<compile_context>
chip_gen: v7x
topology: tpu7x:2x2x1
jax: 0.10.0
libtpu: 0.0.40
codegen_flags: <defaults>
</compile_context>

<pallas_src>
import functools

import jax
import jax.numpy as jnp
from jax import lax
from jax.experimental import pallas as pl
from jax.experimental.pallas import tpu as pltpu


# ----------------------------- kernel helpers -------------------------------

def _stage_activation(x_ref, scale_ref, shift_ref, pad_ref, *, p, H, W, Cin):
    """BN(folded affine) + ReLU in f32, cast once to bf16, write zero-padded into pad_ref.

    All stores to pad_ref cover the full (sublane, lane) extent: the W-padding is composed
    in registers and only whole halo ROWS are zero-stored (halo-only zeroing).
    """
    Wp = W + 2 * p
    x = x_ref[...].astype(jnp.float32)
    act = jnp.maximum(x * scale_ref[...] + shift_ref[...], 0.0)
    # TODO(synk): Dropout2d(dr>0, training) would be a per-channel Bernoulli mask here;
    #             dr=0 / eval mode => identity.
    if p > 0:
        zcol = jnp.zeros((H, p, Cin), jnp.float32)
        act = jnp.concatenate([zcol, act, zcol], axis=1)          # (H, Wp, Cin)
        zrow = jnp.zeros((p, Wp, Cin), pad_ref.dtype)
        pad_ref[0:p, :, :] = zrow                                  # top halo rows
        pad_ref[p + H:p + H + p, :, :] = zrow                      # bottom halo rows
    pad_ref[p:p + H, :, :] = act.astype(pad_ref.dtype)             # interior (+ L/R halo)


def _tap_patch(pad_ref, ky, kx, *, s, Ho, Wo):
    if s == 1:
        return pad_ref[ky:ky + Ho, kx:kx + Wo, :]
    return pad_ref[pl.ds(ky, Ho, stride=s), pl.ds(kx, Wo, stride=s), :]


# ----------------------------- Pallas kernels -------------------------------

def _conv_block_kernel_im2col(x_ref, scale_ref, shift_ref, w_ref, o_ref,
                              pad_ref, col_ref, *, k, s, p, H, W, Cin, Ho, Wo):
    """Cin < 128 path: build im2col once per image, single K=k*k*Cin MXU dot per Cout tile.

    x_ref:     (H, W, Cin)          f32   (batch squeezed)
    scale_ref: (1, 1, Cin)          f32   folded BN scale
    shift_ref: (1, 1, Cin)          f32   folded BN shift
    w_ref:     (k*k*Cin, TCO)       bf16  weights (tap-major rows, lane-dense Cout tile)
    o_ref:     (Ho*Wo, TCO)         f32   output slab (batch squeezed)
    pad_ref:   (H+2p, W+2p, Cin)    bf16  VMEM scratch: padded post-BN/ReLU activation
    col_ref:   (Ho*Wo, k*k*Cin)     bf16  VMEM scratch: im2col slab
    """
    @pl.when(pl.program_id(1) == 0)        # hoisted out of the Cout-tile ("arbitrary") axis
    def _():
        _stage_activation(x_ref, scale_ref, shift_ref, pad_ref, p=p, H=H, W=W, Cin=Cin)
        for ky in range(k):
            for kx in range(k):
                t = ky * k + kx
                patch = _tap_patch(pad_ref, ky, kx, s=s, Ho=Ho, Wo=Wo)
                col_ref[:, t * Cin:(t + 1) * Cin] = patch.reshape(Ho * Wo, Cin)

    o_ref[...] = jnp.dot(col_ref[...], w_ref[...],
                         preferred_element_type=jnp.float32).astype(o_ref.dtype)


def _conv_block_kernel_taps(x_ref, scale_ref, shift_ref, w_ref, o_ref,
                            pad_ref, *, k, s, p, H, W, Cin, Ho, Wo):
    """Cin >= 128 path: tap-wise accumulating MXU dots, accumulated directly in o_ref."""
    @pl.when(pl.program_id(1) == 0)
    def _():
        _stage_activation(x_ref, scale_ref, shift_ref, pad_ref, p=p, H=H, W=W, Cin=Cin)

    for ky in range(k):
        for kx in range(k):
            t = ky * k + kx
            patch = _tap_patch(pad_ref, ky, kx, s=s, Ho=Ho, Wo=Wo)
            a2d = patch.reshape(Ho * Wo, Cin)                       # bf16 already
            contrib = jnp.dot(a2d, w_ref[t * Cin:(t + 1) * Cin, :],
                              preferred_element_type=jnp.float32)
            if t == 0:
                o_ref[...] = contrib                                # no zero-init pass
            else:
                o_ref[...] += contrib


# ----------------------------- wrapper ---------------------------------------

@functools.partial(jax.jit, static_argnames=("k", "s", "p"))
def conv_block_forward(x_nchw, gamma, beta, running_mean, running_var, w_oihw,
                       *, k, s, p, eps=1e-5):
    """ConvBlock forward (inference): BN -> ReLU -> Conv2d(bias=False). NCHW in/out."""
    N, Cin, H, W = x_nchw.shape
    Cout = w_oihw.shape[0]
    Ho = (H + 2 * p - k) // s + 1
    Wo = (W + 2 * p - k) // s + 1
    Hp, Wp = H + 2 * p, W + 2 * p
    KC = k * k * Cin

    # Fold BN (eval mode) into a per-channel affine.
    scale = (gamma / jnp.sqrt(running_var + eps)).astype(jnp.float32)
    shift = (beta - running_mean * scale).astype(jnp.float32)

    # NCHW -> NHWC (channels-last is the lane-friendly layout).
    x_nhwc = jnp.transpose(x_nchw, (0, 2, 3, 1)).astype(jnp.float32)

    # Lane-dense output tiling: 256-wide tiles when Cout > 128 (full MXU width on
    # v6e/v7x, 2 native passes on v5e), single 128 tile otherwise.
    TCO = 256 if Cout > 128 else 128
    Coutp = ((Cout + TCO - 1) // TCO) * TCO
    n_co = Coutp // TCO

    # OIHW -> (k*k*Cin, Coutp) bf16, tap-major rows; zero-pad extra output columns.
    w2d = jnp.transpose(w_oihw, (2, 3, 1, 0)).reshape(KC, Cout)
    w2d = jnp.pad(w2d, ((0, 0), (0, Coutp - Cout))).astype(jnp.bfloat16)

    use_im2col = Cin < 128
    scratch = [pltpu.VMEM((Hp, Wp, Cin), jnp.bfloat16)]     # padded activation staging
    if use_im2col:
        scratch.append(pltpu.VMEM((Ho * Wo, KC), jnp.bfloat16))   # im2col slab
        kernel = functools.partial(_conv_block_kernel_im2col, k=k, s=s, p=p,
                                   H=H, W=W, Cin=Cin, Ho=Ho, Wo=Wo)
    else:
        kernel = functools.partial(_conv_block_kernel_taps, k=k, s=s, p=p,
                                   H=H, W=W, Cin=Cin, Ho=Ho, Wo=Wo)

    out2d = pl.pallas_call(
        kernel,
        out_shape=jax.ShapeDtypeStruct((N, Ho * Wo, Coutp), jnp.float32),
        grid_spec=pltpu.PrefetchScalarGridSpec(
            num_scalar_prefetch=0,
            grid=(N, n_co),
            in_specs=[
                pl.BlockSpec((None, H, W, Cin), lambda n, j: (n, 0, 0, 0)),
                pl.BlockSpec((1, 1, Cin), lambda n, j: (0, 0, 0)),
                pl.BlockSpec((1, 1, Cin), lambda n, j: (0, 0, 0)),
                pl.BlockSpec((KC, TCO), lambda n, j: (0, j)),
            ],
            out_specs=pl.BlockSpec((None, Ho * Wo, TCO), lambda n, j: (n, 0, j)),
            scratch_shapes=scratch,
        ),
        compiler_params=pltpu.CompilerParams(
            # Staging is gated on program_id(1)==0 and reused across Cout tiles, so the
            # Cout axis MUST be "arbitrary"; the batch axis stays "parallel" (megacore).
            dimension_semantics=("parallel", "arbitrary"),
            # Per-step VMEM is well under 32 MiB at these tile sizes; safe on v5e/v6e
            # (128 MiB physical) and v7x (64 MiB physical).
            vmem_limit_bytes=32 * 1024 * 1024,
        ),
    )(x_nhwc, scale.reshape(1, 1, Cin), shift.reshape(1, 1, Cin), w2d)

    out = out2d[:, :, :Cout].reshape(N, Ho, Wo, Cout)
    return jnp.transpose(out, (0, 3, 1, 2))                 # NHWC -> NCHW


# ----------------------------- main ------------------------------------------

if __name__ == "__main__":
    # ConvBlock(inp=4, outp=8, k=3, s=1, p=1, dr=0) on x of shape (2, 4, 16, 16)
    N, Cin, H, W = 2, 4, 16, 16
    Cout, k, s, p = 8, 3, 1, 1

    key = jax.random.PRNGKey(0)
    kx_, kg, kb, km, kv, kw = jax.random.split(key, 6)

    x = jax.random.normal(kx_, (N, Cin, H, W), dtype=jnp.float32)
    gamma = 1.0 + 0.1 * jax.random.normal(kg, (Cin,), dtype=jnp.float32)
    beta = 0.1 * jax.random.normal(kb, (Cin,), dtype=jnp.float32)
    running_mean = 0.05 * jax.random.normal(km, (Cin,), dtype=jnp.float32)
    running_var = 1.0 + 0.1 * jax.random.uniform(kv, (Cin,), dtype=jnp.float32)
    w = 0.1 * jax.random.normal(kw, (Cout, Cin, k, k), dtype=jnp.float32)

    out = conv_block_forward(x, gamma, beta, running_mean, running_var, w, k=k, s=s, p=p)
    out = jax.block_until_ready(out)
    assert out.shape == (N, Cout, H, W), out.shape

    # References: BN(eval) -> ReLU -> conv.  The kernel feeds the MXU in bf16 with f32
    # accumulation, so the tight check uses a bf16-quantized reference; a loose check
    # covers the full-f32 reference.
    scale = gamma / jnp.sqrt(running_var + 1e-5)
    shift = beta - running_mean * scale
    a = jnp.maximum(x * scale[None, :, None, None] + shift[None, :, None, None], 0.0)
    conv = lambda lhs, rhs: lax.conv_general_dilated(
        lhs, rhs, window_strides=(s, s), padding=[(p, p), (p, p)],
        dimension_numbers=("NCHW", "OIHW", "NCHW"))
    ref_q = conv(a.astype(jnp.bfloat16).astype(jnp.float32),
                 w.astype(jnp.bfloat16).astype(jnp.float32))
    ref_f = conv(a, w)
    assert jnp.allclose(out, ref_q, atol=2e-3, rtol=2e-3), \
        float(jnp.max(jnp.abs(out - ref_q)))
    assert jnp.allclose(out, ref_f, atol=5e-2, rtol=5e-2), \
        float(jnp.max(jnp.abs(out - ref_f)))

    print("KERNEL_OK")
</pallas_src>

<mosaic_0001>
module attributes {stable_mosaic.version = 11 : i64} {
  func.func @_conv_block_kernel_im2col(%arg0: i32, %arg1: i32, %arg2: memref<1x16x16x4xf32, #tpu.memory_space<vmem>>, %arg3: memref<1x1x4xf32, #tpu.memory_space<vmem>>, %arg4: memref<1x1x4xf32, #tpu.memory_space<vmem>>, %arg5: memref<36x128xbf16, #tpu.memory_space<vmem>>, %arg6: memref<1x256x128xf32, #tpu.memory_space<vmem>>, %arg7: memref<18x18x4xbf16, #tpu.memory_space<vmem>>, %arg8: memref<256x36xbf16, #tpu.memory_space<vmem>>) attributes {dimension_semantics = [#tpu.dimension_semantics<parallel>, #tpu.dimension_semantics<arbitrary>], iteration_bounds = array<i64: 2, 1>, scalar_prefetch = 0 : i64, scratch_operands = 2 : i64, tpu.core_type = #tpu.core_type<tc>, window_params = [{transform_indices = @transform_0, window_bounds = array<i64: 1, 16, 16, 4>}, {pipeline_mode = #tpu.pipeline_mode<synchronous>, transform_indices = @transform_1, window_bounds = array<i64: 1, 1, 4>}, {pipeline_mode = #tpu.pipeline_mode<synchronous>, transform_indices = @transform_2, window_bounds = array<i64: 1, 1, 4>}, {transform_indices = @transform_3, window_bounds = array<i64: 36, 128>}, {transform_indices = @transform_4, window_bounds = array<i64: 1, 256, 128>}]} {
    %c0_i32 = arith.constant 0 : i32
    %0 = arith.cmpi eq, %arg1, %c0_i32 : i32
    %1 = arith.extui %0 : i1 to i32
    %c0_i32_0 = arith.constant 0 : i32
    %2 = arith.cmpi ne, %1, %c0_i32_0 : i32
    scf.if %2 {
      %c0_7 = arith.constant 0 : index
      %c0_8 = arith.constant 0 : index
      %c0_9 = arith.constant 0 : index
      %c0_10 = arith.constant 0 : index
      %9 = vector.load %arg2[%c0_7, %c0_8, %c0_9, %c0_10] : memref<1x16x16x4xf32, #tpu.memory_space<vmem>>, vector<1x16x16x4xf32>
      %10 = vector.shape_cast %9 : vector<1x16x16x4xf32> to vector<16x16x4xf32>
      %c0_11 = arith.constant 0 : index
      %c0_12 = arith.constant 0 : index
      %c0_13 = arith.constant 0 : index
      %11 = vector.load %arg3[%c0_11, %c0_12, %c0_13] : memref<1x1x4xf32, #tpu.memory_space<vmem>>, vector<1x1x4xf32>
      %12 = vector.broadcast %11 : vector<1x1x4xf32> to vector<16x16x4xf32>
      %13 = arith.mulf %10, %12 : vector<16x16x4xf32>
      %c0_14 = arith.constant 0 : index
      %c0_15 = arith.constant 0 : index
      %c0_16 = arith.constant 0 : index
      %14 = vector.load %arg4[%c0_14, %c0_15, %c0_16] : memref<1x1x4xf32, #tpu.memory_space<vmem>>, vector<1x1x4xf32>
      %15 = vector.broadcast %14 : vector<1x1x4xf32> to vector<16x16x4xf32>
      %16 = arith.addf %13, %15 : vector<16x16x4xf32>
      %cst_17 = arith.constant 0.000000e+00 : f32
      %17 = vector.broadcast %cst_17 : f32 to vector<16x16x4xf32>
      %18 = arith.maximumf %16, %17 : vector<16x16x4xf32>
      %cst_18 = arith.constant 0.000000e+00 : f32
      %19 = vector.broadcast %cst_18 : f32 to vector<16x1x4xf32>
      %20 = tpu.concatenate %19, %18, %19 in 1 : vector<16x1x4xf32>, vector<16x16x4xf32>, vector<16x1x4xf32> -> vector<16x18x4xf32>
      %cst_19 = arith.constant 0.000000e+00 : bf16
      %21 = vector.broadcast %cst_19 : bf16 to vector<1x18x4xbf16>
      %c0_20 = arith.constant 0 : index
      %c0_21 = arith.constant 0 : index
      %c0_22 = arith.constant 0 : index
      %22 = vector.load %arg7[%c0_20, %c0_21, %c0_22] : memref<18x18x4xbf16, #tpu.memory_space<vmem>>, vector<1x18x4xbf16>
      tpu.vector_store %arg7[%c0_20, %c0_21, %c0_22], %21 {strides = array<i32>} : memref<18x18x4xbf16, #tpu.memory_space<vmem>>, vector<1x18x4xbf16>,
      %c17 = arith.constant 17 : index
      %c0_23 = arith.constant 0 : index
      %c0_24 = arith.constant 0 : index
      %23 = vector.load %arg7[%c17, %c0_23, %c0_24] : memref<18x18x4xbf16, #tpu.memory_space<vmem>>, vector<1x18x4xbf16>
      tpu.vector_store %arg7[%c17, %c0_23, %c0_24], %21 {strides = array<i32>} : memref<18x18x4xbf16, #tpu.memory_space<vmem>>, vector<1x18x4xbf16>,
      %24 = arith.truncf %20 : vector<16x18x4xf32> to vector<16x18x4xbf16>
      %c1 = arith.constant 1 : index
      %c0_25 = arith.constant 0 : index
      %c0_26 = arith.constant 0 : index
      %25 = vector.load %arg7[%c1, %c0_25, %c0_26] : memref<18x18x4xbf16, #tpu.memory_space<vmem>>, vector<16x18x4xbf16>
      tpu.vector_store %arg7[%c1, %c0_25, %c0_26], %24 {strides = array<i32>} : memref<18x18x4xbf16, #tpu.memory_space<vmem>>, vector<16x18x4xbf16>,
      %c0_27 = arith.constant 0 : index
      %c0_28 = arith.constant 0 : index
      %c0_29 = arith.constant 0 : index
      %26 = vector.load %arg7[%c0_27, %c0_28, %c0_29] : memref<18x18x4xbf16, #tpu.memory_space<vmem>>, vector<16x16x4xbf16>
      %27 = vector.shape_cast %26 : vector<16x16x4xbf16> to vector<256x4xbf16>
      %c0_30 = arith.constant 0 : index
      %c0_31 = arith.constant 0 : index
      %28 = vector.load %arg8[%c0_30, %c0_31] : memref<256x36xbf16, #tpu.memory_space<vmem>>, vector<256x4xbf16>
      tpu.vector_store %arg8[%c0_30, %c0_31], %27 {strides = array<i32>} : memref<256x36xbf16, #tpu.memory_space<vmem>>, vector<256x4xbf16>,
      %c0_32 = arith.constant 0 : index
      %c1_33 = arith.constant 1 : index
      %c0_34 = arith.constant 0 : index
      %29 = vector.load %arg7[%c0_32, %c1_33, %c0_34] : memref<18x18x4xbf16, #tpu.memory_space<vmem>>, vector<16x16x4xbf16>
      %30 = vector.shape_cast %29 : vector<16x16x4xbf16> to vector<256x4xbf16>
      %c0_35 = arith.constant 0 : index
      %c4 = arith.constant 4 : index
      %31 = vector.load %arg8[%c0_35, %c4] : memref<256x36xbf16, #tpu.memory_space<vmem>>, vector<256x4xbf16>
      tpu.vector_store %arg8[%c0_35, %c4], %30 {strides = array<i32>} : memref<256x36xbf16, #tpu.memory_space<vmem>>, vector<256x4xbf16>,
      %c0_36 = arith.constant 0 : index
      %c2 = arith.constant 2 : index
      %c0_37 = arith.constant 0 : index
      %32 = vector.load %arg7[%c0_36, %c2, %c0_37] : memref<18x18x4xbf16, #tpu.memory_space<vmem>>, vector<16x16x4xbf16>
      %33 = vector.shape_cast %32 : vector<16x16x4xbf16> to vector<256x4xbf16>
      %c0_38 = arith.constant 0 : index
      %c8 = arith.constant 8 : index
      %34 = vector.load %arg8[%c0_38, %c8] : memref<256x36xbf16, #tpu.memory_space<vmem>>, vector<256x4xbf16>
      tpu.vector_store %arg8[%c0_38, %c8], %33 {strides = array<i32>} : memref<256x36xbf16, #tpu.memory_space<vmem>>, vector<256x4xbf16>,
      %c1_39 = arith.constant 1 : index
      %c0_40 = arith.constant 0 : index
      %c0_41 = arith.constant 0 : index
      %35 = vector.load %arg7[%c1_39, %c0_40, %c0_41] : memref<18x18x4xbf16, #tpu.memory_space<vmem>>, vector<16x16x4xbf16>
      %36 = vector.shape_cast %35 : vector<16x16x4xbf16> to vector<256x4xbf16>
      %c0_42 = arith.constant 0 : index
      %c12 = arith.constant 12 : index
      %37 = vector.load %arg8[%c0_42, %c12] : memref<256x36xbf16, #tpu.memory_space<vmem>>, vector<256x4xbf16>
      tpu.vector_store %arg8[%c0_42, %c12], %36 {strides = array<i32>} : memref<256x36xbf16, #tpu.memory_space<vmem>>, vector<256x4xbf16>,
      %c1_43 = arith.constant 1 : index
      %c1_44 = arith.constant 1 : index
      %c0_45 = arith.constant 0 : index
      %38 = vector.load %arg7[%c1_43, %c1_44, %c0_45] : memref<18x18x4xbf16, #tpu.memory_space<vmem>>, vector<16x16x4xbf16>
      %39 = vector.shape_cast %38 : vector<16x16x4xbf16> to vector<256x4xbf16>
      %c0_46 = arith.constant 0 : index
      %c16 = arith.constant 16 : index
      %40 = vector.load %arg8[%c0_46, %c16] : memref<256x36xbf16, #tpu.memory_space<vmem>>, vector<256x4xbf16>
      tpu.vector_store %arg8[%c0_46, %c16], %39 {strides = array<i32>} : memref<256x36xbf16, #tpu.memory_space<vmem>>, vector<256x4xbf16>,
      %c1_47 = arith.constant 1 : index
      %c2_48 = arith.constant 2 : index
      %c0_49 = arith.constant 0 : index
      %41 = vector.load %arg7[%c1_47, %c2_48, %c0_49] : memref<18x18x4xbf16, #tpu.memory_space<vmem>>, vector<16x16x4xbf16>
      %42 = vector.shape_cast %41 : vector<16x16x4xbf16> to vector<256x4xbf16>
      %c0_50 = arith.constant 0 : index
      %c20 = arith.constant 20 : index
      %43 = vector.load %arg8[%c0_50, %c20] : memref<256x36xbf16, #tpu.memory_space<vmem>>, vector<256x4xbf16>
      tpu.vector_store %arg8[%c0_50, %c20], %42 {strides = array<i32>} : memref<256x36xbf16, #tpu.memory_space<vmem>>, vector<256x4xbf16>,
      %c2_51 = arith.constant 2 : index
      %c0_52 = arith.constant 0 : index
      %c0_53 = arith.constant 0 : index
      %44 = vector.load %arg7[%c2_51, %c0_52, %c0_53] : memref<18x18x4xbf16, #tpu.memory_space<vmem>>, vector<16x16x4xbf16>
      %45 = vector.shape_cast %44 : vector<16x16x4xbf16> to vector<256x4xbf16>
      %c0_54 = arith.constant 0 : index
      %c24 = arith.constant 24 : index
      %46 = vector.load %arg8[%c0_54, %c24] : memref<256x36xbf16, #tpu.memory_space<vmem>>, vector<256x4xbf16>
      tpu.vector_store %arg8[%c0_54, %c24], %45 {strides = array<i32>} : memref<256x36xbf16, #tpu.memory_space<vmem>>, vector<256x4xbf16>,
      %c2_55 = arith.constant 2 : index
      %c1_56 = arith.constant 1 : index
      %c0_57 = arith.constant 0 : index
      %47 = vector.load %arg7[%c2_55, %c1_56, %c0_57] : memref<18x18x4xbf16, #tpu.memory_space<vmem>>, vector<16x16x4xbf16>
      %48 = vector.shape_cast %47 : vector<16x16x4xbf16> to vector<256x4xbf16>
      %c0_58 = arith.constant 0 : index
      %c28 = arith.constant 28 : index
      %49 = vector.load %arg8[%c0_58, %c28] : memref<256x36xbf16, #tpu.memory_space<vmem>>, vector<256x4xbf16>
      tpu.vector_store %arg8[%c0_58, %c28], %48 {strides = array<i32>} : memref<256x36xbf16, #tpu.memory_space<vmem>>, vector<256x4xbf16>,
      %c2_59 = arith.constant 2 : index
      %c2_60 = arith.constant 2 : index
      %c0_61 = arith.constant 0 : index
      %50 = vector.load %arg7[%c2_59, %c2_60, %c0_61] : memref<18x18x4xbf16, #tpu.memory_space<vmem>>, vector<16x16x4xbf16>
      %51 = vector.shape_cast %50 : vector<16x16x4xbf16> to vector<256x4xbf16>
      %c0_62 = arith.constant 0 : index
      %c32 = arith.constant 32 : index
      %52 = vector.load %arg8[%c0_62, %c32] : memref<256x36xbf16, #tpu.memory_space<vmem>>, vector<256x4xbf16>
      tpu.vector_store %arg8[%c0_62, %c32], %51 {strides = array<i32>} : memref<256x36xbf16, #tpu.memory_space<vmem>>, vector<256x4xbf16>,
    } else {
    }
    %c0 = arith.constant 0 : index
    %c0_1 = arith.constant 0 : index
    %3 = vector.load %arg8[%c0, %c0_1] : memref<256x36xbf16, #tpu.memory_space<vmem>>, vector<256x36xbf16>
    %c0_2 = arith.constant 0 : index
    %c0_3 = arith.constant 0 : index
    %4 = vector.load %arg5[%c0_2, %c0_3] : memref<36x128xbf16, #tpu.memory_space<vmem>>, vector<36x128xbf16>
    %cst = arith.constant dense<0.000000e+00> : vector<256x128xf32>
    %5 = tpu.matmul %3, %4, %cst {dimension_numbers = #tpu.dot_dimension_numbers<[1], [0], [0], [1], [0, 0, 1, 1], [], []>} : vector<256x36xbf16>, vector<36x128xbf16>, vector<256x128xf32> -> vector<256x128xf32>
    %c0_4 = arith.constant 0 : index
    %c0_5 = arith.constant 0 : index
    %c0_6 = arith.constant 0 : index
    %6 = vector.load %arg6[%c0_4, %c0_5, %c0_6] : memref<1x256x128xf32, #tpu.memory_space<vmem>>, vector<1x256x128xf32>
    %7 = vector.shape_cast %6 : vector<1x256x128xf32> to vector<256x128xf32>
    %8 = vector.shape_cast %5 : vector<256x128xf32> to vector<1x256x128xf32>
    tpu.vector_store %arg6[%c0_4, %c0_5, %c0_6], %8 {strides = array<i32>} : memref<1x256x128xf32, #tpu.memory_space<vmem>>, vector<1x256x128xf32>,
    return
  }
  func.func @transform_0(%arg0: i32, %arg1: i32) -> (i32, i32, i32, i32) {
    %c0_i32 = arith.constant 0 : i32
    %c0_i32_0 = arith.constant 0 : i32
    %c0_i32_1 = arith.constant 0 : i32
    %c0_i32_2 = arith.constant 0 : i32
    return %arg0, %c0_i32, %c0_i32_0, %c0_i32_1 : i32, i32, i32, i32
  }
  func.func @transform_1(%arg0: i32, %arg1: i32) -> (i32, i32, i32) {
    %c0_i32 = arith.constant 0 : i32
    %c0_i32_0 = arith.constant 0 : i32
    %c0_i32_1 = arith.constant 0 : i32
    %c0_i32_2 = arith.constant 0 : i32
    return %c0_i32, %c0_i32_0, %c0_i32_1 : i32, i32, i32
  }
  func.func @transform_2(%arg0: i32, %arg1: i32) -> (i32, i32, i32) {
    %c0_i32 = arith.constant 0 : i32
    %c0_i32_0 = arith.constant 0 : i32
    %c0_i32_1 = arith.constant 0 : i32
    %c0_i32_2 = arith.constant 0 : i32
    return %c0_i32, %c0_i32_0, %c0_i32_1 : i32, i32, i32
  }
  func.func @transform_3(%arg0: i32, %arg1: i32) -> (i32, i32) {
    %c0_i32 = arith.constant 0 : i32
    %c0_i32_0 = arith.constant 0 : i32
    return %c0_i32, %arg1 : i32, i32
  }
  func.func @transform_4(%arg0: i32, %arg1: i32) -> (i32, i32, i32) {
    %c0_i32 = arith.constant 0 : i32
    %c0_i32_0 = arith.constant 0 : i32
    return %arg0, %c0_i32, %arg1 : i32, i32, i32
  }
}

</mosaic_0001>

<bundles_post_ra>
// kernel: conv_block_forward.1
= control target key start
LH: loop header
LB: loop body
LE: loop exit
PB: predicated region body
PF: predicated region fallthrough
CT: control target
= control target key end

     0   :  { %s4822_s15 = smov 0   ;;  %s4824_s16 = smov 0   ;;  %s6079_s0 = inlined_call_operand.vmem [shape: f32[2,16,16,4], index: 0, kind: input, shape index: {}]   ;;  %s6080_s1 = inlined_call_operand.vmem [shape: f32[1,1,4], index: 1, kind: input, shape index: {}]   ;;  %s6081_s2 = inlined_call_operand.vmem [shape: f32[1,1,4], index: 2, kind: input, shape index: {}]   ;;  %s6082_s3 = inlined_call_operand.vmem [shape: bf16[36,128], index: 3, kind: input, shape index: {}]   ;;  %s6083_s4 = inlined_call_operand.vmem [shape: f32[2,256,128], index: 4, kind: output, shape index: {}]  }
   0x1   :  { %s4826_s17 = smov 0  }
   0x2 LB: > { %s26_s18 = sadd.s32 1, %s4782_s16  ;;  %p4293_p0 = scmp.ge.s32.totalorder %s4786_s17, 1  ;;  %s4786_s17 = sphi %s4826_s17, %s14_s17   ;;  %s4782_s16 = sphi %s4824_s16, %s6089_s16   ;;  %s4778_s15 = sphi %s4822_s15, %s6088_s15  }
   0x3   : > { %p28_p1 = scmp.ge.s32.totalorder %s26_s18, 2  ;;  %p185_p2 = scmp.lt.s32.totalorder %s4786_s17, 3 }
   0x5   : > { %s6091_s18 = smov (%p28_p1, %s26_s18), 0  ;;  %p186_p3 = pnand %p4293_p0, %p185_p2 }
   0x6   : > { %vm543_vm0 = vcmask (!%p186_p3), 27648   ;;  %vm546_vm1 = vcmask (!%p186_p3), 24576   ;;  %v4788_v0 = vmov (!%p186_p3), 0   ;;  %p218_p4 = scmp.lt.s32.totalorder (!%p186_p3), %s4778_s15, 1  ;;  %vm1598_vm2 = vcmask (!%p186_p3), 1042432   ;;  %s4789_s27 = smov (!%p186_p3), 8  }
   0x7   : > { %189 = sbr.rel (%p186_p3) target bundleno = 715 (0x2cb), region = 36  ;;  %544 = vst.msk [vmem:[#allocation2] sm:$0xf] (!%p186_p3), %vm543_vm0, %v4788_v0  ;;  %545 = vst.msk [vmem:[#allocation2 + $0x4] sm:$0xf] (!%p186_p3), %vm543_vm0, %v4788_v0  ;;  %vm1599_vm3 = vcmask (!%p186_p3), 1046532  }
   0x8   : > { %547 = vst.msk [vmem:[#allocation2 + $0x8] sm:$0x1] (!%p186_p3), %vm546_vm1, %v4788_v0  ;;  %551 = vst.msk [vmem:[#allocation2 + $0xd4] sm:$0x1] (!%p186_p3), %vm546_vm1, %v4788_v0  ;;  %v4852_v1 = vld [vmem:[%s6080_s1] ss:$0 sm:$0xff] (!%p186_p3) }
   0x9   : > { %549 = vst.msk [vmem:[#allocation2 + $0xcc] sm:$0xf] (!%p186_p3), %vm543_vm0, %v4788_v0  ;;  %550 = vst.msk [vmem:[#allocation2 + $0xd0] sm:$0xf] (!%p186_p3), %vm543_vm0, %v4788_v0  ;;  %vm1002_vm5 = vsmask.f32 (!%p186_p3), 3328 }
   0xa   : > { %vm4854_vm4 = vmor (!%p186_p3), %vm1598_vm2, %vm1599_vm3  ;;  %v4868_v3 = vld [vmem:[%s6081_s2] ss:$0 sm:$0xff] (!%p186_p3)  ;;  %vm1003_vm6 = vsmask.f32 (!%p186_p3), 7440  ;;  %vm414_vm7 = vcmask (!%p186_p3), 1040384   ;;  %s4790_s28 = smov (!%p186_p3), 4  }
   0xb   : > { %vm4887_vm8 = vmor (!%p186_p3), %vm1002_vm5, %vm1003_vm6  ;;  %s4791_s29 = smov (!%p186_p3), 12   ;;  %s4792_s30 = smov (!%p186_p3), 20   ;;  %vm937_vm9 = vcmask (!%p186_p3), 31744   ;;  %vm1485_vm10 = vcmask (!%p186_p3), 64544   ;;  %vm1809_vm11 = vcmask (!%p186_p3), 97344   ;;  %vm1986_vm12 = vcmask (!%p186_p3), 130144  }
   0xc   : > { %s4793_s5 = smov (!%p186_p3), 16   ;;  %s4794_s6 = smov (!%p186_p3), 24   ;;  %vm2531_vm13 = vcmask (!%p186_p3), 162944   ;;  %vm2852_vm14 = vcmask (!%p186_p3), 195744   ;;  %vm3030_vm15 = vcmask (!%p186_p3), 228544   ;;  %vm3575_vm2 = vcmask (!%p186_p3), 261344  }
   0xd   : > { %s4795_s7 = smov (!%p186_p3), 28   ;;  %s4796_s8 = smov (!%p186_p3), 32   ;;  %vm3896_vm3 = vcmask (!%p186_p3), 294144   ;;  %vm3949_vm5 = vcmask (!%p186_p3), 293888   ;;  %vm3998_vm6 = vcmask (!%p186_p3), 1041408  }
   0xe   : > { %s6093_s15 = smov (!%p218_p4, %s4778_s15), 1  ;;  %v1502_v7 = vld [vmem:[#allocation2] sm:$0xe]  ;;  %v1503_v8 = vld [vmem:[#allocation2 + $0x4] sm:$0xf] }
   0xf   : > { %s4561_s19 = sshll.u32 %s6093_s15, 8  ;;  %v1504_v9 = vld [vmem:[#allocation2 + $0x8] sm:$0x1]  ;;  %v4380_v12 = vrot.slane %v1502_v7, 9  ;;  %v1603_v13 = vrot.slane %v1503_v8, 5 }
  0x10   : > { %s4863_s24 = scalar_lea.vmem %s6079_s0, %s4561_s19  ;;  %v1606_v14 = vrot.slane %v1504_v9, 5  ;;  %v954_v15 = vld [vmem:[#allocation2] sm:$0xf]  ;;  %v955_v17 = vld [vmem:[#allocation2 + $0x4] sm:$0xf] }
  0x11   : > { %v256_v4 = vld [vmem:[%s4863_s24 + $0x80] sm:$0xff]  ;;  %v257_v5 = vld [vmem:[%s4863_s24 + $0x88] sm:$0xff]  ;;  %v1006_v19 = vshrl.u32 %v954_v15, 16  ;;  %v1009_v20 = vshll.u32 %v954_v15, 16  ;;  %v1604_v23 = vsel %vm4854_vm4, %v4380_v12, %v1603_v13  ;;  %v1605_v24 = vrot.slane %v1603_v13, 4  ;;  %v258_v36 = vld [vmem:[%s4863_s24 + $0x90] sm:$0xff] }
  0x12   : > { %v240_v6 = vld [vmem:[%s4863_s24] sm:$0xff]  ;;  %v295_v10 = vmul.f32 %v4852_v1, %v256_v4  ;;  %v296_v11 = vmul.f32 %v4852_v1, %v257_v5  ;;  %v956_v18 = vld [vmem:[#allocation2 + $0x8] sm:$0x1]  ;;  %v1015_v25 = vshll.u32 %v955_v17, 16  ;;  %v1019_v26 = vshrl.u32 %v955_v17, 16  ;;  %v259_v37 = vld [vmem:[%s4863_s24 + $0x98] sm:$0xff] }
  0x13   : > { %v279_v16 = vmul.f32 %v4852_v1, %v240_v6  ;;  %v1008_v27 = vrot.slane %v1006_v19, 4  ;;  %v1011_v28 = vrot.slane %v1009_v20, 5  ;;  %v1025_v29 = vshll.u32 %v956_v18, 16  ;;  %v241_v31 = vld [vmem:[%s4863_s24 + $0x8] sm:$0xff]  ;;  %v242_v47 = vld [vmem:[%s4863_s24 + $0x10] sm:$0xff]  ;;  %v243_v48 = vld [vmem:[%s4863_s24 + $0x18] sm:$0xff] }
  0x14   : > { %v334_v21 = vadd.f32 %v4868_v3, %v295_v10  ;;  %v335_v22 = vadd.f32 %v4868_v3, %v296_v11  ;;  %v1607_v32 = vsel %vm4854_vm4, %v1605_v24, %v1606_v14  ;;  %v1017_v33 = vrot.slane %v1015_v25, 5  ;;  %v254_v61 = vld [vmem:[%s4863_s24 + $0x70] sm:$0xff]  ;;  %v255_v5 = vld [vmem:[%s4863_s24 + $0x78] sm:$0xff] }
  0x15   : > { %v1021_v34 = vrot.slane %v1019_v26, 4  ;;  %v4396_v38 = vcombine.low %v1604_v23, %v1607_v32  ;;  %v1012_v39 = vor.u32 %v1011_v28, %v1008_v27  ;;  %v1027_v40 = vrot.slane %v1025_v29, 5  ;;  %v244_v26 = vld [vmem:[%s4863_s24 + $0x20] sm:$0xff] }
  0x16   : > { %v366_v30 = vmax.f32 %v334_v21, 0.0  ;;  %v367_v35 = vmax.f32 %v335_v22, 0.0  ;;  %v280_v45 = vmul.f32 %v4852_v1, %v241_v31  ;;  %v318_v46 = vadd.f32 %v4868_v3, %v279_v16 }
  0x17   : > { %v1022_v43 = vor.u32 %v1021_v34, %v1017_v33  ;;  %1761 = vrot.lane.b32.xlu0 %v4396_v38, %s4789_s27  ;;  %v1013_v49 = vrot.slane %v1012_v39, 4  ;;  %v297_v51 = vmul.f32 %v4852_v1, %v258_v36  ;;  %v298_v52 = vmul.f32 %v4852_v1, %v259_v37 }
  0x18   : > { %v439_v41 = vrot.slane %v366_v30, 7  ;;  %v440_v44 = vrot.slane %v367_v35, 7  ;;  %v319_v60 = vadd.f32 %v4868_v3, %v280_v45  ;;  %v350_v63 = vmax.f32 %v318_v46, 0.0 }
  0x19   : > { %v1023_v53 = vrot.slane %v1022_v43, 4  ;;  %v1018_v57 = vsel %vm4887_vm8, %v1013_v49, %v1017_v33  ;;  %v336_v0 = vadd.f32 %v4868_v3, %v297_v51  ;;  %v337_v4 = vadd.f32 %v4868_v3, %v298_v52 }
  0x1a   : > { %v519_v50 = vsel %vm414_vm7, 0.0, %v439_v41  ;;  %v441_v54 = vsel %vm414_vm7, %v439_v41, %v440_v44  ;;  %v535_v55 = vsel %vm414_vm7, %v440_v44, 0.0  ;;  %v351_v7 = vmax.f32 %v319_v60, 0.0 }
  0x1b   : > { %v4587_v56 = vpack.c.bf16 %v519_v50, %v519_v50  ;;  %v4588_v58 = vpack.c.bf16 %v441_v54, %v441_v54  ;;  %v4589_v59 = vpack.c.bf16 %v535_v55, %v535_v55  ;;  %v1028_v62 = vsel %vm4887_vm8, %v1023_v53, %v1027_v40 }
  0x1c   : > { %v4364_v6 = vcombine.low %v1018_v57, %v1028_v62  ;;  %v281_v8 = vmul.f32 %v4852_v1, %v242_v47  ;;  %v282_v9 = vmul.f32 %v4852_v1, %v243_v48  ;;  %v415_v10 = vrot.slane %v350_v63, 7  ;;  %v245_v48 = vld [vmem:[%s4863_s24 + $0x28] sm:$0xff] }
  0x1d   : > { %785 = vst.msk [vmem:[#allocation2 + $0x6c] sm:$0xf] %vm543_vm0, %v4587_v56  ;;  %786 = vst.msk [vmem:[#allocation2 + $0x70] sm:$0xf] %vm543_vm0, %v4588_v58  ;;  %v368_v11 = vmax.f32 %v336_v0, 0.0  ;;  %v369_v12 = vmax.f32 %v337_v4, 0.0  ;;  %v293_v13 = vmul.f32 %v4852_v1, %v254_v61  ;;  %v294_v17 = vmul.f32 %v4852_v1, %v255_v5 }
  0x1e   : > { %787 = vst.msk [vmem:[#allocation2 + $0x74] sm:$0x1] %vm546_vm1, %v4589_v59  ;;  %1437 = vrot.lane.b32.xlu0 %v4364_v6, %s4790_s28  ;;  %v416_v14 = vrot.slane %v351_v7, 7  ;;  %v320_v15 = vadd.f32 %v4868_v3, %v281_v8  ;;  %v321_v16 = vadd.f32 %v4868_v3, %v282_v9  ;;  %v511_v18 = vsel %vm414_vm7, 0.0, %v415_v10  ;;  %v260_v0 = vld [vmem:[%s4863_s24 + $0xa0] sm:$0xff]  ;;  %v261_v4 = vld [vmem:[%s4863_s24 + $0xa8] sm:$0xff] }
  0x1f   : > { %v442_v19 = vrot.slane %v368_v11, 7  ;;  %v4921_v20 = vrot.slane %v369_v12, 7  ;;  %v332_v21 = vadd.f32 %v4868_v3, %v293_v13  ;;  %v4563_v23 = vpack.c.bf16 %v511_v18, %v511_v18 }
  0x20   : > { %v417_v22 = vsel %vm414_vm7, %v415_v10, %v416_v14  ;;  %v352_v24 = vmax.f32 %v320_v15, 0.0  ;;  %v353_v25 = vmax.f32 %v321_v16, 0.0  ;;  %v333_v30 = vadd.f32 %v4868_v3, %v294_v17 }
  0x21   : > { %v4564_v27 = vpack.c.bf16 %v417_v22, %v417_v22  ;;  %v444_v28 = vsel %vm414_vm7, %v442_v19, %v4921_v20  ;;  %v520_v29 = vsel %vm414_vm7, 0.0, %v442_v19  ;;  %761 = vst.msk [vmem:[#allocation2 + $0xc] sm:$0xf] %vm543_vm0, %v4563_v23  ;;  %v364_v37 = vmax.f32 %v332_v21, 0.0  ;;  %v246_v21 = vld [vmem:[%s4863_s24 + $0x30] sm:$0xff]  ;;  %v247_v22 = vld [vmem:[%s4863_s24 + $0x38] sm:$0xff] }
  0x22   : > { %v4590_v31 = vpack.c.bf16 %v520_v29, %v520_v29  ;;  %v4591_v32 = vpack.c.bf16 %v444_v28, %v444_v28  ;;  %v418_v33 = vrot.slane %v352_v24, 7  ;;  %v4931_v34 = vrot.slane %v353_v25, 7  ;;  %v262_v28 = vld [vmem:[%s4863_s24 + $0xb0] sm:$0xff] }
  0x23   : > { %762 = vst.msk [vmem:[#allocation2 + $0x10] sm:$0xf] %vm543_vm0, %v4564_v27  ;;  %v365_v38 = vmax.f32 %v333_v30, 0.0  ;;  %v527_v39 = vsel %vm414_vm7, %v416_v14, 0.0  ;;  %v283_v40 = vmul.f32 %v4852_v1, %v244_v26  ;;  %v436_v51 = vrot.slane %v364_v37, 7 }
  0x24   : > { %v1529_v35 = vld [vmem:[#allocation2 + $0x6c] sm:$0xe]  ;;  %788 = vst.msk [vmem:[#allocation2 + $0x78] sm:$0xf] %vm543_vm0, %v4590_v31  ;;  %789 = vst.msk [vmem:[#allocation2 + $0x7c] sm:$0xf] %vm543_vm0, %v4591_v32  ;;  %v420_v41 = vsel %vm414_vm7, %v418_v33, %v4931_v34  ;;  %v4565_v44 = vpack.c.bf16 %v527_v39, %v527_v39  ;;  %v284_v13 = vmul.f32 %v4852_v1, %v245_v48 }
  0x25   : > { %v4709_v36 = vld [vmem:[#allocation2 + $0x6c] sm:$0xff]   ;;  %v512_v43 = vsel %vm414_vm7, 0.0, %v418_v33  ;;  %v1531_v46 = vld [vmem:[#allocation2 + $0x74] sm:$0x1]  ;;  %v4389_v47 = vrot.slane %v1529_v35, 9  ;;  %v4567_v50 = vpack.c.bf16 %v420_v41, %v420_v41  ;;  %v437_v52 = vrot.slane %v365_v38, 7 }
  0x26   : > { %v1530_v45 = vld [vmem:[#allocation2 + $0x70] sm:$0xf]  ;;  %1954 = vrot.lane.b32.xlu1 %v4709_v36, %s4791_s29  ;;  %v4566_v49 = vpack.c.bf16 %v512_v43, %v512_v43  ;;  %v2572_v53 = vld [vmem:[#allocation2 + $0x6c] sm:$0xe]  ;;  %763 = vst.msk [vmem:[#allocation2 + $0x14] sm:$0x1] %vm546_vm1, %v4565_v44  ;;  %v4964_v17 = vadd.f32 %v4868_v3, %v283_v40  ;;  %v299_v18 = vmul.f32 %v4852_v1, %v260_v0 }
  0x27   : > { %v2573_v54 = vld [vmem:[#allocation2 + $0x70] sm:$0xf]  ;;  %v1666_v55 = vrot.slane %v1530_v45, 5  ;;  %v1669_v56 = vrot.slane %v1531_v46, 5  ;;  %v2574_v57 = vld [vmem:[#allocation2 + $0x74] sm:$0x1]  ;;  %v438_v60 = vsel %vm414_vm7, %v436_v51, %v437_v52  ;;  %v300_v19 = vmul.f32 %v4852_v1, %v261_v4 }
  0x28   : > { %v4452_v58 = vrot.slane %v2572_v53, 9  ;;  %v2702_v59 = vrot.slane %v2573_v54, 5  ;;  %764 = vst.msk [vmem:[#allocation2 + $0x18] sm:$0xf] %vm543_vm0, %v4566_v49  ;;  %765 = vst.msk [vmem:[#allocation2 + $0x1c] sm:$0xf] %vm543_vm0, %v4567_v50  ;;  %v4585_v6 = vpack.c.bf16 %v438_v60, %v438_v60  ;;  %v4979_v27 = vadd.f32 %v4868_v3, %v284_v13 }
  0x29   : > { %v518_v61 = vsel %vm414_vm7, 0.0, %v436_v51  ;;  %v534_v62 = vsel %vm414_vm7, %v437_v52, 0.0  ;;  %v2705_v63 = vrot.slane %v2574_v57, 5  ;;  %v4953_v8 = vsel %vm4854_vm4, %v4389_v47, %v1666_v55  ;;  %v1505_v9 = vld [vmem:[#allocation2 + $0xc] sm:$0xe] }
  0x2a   : > { %v4584_v5 = vpack.c.bf16 %v518_v61, %v518_v61  ;;  %v4586_v7 = vpack.c.bf16 %v534_v62, %v534_v62  ;;  %v1668_v10 = vrot.slane %v1666_v55, 4  ;;  %v4957_v11 = vsel %vm4854_vm4, %v4452_v58, %v2702_v59  ;;  %v4710_v14 = vld [vmem:[#allocation2 + $0xc] sm:$0xff]   ;;  %783 = vst.msk [vmem:[#allocation2 + $0x64] sm:$0xf] %vm543_vm0, %v4585_v6 }
  0x2b   : > { %v2704_v12 = vrot.slane %v2702_v59, 4  ;;  %v1506_v15 = vld [vmem:[#allocation2 + $0x10] sm:$0xf]  ;;  %v4381_v16 = vrot.slane %v1505_v9, 9  ;;  %v4711_v23 = vld [vmem:[#allocation2 + $0x78] sm:$0xff]   ;;  %1938 = vrot.lane.b32.xlu0 %v4710_v14, %s4791_s29  ;;  %v528_v33 = vsel %vm414_vm7, %v4931_v34, 0.0  ;;  %v4995_v46 = vadd.f32 %v4868_v3, %v299_v18 }
  0x2c   : > { %782 = vst.msk [vmem:[#allocation2 + $0x60] sm:$0xf] %vm543_vm0, %v4584_v5  ;;  %v1610_v24 = vrot.slane %v1506_v15, 5  ;;  %v4972_v25 = vsel %vm4854_vm4, %v1668_v10, %v1669_v56  ;;  %v2548_v30 = vld [vmem:[#allocation2 + $0xc] sm:$0xe]  ;;  %v536_v35 = vsel %vm414_vm7, %v4921_v20, 0.0  ;;  %1956 = vrot.lane.b32.xlu1 %v4711_v23, %s4791_s29  ;;  %v4568_v41 = vpack.c.bf16 %v528_v33, %v528_v33 }
  0x2d   : > { %784 = vst.msk [vmem:[#allocation2 + $0x68] sm:$0x1] %vm546_vm1, %v4586_v7  ;;  %v4976_v26 = vsel %vm4854_vm4, %v2704_v12, %v2705_v63  ;;  %v4405_v29 = vcombine.low %v4953_v8, %v4972_v25  ;;  %v2549_v31 = vld [vmem:[#allocation2 + $0x10] sm:$0xf]  ;;  %v1507_v36 = vld [vmem:[#allocation2 + $0x14] sm:$0x1]  ;;  %v4592_v45 = vpack.c.bf16 %v536_v35, %v536_v35  ;;  %v4998_v34 = vadd.f32 %v4868_v3, %v300_v19 }
  0x2e   : > { %v4468_v32 = vcombine.low %v4957_v11, %v4976_v26  ;;  %v1611_v37 = vsel %vm4854_vm4, %v4381_v16, %v1610_v24  ;;  %v1612_v38 = vrot.slane %v1610_v24, 4  ;;  %v2550_v39 = vld [vmem:[#allocation2 + $0x14] sm:$0x1]  ;;  %v4444_v40 = vrot.slane %v2548_v30, 9  ;;  %766 = vst.msk [vmem:[#allocation2 + $0x20] sm:$0x1] %vm546_vm1, %v4568_v41 }
  0x2f   : > { %v4712_v43 = vld [vmem:[#allocation2 + $0x18] sm:$0xff]   ;;  %v1613_v44 = vrot.slane %v1507_v36, 5  ;;  %v2646_v20 = vrot.slane %v2549_v31, 5  ;;  %v2649_v47 = vrot.slane %v2550_v39, 5  ;;  %v285_v50 = vmul.f32 %v4852_v1, %v246_v21  ;;  %790 = vst.msk [vmem:[#allocation2 + $0x80] sm:$0x1] %vm546_vm1, %v4592_v45 }
  0x30   : > { %v2551_v48 = vld [vmem:[#allocation2 + $0x18] sm:$0xe]  ;;  %v2552_v49 = vld [vmem:[#allocation2 + $0x1c] sm:$0xf]  ;;  %v286_v51 = vmul.f32 %v4852_v1, %v247_v22  ;;  %1940 = vrot.lane.b32.xlu0 %v4712_v43, %s4791_s29  ;;  %v5008_v57 = vmul.f32 %v4852_v1, %v262_v28  ;;  %v2003_v31 = vld [vmem:[#allocation2 + $0xc] sm:$0xf] }
  0x31   : > { %v1614_v52 = vsel %vm4854_vm4, %v1612_v38, %v1613_v44  ;;  %v4445_v53 = vrot.slane %v2551_v48, 9  ;;  %v2653_v54 = vrot.slane %v2552_v49, 5  ;;  %v2575_v55 = vld [vmem:[#allocation2 + $0x78] sm:$0xe]  ;;  %v2576_v56 = vld [vmem:[#allocation2 + $0x7c] sm:$0xf]  ;;  %v2647_v62 = vsel %vm4854_vm4, %v4444_v40, %v2646_v20 }
  0x32   : > { %v1527_v59 = vld [vmem:[#allocation2 + $0x64] sm:$0xf]  ;;  %v4397_v61 = vcombine.low %v1611_v37, %v1614_v52  ;;  %v5013_v63 = vadd.f32 %v4868_v3, %v285_v50  ;;  %v5016_v0 = vadd.f32 %v4868_v3, %v286_v51  ;;  %v2648_v7 = vrot.slane %v2646_v20, 4  ;;  %v2004_v48 = vld [vmem:[#allocation2 + $0x10] sm:$0xf] }
  0x33   : > { %v1526_v58 = vld [vmem:[#allocation2 + $0x60] sm:$0xe]  ;;  %v1659_v5 = vrot.slane %v1527_v59, 5  ;;  %v2654_v10 = vsel %vm4854_vm4, %v4445_v53, %v2653_v54  ;;  %v2655_v12 = vrot.slane %v2653_v54, 4  ;;  %v4453_v13 = vrot.slane %v2575_v55, 9 }
  0x34   : > { %v1528_v60 = vld [vmem:[#allocation2 + $0x68] sm:$0x1]  ;;  %v4388_v4 = vrot.slane %v1526_v58, 9  ;;  %v978_v9 = vld [vmem:[#allocation2 + $0x60] sm:$0xf]  ;;  %v2709_v14 = vrot.slane %v2576_v56, 5  ;;  %1763 = vrot.lane.b32.xlu0 %v4397_v61, %s4789_s27  ;;  %v2650_v19 = vsel %vm4854_vm4, %v2648_v7, %v2649_v47 }
  0x35   : > { %v1662_v6 = vrot.slane %v1528_v60, 5  ;;  %v979_v15 = vld [vmem:[#allocation2 + $0x64] sm:$0xf]  ;;  %v1661_v18 = vrot.slane %v1659_v5, 4  ;;  %v980_v21 = vld [vmem:[#allocation2 + $0x68] sm:$0x1]  ;;  %v4460_v23 = vcombine.low %v2647_v62, %v2650_v19 }
  0x36   : > { %v1660_v16 = vsel %vm4854_vm4, %v4388_v4, %v1659_v5  ;;  %v1198_v22 = vshrl.u32 %v978_v9, 16  ;;  %v5027_v24 = vsel %vm4854_vm4, %v4453_v13, %v2709_v14  ;;  %v2711_v28 = vrot.slane %v2709_v14, 4  ;;  %v2553_v35 = vld [vmem:[#allocation2 + $0x20] sm:$0x1]  ;;  %v2005_v53 = vld [vmem:[#allocation2 + $0x14] sm:$0x1] }
  0x37   : > { %v1201_v30 = vshll.u32 %v978_v9, 16  ;;  %v1663_v33 = vsel %vm4854_vm4, %v1661_v18, %v1662_v6  ;;  %v1207_v37 = vshll.u32 %v979_v15, 16  ;;  %v1211_v38 = vshrl.u32 %v979_v15, 16  ;;  %v2577_v41 = vld [vmem:[#allocation2 + $0x80] sm:$0x1] }
  0x38   : > { %v1200_v36 = vrot.slane %v1198_v22, 4  ;;  %v4404_v39 = vcombine.low %v1660_v16, %v1663_v33  ;;  %v2656_v40 = vrot.slane %v2553_v35, 5  ;;  %v1217_v44 = vshll.u32 %v980_v21, 16  ;;  %2804 = vrot.lane.b32.xlu0 %v4460_v23, %s4792_s30  ;;  %v957_v55 = vld [vmem:[#allocation2 + $0xc] sm:$0xf] }
  0x39   : > { %v1203_v43 = vrot.slane %v1201_v30, 5  ;;  %v2712_v45 = vrot.slane %v2577_v41, 5  ;;  %v1209_v20 = vrot.slane %v1207_v37, 5  ;;  %v1213_v47 = vrot.slane %v1211_v38, 4  ;;  %v959_v16 = vld [vmem:[#allocation2 + $0x14] sm:$0x1] }
  0x3a   : > { %v2052_v49 = vshrl.u32 %v2003_v31, 16  ;;  %1777 = vrot.lane.b32.xlu1 %v4404_v39, %s4789_s27  ;;  %v2657_v50 = vsel %vm4854_vm4, %v2655_v12, %v2656_v40  ;;  %v1219_v52 = vrot.slane %v1217_v44, 5  ;;  %v2055_v54 = vshll.u32 %v2003_v31, 16  ;;  %v958_v12 = vld [vmem:[#allocation2 + $0x10] sm:$0xf] }
  0x3b   : > { %v1204_v51 = vor.u32 %v1203_v43, %v1200_v36  ;;  %v4461_v56 = vcombine.low %v2654_v10, %v2657_v50  ;;  %v2713_v58 = vsel %vm4854_vm4, %v2711_v28, %v2712_v45  ;;  %v1214_v59 = vor.u32 %v1213_v47, %v1209_v20  ;;  %v2006_v19 = vld [vmem:[#allocation2 + $0x18] sm:$0xf]  ;;  %v2007_v28 = vld [vmem:[#allocation2 + $0x1c] sm:$0xf]  ;;  %v2008_v25 = vld [vmem:[#allocation2 + $0x20] sm:$0x1] }
  0x3c   : > { %v2054_v60 = vrot.slane %v2052_v49, 4  ;;  %v4469_v61 = vcombine.low %v5027_v24, %v2713_v58  ;;  %v2057_v4 = vrot.slane %v2055_v54, 5  ;;  %v2061_v5 = vshll.u32 %v2004_v48, 16 }
  0x3d   : > { %v1205_v62 = vrot.slane %v1204_v51, 4  ;;  %2806 = vrot.lane.b32.xlu0 %v4461_v56, %s4792_s30  ;;  %v1215_v6 = vrot.slane %v1214_v59, 4  ;;  %v2065_v7 = vshrl.u32 %v2004_v48, 16  ;;  %v2071_v9 = vshll.u32 %v2005_v53, 16  ;;  %v983_v59 = vld [vmem:[#allocation2 + $0x74] sm:$0x1] }
  0x3e   : > { %v1030_v13 = vshrl.u32 %v957_v55, 16  ;;  %1779 = vrot.lane.b32.xlu1 %v4405_v29, %s4789_s27  ;;  %v2058_v14 = vor.u32 %v2057_v4, %v2054_v60  ;;  %v2063_v15 = vrot.slane %v2061_v5, 5  ;;  %v1033_v18 = vshll.u32 %v957_v55, 16  ;;  %v981_v29 = vld [vmem:[#allocation2 + $0x6c] sm:$0xf] }
  0x3f   : > { %v1210_v10 = vsel %vm4887_vm8, %v1205_v62, %v1209_v20  ;;  %v1220_v21 = vsel %vm4887_vm8, %v1215_v6, %v1219_v52  ;;  %v2067_v22 = vrot.slane %v2065_v7, 4  ;;  %v2073_v23 = vrot.slane %v2071_v9, 5  ;;  %v982_v52 = vld [vmem:[#allocation2 + $0x70] sm:$0xf]  ;;  %v2027_v60 = vld [vmem:[#allocation2 + $0x6c] sm:$0xf] }
  0x40   : > { %v1032_v24 = vrot.slane %v1030_v13, 4  ;;  %v4372_v30 = vcombine.low %v1210_v10, %v1220_v21  ;;  %v2059_v31 = vrot.slane %v2058_v14, 4  ;;  %v1035_v33 = vrot.slane %v1033_v18, 5 }
  0x41   : > { %v1039_v8 = vshll.u32 %v958_v12, 16  ;;  %v2068_v35 = vor.u32 %v2067_v22, %v2063_v15  ;;  %v1043_v36 = vshrl.u32 %v958_v12, 16  ;;  %v1049_v37 = vshll.u32 %v959_v16, 16 }
  0x42   : > { %v2076_v38 = vshrl.u32 %v2006_v19, 16  ;;  %2820 = vrot.lane.b32.xlu1 %v4468_v32, %s4792_s30  ;;  %1453 = vrot.lane.b32.xlu0 %v4372_v30, %s4790_s28  ;;  %v2064_v39 = vsel %vm4887_vm8, %v2059_v31, %v2063_v15  ;;  %v1036_v40 = vor.u32 %v1035_v33, %v1032_v24  ;;  %v2079_v43 = vshll.u32 %v2006_v19, 16  ;;  %v2028_v15 = vld [vmem:[#allocation2 + $0x70] sm:$0xf]  ;;  %v2030_v24 = vld [vmem:[#allocation2 + $0x78] sm:$0xf] }
  0x43   : > { %v1041_v41 = vrot.slane %v1039_v8, 5  ;;  %v2069_v44 = vrot.slane %v2068_v35, 4  ;;  %v1045_v45 = vrot.slane %v1043_v36, 4  ;;  %v1051_v20 = vrot.slane %v1049_v37, 5 }
  0x44   : > { %v2078_v47 = vrot.slane %v2076_v38, 4  ;;  %v1037_v48 = vrot.slane %v1036_v40, 4  ;;  %v2081_v49 = vrot.slane %v2079_v43, 5  ;;  %v2085_v50 = vshll.u32 %v2007_v28, 16 }
  0x45   : > { %v2089_v51 = vshrl.u32 %v2007_v28, 16  ;;  %v2074_v11 = vsel %vm4887_vm8, %v2069_v44, %v2073_v23  ;;  %v1046_v26 = vor.u32 %v1045_v45, %v1041_v41  ;;  %v2095_v32 = vshll.u32 %v2008_v25, 16  ;;  %v2029_v23 = vld [vmem:[#allocation2 + $0x74] sm:$0x1] }
  0x46   : > { %v1222_v53 = vshrl.u32 %v981_v29, 16  ;;  %2822 = vrot.lane.b32.xlu1 %v4469_v61, %s4792_s30  ;;  %v4428_v54 = vcombine.low %v2064_v39, %v2074_v11  ;;  %v1042_v55 = vsel %vm4887_vm8, %v1037_v48, %v1041_v41  ;;  %v2082_v56 = vor.u32 %v2081_v49, %v2078_v47  ;;  %v2031_v39 = vld [vmem:[#allocation2 + $0x7c] sm:$0xf] }
  0x47   : > { %v2087_v58 = vrot.slane %v2085_v50, 5  ;;  %v1047_v62 = vrot.slane %v1046_v26, 4  ;;  %v2091_v4 = vrot.slane %v2089_v51, 4  ;;  %v2097_v5 = vrot.slane %v2095_v32, 5 }
  0x48   : > { %v1224_v6 = vrot.slane %v1222_v53, 4  ;;  %2483 = vrot.lane.b32.xlu0 %v4428_v54, %s4793_s5  ;;  %v2083_v7 = vrot.slane %v2082_v56, 4  ;;  %v1225_v9 = vshll.u32 %v981_v29, 16  ;;  %v1231_v12 = vshll.u32 %v982_v52, 16 }
  0x49   : > { %v1235_v13 = vshrl.u32 %v982_v52, 16  ;;  %v1052_v61 = vsel %vm4887_vm8, %v1047_v62, %v1051_v20  ;;  %v2092_v10 = vor.u32 %v2091_v4, %v2087_v58  ;;  %v1241_v14 = vshll.u32 %v983_v59, 16  ;;  %v2032_v20 = vld [vmem:[#allocation2 + $0x80] sm:$0x1]  ;;  %v4713_v52 = vld [vmem:[#allocation2 + $0x18] sm:$0xff]  }
  0x4a   : > { %v2244_v16 = vshrl.u32 %v2027_v60, 16  ;;  %v4365_v18 = vcombine.low %v1042_v55, %v1052_v61  ;;  %v2088_v19 = vsel %vm4887_vm8, %v2083_v7, %v2087_v58  ;;  %v1227_v21 = vrot.slane %v1225_v9, 5 }
  0x4b   : > { %v1233_v22 = vrot.slane %v1231_v12, 5  ;;  %v2093_v28 = vrot.slane %v2092_v10, 4  ;;  %v1237_v30 = vrot.slane %v1235_v13, 4  ;;  %v1243_v31 = vrot.slane %v1241_v14, 5  ;;  %v3047_v10 = vld [vmem:[#allocation2 + $0x18] sm:$0xf] }
  0x4c   : > { %v2246_v33 = vrot.slane %v2244_v16, 4  ;;  %1439 = vrot.lane.b32.xlu1 %v4365_v18, %s4790_s28  ;;  %v1228_v8 = vor.u32 %v1227_v21, %v1224_v6  ;;  %v2247_v25 = vshll.u32 %v2027_v60, 16  ;;  %v2253_v29 = vshll.u32 %v2028_v15, 16 }
  0x4d   : > { %v2257_v35 = vshrl.u32 %v2028_v15, 16  ;;  %v2098_v36 = vsel %vm4887_vm8, %v2093_v28, %v2097_v5  ;;  %v1238_v37 = vor.u32 %v1237_v30, %v1233_v22  ;;  %v2263_v38 = vshll.u32 %v2029_v23, 16  ;;  %v3048_v23 = vld [vmem:[#allocation2 + $0x1c] sm:$0xf]  ;;  %v3071_v28 = vld [vmem:[#allocation2 + $0x78] sm:$0xf] }
  0x4e   : > { %v2268_v40 = vshrl.u32 %v2030_v24, 16  ;;  %v4429_v41 = vcombine.low %v2088_v19, %v2098_v36  ;;  %v1229_v43 = vrot.slane %v1228_v8, 4  ;;  %v2249_v44 = vrot.slane %v2247_v25, 5 }
  0x4f   : > { %v2255_v45 = vrot.slane %v2253_v29, 5  ;;  %v1239_v47 = vrot.slane %v1238_v37, 4  ;;  %v2259_v48 = vrot.slane %v2257_v35, 4  ;;  %v2265_v49 = vrot.slane %v2263_v38, 5  ;;  %v3072_v29 = vld [vmem:[#allocation2 + $0x7c] sm:$0xf] }
  0x50   : > { %v2270_v50 = vrot.slane %v2268_v40, 4  ;;  %2485 = vrot.lane.b32.xlu0 %v4429_v41, %s4793_s5  ;;  %v1234_v51 = vsel %vm4887_vm8, %v1229_v43, %v1233_v22  ;;  %v2250_v11 = vor.u32 %v2249_v44, %v2246_v33  ;;  %v2271_v26 = vshll.u32 %v2030_v24, 16  ;;  %v3049_v24 = vld [vmem:[#allocation2 + $0x20] sm:$0x1]  ;;  %v4714_v40 = vld [vmem:[#allocation2 + $0x78] sm:$0xff]  }
  0x51   : > { %v2277_v32 = vshll.u32 %v2031_v39, 16  ;;  %v1244_v53 = vsel %vm4887_vm8, %v1239_v47, %v1243_v31  ;;  %v2260_v54 = vor.u32 %v2259_v48, %v2255_v45  ;;  %v2281_v55 = vshrl.u32 %v2031_v39, 16 }
  0x52   : > { %v2287_v56 = vshll.u32 %v2032_v20, 16  ;;  %v4373_v58 = vcombine.low %v1234_v51, %v1244_v53  ;;  %v2251_v59 = vrot.slane %v2250_v11, 4  ;;  %v2273_v60 = vrot.slane %v2271_v26, 5 }
  0x53   : > { %v2279_v62 = vrot.slane %v2277_v32, 5  ;;  %v2261_v4 = vrot.slane %v2260_v54, 4  ;;  %v2283_v5 = vrot.slane %v2281_v55, 4  ;;  %v354_v7 = vmax.f32 %v4964_v17, 0.0 }
  0x54   : > { %v2289_v6 = vrot.slane %v2287_v56, 5  ;;  %1455 = vrot.lane.b32.xlu1 %v4373_v58, %s4790_s28  ;;  %v2256_v9 = vsel %vm4887_vm8, %v2251_v59, %v2255_v45  ;;  %v2274_v12 = vor.u32 %v2273_v60, %v2270_v50  ;;  %2982 = vrot.lane.b32.xlu0 %v4713_v52, %s4794_s6  ;;  %v355_v13 = vmax.f32 %v4979_v27, 0.0  ;;  %v3073_v45 = vld [vmem:[#allocation2 + $0x80] sm:$0x1]  ;;  %v263_v60 = vld [vmem:[%s4863_s24 + $0xb8] sm:$0xff] }
  0x55   : > { %v370_v61 = vmax.f32 %v4995_v46, 0.0  ;;  %v2266_v14 = vsel %vm4887_vm8, %v2261_v4, %v2265_v49  ;;  %v2284_v15 = vor.u32 %v2283_v5, %v2279_v62  ;;  %v421_v16 = vrot.slane %v354_v7, 7  ;;  %v248_v7 = vld [vmem:[%s4863_s24 + $0x40] sm:$0xff] }
  0x56   : > { %v371_v17 = vmax.f32 %v4998_v34, 0.0  ;;  %v4436_v18 = vcombine.low %v2256_v9, %v2266_v14  ;;  %v2275_v19 = vrot.slane %v2274_v12, 4  ;;  %v422_v21 = vrot.slane %v355_v13, 7 }
  0x57   : > { %v445_v22 = vrot.slane %v370_v61, 7  ;;  %v2285_v30 = vrot.slane %v2284_v15, 4  ;;  %v513_v27 = vsel %vm414_vm7, 0.0, %v421_v16  ;;  %v3096_v46 = vshrl.u32 %v3047_v10, 16 }
  0x58   : > { %v446_v31 = vrot.slane %v371_v17, 7  ;;  %2499 = vrot.lane.b32.xlu1 %v4436_v18, %s4793_s5  ;;  %v2280_v33 = vsel %vm4887_vm8, %v2275_v19, %v2279_v62  ;;  %v423_v8 = vsel %vm414_vm7, %v421_v16, %v422_v21  ;;  %v4569_v34 = vpack.c.bf16 %v513_v27, %v513_v27 }
  0x59   : > { %v521_v25 = vsel %vm414_vm7, 0.0, %v445_v22  ;;  %v2290_v35 = vsel %vm4887_vm8, %v2285_v30, %v2289_v6  ;;  %v4570_v36 = vpack.c.bf16 %v423_v8, %v423_v8  ;;  %v3098_v43 = vrot.slane %v3096_v46, 4  ;;  %v3592_v46 = vld [vmem:[#allocation2 + $0x18] sm:$0xe] }
  0x5a   : > { %v447_v37 = vsel %vm414_vm7, %v445_v22, %v446_v31  ;;  %v4593_v38 = vpack.c.bf16 %v521_v25, %v521_v25  ;;  %v4437_v39 = vcombine.low %v2280_v33, %v2290_v35  ;;  %767 = vst.msk [vmem:[#allocation2 + $0x24] sm:$0xf] %vm543_vm0, %v4569_v34  ;;  %v3099_v44 = vshll.u32 %v3047_v10, 16  ;;  %v249_v10 = vld [vmem:[%s4863_s24 + $0x48] sm:$0xff] }
  0x5b   : > { %v4594_v41 = vpack.c.bf16 %v447_v37, %v447_v37  ;;  %768 = vst.msk [vmem:[#allocation2 + $0x28] sm:$0xf] %vm543_vm0, %v4570_v36  ;;  %v3105_v20 = vshll.u32 %v3048_v23, 16  ;;  %v3109_v47 = vshrl.u32 %v3048_v23, 16  ;;  %v3115_v48 = vshll.u32 %v3049_v24, 16 }
  0x5c   : > { %791 = vst.msk [vmem:[#allocation2 + $0x84] sm:$0xf] %vm543_vm0, %v4593_v38  ;;  %v3288_v49 = vshrl.u32 %v3071_v28, 16  ;;  %2501 = vrot.lane.b32.xlu1 %v4437_v39, %s4793_s5  ;;  %v3101_v50 = vrot.slane %v3099_v44, 5  ;;  %v3291_v51 = vshll.u32 %v3071_v28, 16  ;;  %v3297_v11 = vshll.u32 %v3072_v29, 16 }
  0x5d   : > { %792 = vst.msk [vmem:[#allocation2 + $0x88] sm:$0xf] %vm543_vm0, %v4594_v41  ;;  %v3301_v26 = vshrl.u32 %v3072_v29, 16  ;;  %v3107_v32 = vrot.slane %v3105_v20, 5  ;;  %v3111_v52 = vrot.slane %v3109_v47, 4  ;;  %v3117_v53 = vrot.slane %v3115_v48, 5 }
  0x5e   : > { %v3290_v54 = vrot.slane %v3288_v49, 4  ;;  %v3102_v55 = vor.u32 %v3101_v50, %v3098_v43  ;;  %v3293_v56 = vrot.slane %v3291_v51, 5  ;;  %v3299_v58 = vrot.slane %v3297_v11, 5 }
  0x5f   : > { %v3303_v59 = vrot.slane %v3301_v26, 4  ;;  %v3112_v62 = vor.u32 %v3111_v52, %v3107_v32  ;;  %v3307_v4 = vshll.u32 %v3073_v45, 16  ;;  %v529_v5 = vsel %vm414_vm7, %v422_v21, 0.0  ;;  %v3594_v45 = vld [vmem:[#allocation2 + $0x20] sm:$0x1] }
  0x60   : > { %v537_v6 = vsel %vm414_vm7, %v446_v31, 0.0  ;;  %2998 = vrot.lane.b32.xlu1 %v4714_v40, %s4794_s6  ;;  %v3103_v9 = vrot.slane %v3102_v55, 4  ;;  %v3294_v12 = vor.u32 %v3293_v56, %v3290_v54  ;;  %v4571_v61 = vpack.c.bf16 %v529_v5, %v529_v5  ;;  %v3617_v52 = vld [vmem:[#allocation2 + $0x7c] sm:$0xf] }
  0x61   : > { %v3304_v13 = vor.u32 %v3303_v59, %v3299_v58  ;;  %v3113_v14 = vrot.slane %v3112_v62, 4  ;;  %v3309_v15 = vrot.slane %v3307_v4, 5  ;;  %v3050_v16 = vld [vmem:[#allocation2 + $0x24] sm:$0xf]  ;;  %v4595_v17 = vpack.c.bf16 %v537_v6, %v537_v6 }
  0x62   : > { %v302_v18 = vmul.f32 %v4852_v1, %v263_v60  ;;  %v4715_v19 = vld [vmem:[#allocation2 + $0x24] sm:$0xff]   ;;  %v3108_v21 = vsel %vm4887_vm8, %v3103_v9, %v3107_v32  ;;  %v3295_v22 = vrot.slane %v3294_v12, 4  ;;  %769 = vst.msk [vmem:[#allocation2 + $0x2c] sm:$0x1] %vm546_vm1, %v4571_v61  ;;  %v5108_v23 = vadd.f32 %v4868_v3, %v5008_v57  ;;  %v3616_v32 = vld [vmem:[#allocation2 + $0x78] sm:$0xe] }
  0x63   : > { %v5111_v24 = vmul.f32 %v4852_v1, %v248_v7  ;;  %v3118_v30 = vsel %vm4887_vm8, %v3113_v14, %v3117_v53  ;;  %v3305_v27 = vrot.slane %v3304_v13, 4  ;;  %v3051_v31 = vld [vmem:[#allocation2 + $0x28] sm:$0xf]  ;;  %793 = vst.msk [vmem:[#allocation2 + $0x8c] sm:$0x1] %vm546_vm1, %v4595_v17  ;;  %v5120_v8 = vmul.f32 %v4852_v1, %v249_v10  ;;  %2984 = vrot.lane.b32.xlu0 %v4715_v19, %s4794_s6 }
  0x64   : > { %v4716_v28 = vld [vmem:[#allocation2 + $0x84] sm:$0xff]   ;;  %v5117_v33 = vadd.f32 %v4868_v3, %v302_v18  ;;  %v4492_v57 = vcombine.low %v3108_v21, %v3118_v30  ;;  %v3300_v34 = vsel %vm4887_vm8, %v3295_v22, %v3299_v58  ;;  %v3120_v25 = vshrl.u32 %v3050_v16, 16  ;;  %v3593_v1 = vld [vmem:[#allocation2 + $0x1c] sm:$0xf] }
  0x65   : > { %v3123_v29 = vshll.u32 %v3050_v16, 16  ;;  %v3074_v35 = vld [vmem:[#allocation2 + $0x84] sm:$0xf]  ;;  %v3075_v36 = vld [vmem:[#allocation2 + $0x88] sm:$0xf]  ;;  %3000 = vrot.lane.b32.xlu1 %v4716_v28, %s4794_s6  ;;  %v3310_v37 = vsel %vm4887_vm8, %v3305_v27, %v3309_v15  ;;  %v3129_v3 = vshll.u32 %v3051_v31, 16 }
  0x66   : > { %v3133_v38 = vshrl.u32 %v3051_v31, 16  ;;  %v3312_v39 = vshrl.u32 %v3074_v35, 16  ;;  %v4500_v40 = vcombine.low %v3300_v34, %v3310_v37  ;;  %v3122_v41 = vrot.slane %v3120_v25, 4  ;;  %v3618_v15 = vld [vmem:[#allocation2 + $0x80] sm:$0x1] }
  0x67   : > { %v3125_v43 = vrot.slane %v3123_v29, 5  ;;  %v3315_v44 = vshll.u32 %v3074_v35, 16  ;;  %v3131_v20 = vrot.slane %v3129_v3, 5  ;;  %v3321_v49 = vshll.u32 %v3075_v36, 16  ;;  %3527 = vrot.lane.b32.xlu0 %v4492_v57, %s4795_s7  ;;  %v960_v16 = vld [vmem:[#allocation2 + $0x18] sm:$0xf] }
  0x68   : > { %v3135_v47 = vrot.slane %v3133_v38, 4  ;;  %v3314_v48 = vrot.slane %v3312_v39, 4  ;;  %v3325_v11 = vshrl.u32 %v3075_v36, 16  ;;  %v4508_v26 = vrot.slane %v3592_v46, 9  ;;  %v961_v22 = vld [vmem:[#allocation2 + $0x1c] sm:$0xf] }
  0x69   : > { %v3126_v50 = vor.u32 %v3125_v43, %v3122_v41  ;;  %v3317_v51 = vrot.slane %v3315_v44, 5  ;;  %3543 = vrot.lane.b32.xlu1 %v4500_v40, %s4795_s7  ;;  %v3052_v53 = vld [vmem:[#allocation2 + $0x2c] sm:$0x1]  ;;  %v3323_v55 = vrot.slane %v3321_v49, 5  ;;  %v3690_v56 = vrot.slane %v3593_v1, 5 }
  0x6a   : > { %v3136_v54 = vor.u32 %v3135_v47, %v3131_v20  ;;  %v3693_v58 = vrot.slane %v3594_v45, 5  ;;  %v3139_v60 = vshll.u32 %v3052_v53, 16  ;;  %v3076_v62 = vld [vmem:[#allocation2 + $0x8c] sm:$0x1]  ;;  %v3327_v5 = vrot.slane %v3325_v11, 4 }
  0x6b   : > { %v3127_v59 = vrot.slane %v3126_v50, 4  ;;  %v3318_v4 = vor.u32 %v3317_v51, %v3314_v48  ;;  %v3331_v7 = vshll.u32 %v3076_v62, 16  ;;  %v3691_v9 = vsel %vm4854_vm4, %v4508_v26, %v3690_v56  ;;  %v962_v46 = vld [vmem:[#allocation2 + $0x20] sm:$0x1]  ;;  %v984_v35 = vld [vmem:[#allocation2 + $0x78] sm:$0xf] }
  0x6c   : > { %v3137_v6 = vrot.slane %v3136_v54, 4  ;;  %v3692_v12 = vrot.slane %v3690_v56, 4  ;;  %v3141_v61 = vrot.slane %v3139_v60, 5  ;;  %v3328_v14 = vor.u32 %v3327_v5, %v3323_v55  ;;  %v985_v39 = vld [vmem:[#allocation2 + $0x7c] sm:$0xf] }
  0x6d   : > { %v3132_v13 = vsel %vm4887_vm8, %v3127_v59, %v3131_v20  ;;  %v3319_v10 = vrot.slane %v3318_v4, 4  ;;  %v3333_v17 = vrot.slane %v3331_v7, 5  ;;  %v4516_v19 = vrot.slane %v3616_v32, 9  ;;  %v986_v44 = vld [vmem:[#allocation2 + $0x80] sm:$0x1] }
  0x6e   : > { %v3694_v18 = vsel %vm4854_vm4, %v3692_v12, %v3693_v58  ;;  %v3746_v21 = vrot.slane %v3617_v52, 5  ;;  %v3142_v28 = vsel %vm4887_vm8, %v3137_v6, %v3141_v61  ;;  %v3329_v27 = vrot.slane %v3328_v14, 4  ;;  %v3595_v45 = vld [vmem:[#allocation2 + $0x24] sm:$0xe]  ;;  %v3596_v50 = vld [vmem:[#allocation2 + $0x28] sm:$0xf] }
  0x6f   : > { %v3324_v30 = vsel %vm4887_vm8, %v3319_v10, %v3323_v55  ;;  %v4524_v31 = vcombine.low %v3691_v9, %v3694_v18  ;;  %v4493_v57 = vcombine.low %v3132_v13, %v3142_v28  ;;  %v3749_v29 = vrot.slane %v3618_v15, 5  ;;  %v3619_v52 = vld [vmem:[#allocation2 + $0x84] sm:$0xe]  ;;  %v3620_v53 = vld [vmem:[#allocation2 + $0x88] sm:$0xf] }
  0x70   : > { %v3747_v34 = vsel %vm4854_vm4, %v4516_v19, %v3746_v21  ;;  %v3748_v25 = vrot.slane %v3746_v21, 4  ;;  %v3334_v36 = vsel %vm4887_vm8, %v3329_v27, %v3333_v17  ;;  %v1054_v37 = vshrl.u32 %v960_v16, 16  ;;  %v3597_v59 = vld [vmem:[#allocation2 + $0x2c] sm:$0x1]  ;;  %v963_v21 = vld [vmem:[#allocation2 + $0x24] sm:$0xf] }
  0x71   : > { %v1057_v3 = vshll.u32 %v960_v16, 16  ;;  %v1063_v38 = vshll.u32 %v961_v22, 16  ;;  %3529 = vrot.lane.b32.xlu0 %v4493_v57, %s4795_s7  ;;  %v4501_v1 = vcombine.low %v3324_v30, %v3334_v36  ;;  %v1067_v41 = vshrl.u32 %v961_v22, 16  ;;  %v3621_v13 = vld [vmem:[#allocation2 + $0x8c] sm:$0x1] }
  0x72   : > { %v3750_v40 = vsel %vm4854_vm4, %v3748_v25, %v3749_v29  ;;  %v1073_v43 = vshll.u32 %v962_v46, 16  ;;  %v1056_v47 = vrot.slane %v1054_v37, 4  ;;  %v1246_v26 = vshrl.u32 %v984_v35, 16  ;;  %v965_v37 = vld [vmem:[#allocation2 + $0x2c] sm:$0x1] }
  0x73   : > { %v4532_v20 = vcombine.low %v3747_v34, %v3750_v40  ;;  %v1059_v48 = vrot.slane %v1057_v3, 5  ;;  %v1065_v49 = vrot.slane %v1063_v38, 5  ;;  %3545 = vrot.lane.b32.xlu1 %v4501_v1, %s4795_s7  ;;  %v1069_v51 = vrot.slane %v1067_v41, 4  ;;  %v987_v41 = vld [vmem:[#allocation2 + $0x84] sm:$0xf] }
  0x74   : > { %v1075_v11 = vrot.slane %v1073_v43, 5  ;;  %v1249_v32 = vshll.u32 %v984_v35, 16  ;;  %v1255_v55 = vshll.u32 %v985_v39, 16  ;;  %v1259_v56 = vshrl.u32 %v985_v39, 16  ;;  %v988_v43 = vld [vmem:[#allocation2 + $0x88] sm:$0xf] }
  0x75   : > { %v1060_v54 = vor.u32 %v1059_v48, %v1056_v47  ;;  %v1265_v58 = vshll.u32 %v986_v44, 16  ;;  %3848 = vrot.lane.b32.xlu0 %v4524_v31, %s4796_s8  ;;  %v1070_v60 = vor.u32 %v1069_v51, %v1065_v49  ;;  %v1248_v62 = vrot.slane %v1246_v26, 4  ;;  %v964_v31 = vld [vmem:[#allocation2 + $0x28] sm:$0xf]  ;;  %v989_v48 = vld [vmem:[#allocation2 + $0x8c] sm:$0x1] }
  0x76   : > { %v1251_v4 = vrot.slane %v1249_v32, 5  ;;  %v4509_v5 = vrot.slane %v3595_v45, 9  ;;  %v1257_v7 = vrot.slane %v1255_v55, 5  ;;  %v1261_v9 = vrot.slane %v1259_v56, 4  ;;  %v1509_v32 = vld [vmem:[#allocation2 + $0x1c] sm:$0xf] }
  0x77   : > { %v1061_v6 = vrot.slane %v1060_v54, 4  ;;  %v1267_v12 = vrot.slane %v1265_v58, 5  ;;  %3864 = vrot.lane.b32.xlu1 %v4532_v20, %s4796_s8  ;;  %v1071_v61 = vrot.slane %v1070_v60, 4  ;;  %v3697_v14 = vrot.slane %v3596_v50, 5  ;;  %v1532_v58 = vld [vmem:[#allocation2 + $0x78] sm:$0xe] }
  0x78   : > { %v1252_v10 = vor.u32 %v1251_v4, %v1248_v62  ;;  %v3700_v15 = vrot.slane %v3597_v59, 5  ;;  %v1262_v17 = vor.u32 %v1261_v9, %v1257_v7  ;;  %v4517_v18 = vrot.slane %v3619_v52, 9  ;;  %v1510_v52 = vld [vmem:[#allocation2 + $0x20] sm:$0x1] }
  0x79   : > { %v1066_v16 = vsel %vm4887_vm8, %v1061_v6, %v1065_v49  ;;  %v3753_v19 = vrot.slane %v3620_v53, 5  ;;  %v1076_v22 = vsel %vm4887_vm8, %v1071_v61, %v1075_v11  ;;  %v3698_v30 = vsel %vm4854_vm4, %v4509_v5, %v3697_v14  ;;  %v1508_v49 = vld [vmem:[#allocation2 + $0x18] sm:$0xe] }
  0x7a   : > { %v1253_v28 = vrot.slane %v1252_v10, 4  ;;  %v3699_v27 = vrot.slane %v3697_v14, 4  ;;  %v4366_v46 = vcombine.low %v1066_v16, %v1076_v22  ;;  %v1263_v57 = vrot.slane %v1262_v17, 4 }
  0x7b   : > { %v3754_v34 = vsel %vm4854_vm4, %v4517_v18, %v3753_v19  ;;  %v3755_v25 = vrot.slane %v3753_v19, 4  ;;  %v3756_v36 = vrot.slane %v3621_v13, 5  ;;  %v1078_v3 = vshrl.u32 %v963_v21, 16 }
  0x7c   : > { %v1258_v29 = vsel %vm4887_vm8, %v1253_v28, %v1257_v7  ;;  %v3701_v35 = vsel %vm4854_vm4, %v3699_v27, %v3700_v15  ;;  %1441 = vrot.lane.b32.xlu0 %v4366_v46, %s4790_s28  ;;  %v1268_v38 = vsel %vm4887_vm8, %v1263_v57, %v1267_v12  ;;  %v1081_v1 = vshll.u32 %v963_v21, 16  ;;  %v1533_v12 = vld [vmem:[#allocation2 + $0x7c] sm:$0xf]  ;;  %v1534_v15 = vld [vmem:[#allocation2 + $0x80] sm:$0x1] }
  0x7d   : > { %v4525_v39 = vcombine.low %v3698_v30, %v3701_v35  ;;  %v1087_v40 = vshll.u32 %v964_v31, 16  ;;  %v4374_v44 = vcombine.low %v1258_v29, %v1268_v38  ;;  %v3757_v45 = vsel %vm4854_vm4, %v3755_v25, %v3756_v36  ;;  %v1511_v27 = vld [vmem:[#allocation2 + $0x24] sm:$0xe]  ;;  %v1512_v25 = vld [vmem:[#allocation2 + $0x28] sm:$0xf] }
  0x7e   : > { %v1080_v20 = vrot.slane %v1078_v3, 4  ;;  %v1091_v47 = vshrl.u32 %v964_v31, 16  ;;  %v4533_v50 = vcombine.low %v3754_v34, %v3757_v45  ;;  %v1083_v51 = vrot.slane %v1081_v1, 5  ;;  %v1513_v29 = vld [vmem:[#allocation2 + $0x2c] sm:$0x1] }
  0x7f   : > { %v1089_v11 = vrot.slane %v1087_v40, 5  ;;  %v1097_v26 = vshll.u32 %v965_v37, 16  ;;  %1457 = vrot.lane.b32.xlu1 %v4374_v44, %s4790_s28  ;;  %v1270_v54 = vshrl.u32 %v987_v41, 16  ;;  %v1273_v55 = vshll.u32 %v987_v41, 16  ;;  %v1535_v38 = vld [vmem:[#allocation2 + $0x84] sm:$0xe] }
  0x80   : > { %v1093_v53 = vrot.slane %v1091_v47, 4  ;;  %v1279_v56 = vshll.u32 %v988_v43, 16  ;;  %3850 = vrot.lane.b32.xlu0 %v4525_v39, %s4796_s8  ;;  %v1084_v59 = vor.u32 %v1083_v51, %v1080_v20  ;;  %v1283_v62 = vshrl.u32 %v988_v43, 16  ;;  %v1536_v39 = vld [vmem:[#allocation2 + $0x88] sm:$0xf] }
  0x81   : > { %v1099_v60 = vrot.slane %v1097_v26, 5  ;;  %v1289_v4 = vshll.u32 %v989_v48, 16  ;;  %v1272_v6 = vrot.slane %v1270_v54, 4  ;;  %v1275_v7 = vrot.slane %v1273_v55, 5  ;;  %v1537_v44 = vld [vmem:[#allocation2 + $0x8c] sm:$0x1] }
  0x82   : > { %v1094_v5 = vor.u32 %v1093_v53, %v1089_v11  ;;  %v1281_v9 = vrot.slane %v1279_v56, 5  ;;  %v1085_v13 = vrot.slane %v1084_v59, 4  ;;  %v1285_v61 = vrot.slane %v1283_v62, 4  ;;  %v2009_v26 = vld [vmem:[#allocation2 + $0x24] sm:$0xf] }
  0x83   : > { %v1291_v10 = vrot.slane %v1289_v4, 5  ;;  %v4382_v14 = vrot.slane %v1508_v49, 9  ;;  %3866 = vrot.lane.b32.xlu1 %v4533_v50, %s4796_s8  ;;  %v1276_v17 = vor.u32 %v1275_v7, %v1272_v6  ;;  %v1617_v18 = vrot.slane %v1509_v32, 5 }
  0x84   : > { %v1095_v16 = vrot.slane %v1094_v5, 4  ;;  %v1620_v19 = vrot.slane %v1510_v52, 5  ;;  %v1090_v21 = vsel %vm4887_vm8, %v1085_v13, %v1089_v11  ;;  %v1286_v22 = vor.u32 %v1285_v61, %v1281_v9  ;;  %v2010_v5 = vld [vmem:[#allocation2 + $0x28] sm:$0xf] }
  0x85   : > { %v4390_v28 = vrot.slane %v1532_v58, 9  ;;  %v1673_v30 = vrot.slane %v1533_v12, 5  ;;  %v1277_v46 = vrot.slane %v1276_v17, 4  ;;  %v1618_v57 = vsel %vm4854_vm4, %v4382_v14, %v1617_v18  ;;  %v2033_v17 = vld [vmem:[#allocation2 + $0x84] sm:$0xf] }
  0x86   : > { %v1100_v31 = vsel %vm4887_vm8, %v1095_v16, %v1099_v60  ;;  %v1619_v34 = vrot.slane %v1617_v18, 4  ;;  %v1287_v36 = vrot.slane %v1286_v22, 4  ;;  %v1676_v41 = vrot.slane %v1534_v15, 5  ;;  %v4717_v18 = vld [vmem:[#allocation2 + $0x24] sm:$0xff]  }
  0x87   : > { %v4367_v35 = vcombine.low %v1090_v21, %v1100_v31  ;;  %v1674_v37 = vsel %vm4854_vm4, %v4390_v28, %v1673_v30  ;;  %v1675_v3 = vrot.slane %v1673_v30, 4  ;;  %v1282_v1 = vsel %vm4887_vm8, %v1277_v46, %v1281_v9  ;;  %v2034_v30 = vld [vmem:[#allocation2 + $0x88] sm:$0xf] }
  0x88   : > { %v1621_v40 = vsel %vm4854_vm4, %v1619_v34, %v1620_v19  ;;  %v4383_v43 = vrot.slane %v1511_v27, 9  ;;  %v1292_v45 = vsel %vm4887_vm8, %v1287_v36, %v1291_v10  ;;  %v1624_v47 = vrot.slane %v1512_v25, 5  ;;  %v2011_v10 = vld [vmem:[#allocation2 + $0x2c] sm:$0x1] }
  0x89   : > { %1443 = vrot.lane.b32.xlu0 %v4367_v35, %s4790_s28  ;;  %v4398_v20 = vcombine.low %v1618_v57, %v1621_v40  ;;  %v1627_v48 = vrot.slane %v1513_v29, 5  ;;  %v4375_v49 = vcombine.low %v1282_v1, %v1292_v45  ;;  %v1677_v50 = vsel %vm4854_vm4, %v1675_v3, %v1676_v41  ;;  %v2035_v27 = vld [vmem:[#allocation2 + $0x8c] sm:$0x1]  ;;  %v5214_v40 = vpop.permute.xlu0 %1761  ;;  %v4737_v41 = vld [vmem:[%s6082_s3] sm:$0xff]  }
  0x8a   : > { %v4391_v51 = vrot.slane %v1535_v38, 9  ;;  %v1680_v11 = vrot.slane %v1536_v39, 5  ;;  %v4406_v32 = vcombine.low %v1674_v37, %v1677_v50  ;;  %v1625_v52 = vsel %vm4854_vm4, %v4383_v43, %v1624_v47  ;;  %v4718_v37 = vld [vmem:[#allocation2 + $0x84] sm:$0xff]   ;;  %4630 = vmatprep.subr.bf16.mxu0 %v4737_v41  ;;  %4668 = vmatprep.subr.bf16.mxu1 %v4737_v41 }
  0x8b   : > { %v1626_v53 = vrot.slane %v1624_v47, 4  ;;  %v1683_v54 = vrot.slane %v1537_v44, 5  ;;  %1459 = vrot.lane.b32.xlu1 %v4375_v49, %s4790_s28  ;;  %v356_v58 = vmax.f32 %v5013_v63, 0.0  ;;  %v357_v59 = vmax.f32 %v5016_v0, 0.0  ;;  %v2554_v47 = vld [vmem:[#allocation2 + $0x24] sm:$0xe]  ;;  %4631 = vmatpush3.bf16.msra.mxu0 %v4737_v41 }
  0x8c   : > { %v1681_v55 = vsel %vm4854_vm4, %v4391_v51, %v1680_v11  ;;  %v1682_v56 = vrot.slane %v1680_v11, 4  ;;  %v372_v62 = vmax.f32 %v5108_v23, 0.0  ;;  %v373_v4 = vmax.f32 %v5117_v33, 0.0  ;;  %v2555_v11 = vld [vmem:[#allocation2 + $0x28] sm:$0xf]  ;;  %4671 = vmatpush3.bf16.msra.mxu1 %v4737_v41 }
  0x8d   : > { %1765 = vrot.lane.b32.xlu0 %v4398_v20, %s4789_s27  ;;  %v1628_v60 = vsel %vm4854_vm4, %v1626_v53, %v1627_v48  ;;  %v2100_v6 = vshrl.u32 %v2009_v26, 16  ;;  %v424_v12 = vrot.slane %v356_v58, 7  ;;  %v425_v13 = vrot.slane %v357_v59, 7 }
  0x8e   : > { %v4399_v7 = vcombine.low %v1625_v52, %v1628_v60  ;;  %v1684_v9 = vsel %vm4854_vm4, %v1682_v56, %v1683_v54  ;;  %v448_v61 = vrot.slane %v372_v62, 7  ;;  %v449_v0 = vrot.slane %v373_v4, 7  ;;  %v264_v54 = vld [vmem:[%s4863_s24 + $0xc0] sm:$0xff]  ;;  %v4740_v60 = vld [vmem:[%s6082_s3 + $0x8] sm:$0xff]  }
  0x8f   : > { %v4407_v63 = vcombine.low %v1681_v55, %v1684_v9  ;;  %v2102_v14 = vrot.slane %v2100_v6, 4  ;;  %1781 = vrot.lane.b32.xlu1 %v4406_v32, %s4789_s27  ;;  %v426_v15 = vsel %vm414_vm7, %v424_v12, %v425_v13  ;;  %v514_v23 = vsel %vm414_vm7, 0.0, %v424_v12  ;;  %4632 = vmatprep.subr.bf16.mxu0 %v4740_v60 }
  0x90   : > { %v2103_v33 = vshll.u32 %v2009_v26, 16  ;;  %v2109_v16 = vshll.u32 %v2010_v5, 16  ;;  %v4572_v19 = vpack.c.bf16 %v514_v23, %v514_v23  ;;  %v4573_v21 = vpack.c.bf16 %v426_v15, %v426_v15  ;;  %4669 = vmatprep.subr.bf16.mxu1 %v4740_v60  ;;  %4633 = vmatpush3.bf16.msra.mxu0 %v4740_v60 }
  0x91   : > { %1767 = vrot.lane.b32.xlu0 %v4399_v7, %s4789_s27  ;;  %v450_v22 = vsel %vm414_vm7, %v448_v61, %v449_v0  ;;  %v522_v28 = vsel %vm414_vm7, 0.0, %v448_v61  ;;  %v2113_v25 = vshrl.u32 %v2010_v5, 16  ;;  %v2119_v29 = vshll.u32 %v2011_v10, 16  ;;  %v265_v7 = vld [vmem:[%s4863_s24 + $0xc8] sm:$0xff]  ;;  %4672 = vmatpush3.bf16.msra.mxu1 %v4740_v60 }
  0x92   : > { %v4596_v31 = vpack.c.bf16 %v522_v28, %v522_v28  ;;  %v4597_v46 = vpack.c.bf16 %v450_v22, %v450_v22  ;;  %v2105_v57 = vrot.slane %v2103_v33, 5  ;;  %v5207_v34 = vrot.slane %v2109_v16, 5  ;;  %770 = vst.msk [vmem:[#allocation2 + $0x30] sm:$0xf] %vm543_vm0, %v4572_v19  ;;  %771 = vst.msk [vmem:[#allocation2 + $0x34] sm:$0xf] %vm543_vm0, %v4573_v21 }
  0x93   : > { %v2292_v35 = vshrl.u32 %v2033_v17, 16  ;;  %v2295_v36 = vshll.u32 %v2033_v17, 16  ;;  %1783 = vrot.lane.b32.xlu1 %v4407_v63, %s4789_s27  ;;  %v2301_v38 = vshll.u32 %v2034_v30, 16  ;;  %v2305_v39 = vshrl.u32 %v2034_v30, 16 }
  0x94   : > { %794 = vst.msk [vmem:[#allocation2 + $0x90] sm:$0xf] %vm543_vm0, %v4596_v31  ;;  %795 = vst.msk [vmem:[#allocation2 + $0x94] sm:$0xf] %vm543_vm0, %v4597_v46  ;;  %v2106_v3 = vor.u32 %v2105_v57, %v2102_v14  ;;  %v2311_v1 = vshll.u32 %v2035_v27, 16  ;;  %v2115_v43 = vrot.slane %v2113_v25, 4  ;;  %v5253_v14 = vpop.permute.xlu0 %1437 }
  0x95   : > { %1942 = vrot.lane.b32.xlu0 %v4717_v18, %s4791_s29  ;;  %v2121_v44 = vrot.slane %v2119_v29, 5  ;;  %v2294_v45 = vrot.slane %v2292_v35, 4  ;;  %v2297_v20 = vrot.slane %v2295_v36, 5  ;;  %v2303_v49 = vrot.slane %v2301_v38, 5  ;;  %v2556_v36 = vld [vmem:[#allocation2 + $0x2c] sm:$0x1] }
  0x96   : > { %v2107_v48 = vrot.slane %v2106_v3, 4  ;;  %v2307_v50 = vrot.slane %v2305_v39, 4  ;;  %v2313_v51 = vrot.slane %v2311_v1, 5  ;;  %v2116_v26 = vor.u32 %v2115_v43, %v5207_v34  ;;  %v2578_v1 = vld [vmem:[#allocation2 + $0x84] sm:$0xe] }
  0x97   : > { %v2298_v32 = vor.u32 %v2297_v20, %v2294_v45  ;;  %v530_v52 = vsel %vm414_vm7, %v425_v13, 0.0  ;;  %v538_v53 = vsel %vm414_vm7, %v449_v0, 0.0  ;;  %1958 = vrot.lane.b32.xlu1 %v4718_v37, %s4791_s29  ;;  %v4446_v5 = vrot.slane %v2554_v47, 9  ;;  %v5237_v13 = vld [vmem:[%s6081_s2] ss:$0 sm:$0xff] }
  0x98   : > { %v2112_v55 = vsel %vm4887_vm8, %v2107_v48, %v5207_v34  ;;  %v2308_v56 = vor.u32 %v2307_v50, %v2303_v49  ;;  %v4574_v58 = vpack.c.bf16 %v530_v52, %v530_v52  ;;  %v4598_v59 = vpack.c.bf16 %v538_v53, %v538_v53  ;;  %v5250_v0 = vld [vmem:[%s6080_s1] ss:$0 sm:$0xff]  ;;  %v2579_v20 = vld [vmem:[#allocation2 + $0x88] sm:$0xf] }
  0x99   : > { %v2117_v62 = vrot.slane %v2116_v26, 4  ;;  %v2299_v4 = vrot.slane %v2298_v32, 4  ;;  %v2660_v6 = vrot.slane %v2555_v11, 5  ;;  %v4719_v9 = vld [vmem:[#allocation2 + $0x30] sm:$0xff]   ;;  %v5241_v63 = vadd.f32 %v5237_v13, %v5111_v24  ;;  %v5278_v32 = vpop.permute.xlu1 %1954 }
  0x9a   : > { %v2309_v12 = vrot.slane %v2308_v56, 4  ;;  %772 = vst.msk [vmem:[#allocation2 + $0x38] sm:$0x1] %vm546_vm1, %v4574_v58  ;;  %796 = vst.msk [vmem:[#allocation2 + $0x98] sm:$0x1] %vm546_vm1, %v4598_v59  ;;  %v5245_v61 = vadd.f32 %v5237_v13, %v5120_v8  ;;  %v303_v10 = vmul.f32 %v5250_v0, %v264_v54  ;;  %1944 = vrot.lane.b32.xlu0 %v4719_v9, %s4791_s29  ;;  %v2663_v11 = vrot.slane %v2556_v36, 5 }
  0x9b   : > { %v4720_v15 = vld [vmem:[#allocation2 + $0x90] sm:$0xff]   ;;  %v2122_v24 = vsel %vm4887_vm8, %v2117_v62, %v2121_v44  ;;  %v2304_v23 = vsel %vm4887_vm8, %v2299_v4, %v2303_v49  ;;  %v5261_v8 = vsel %vm4854_vm4, %v4446_v5, %v2660_v6  ;;  %v2662_v33 = vrot.slane %v2660_v6, 4  ;;  %v2580_v56 = vld [vmem:[#allocation2 + $0x8c] sm:$0x1] }
  0x9c   : > { %v4430_v16 = vcombine.low %v2112_v55, %v2122_v24  ;;  %v2314_v17 = vsel %vm4887_vm8, %v2309_v12, %v2313_v51  ;;  %v2012_v18 = vld [vmem:[#allocation2 + $0x30] sm:$0xf]  ;;  %v2013_v19 = vld [vmem:[#allocation2 + $0x34] sm:$0xf]  ;;  %v304_v22 = vmul.f32 %v5250_v0, %v265_v7  ;;  %v5268_v28 = vadd.f32 %v5237_v13, %v303_v10  ;;  %1960 = vrot.lane.b32.xlu1 %v4720_v15, %s4791_s29 }
  0x9d   : > { %v2036_v21 = vld [vmem:[#allocation2 + $0x90] sm:$0xf]  ;;  %v4438_v30 = vcombine.low %v2304_v23, %v2314_v17  ;;  %v2124_v27 = vshrl.u32 %v2012_v18, 16  ;;  %v2127_v31 = vshll.u32 %v2012_v18, 16  ;;  %v2133_v46 = vshll.u32 %v2013_v19, 16  ;;  %v5272_v47 = vpop.permute.xlu0 %1938 }
  0x9e   : > { %v2037_v57 = vld [vmem:[#allocation2 + $0x94] sm:$0xf]  ;;  %v2137_v34 = vshrl.u32 %v2013_v19, 16  ;;  %v2316_v25 = vshrl.u32 %v2036_v21, 16  ;;  %v2319_v29 = vshll.u32 %v2036_v21, 16  ;;  %2487 = vrot.lane.b32.xlu0 %v4430_v16, %s4793_s5  ;;  %v5276_v26 = vadd.f32 %v5237_v13, %v304_v22 }
  0x9f   : > { %v2325_v35 = vshll.u32 %v2037_v57, 16  ;;  %v2126_v37 = vrot.slane %v2124_v27, 4  ;;  %v2129_v3 = vrot.slane %v2127_v31, 5  ;;  %v2135_v38 = vrot.slane %v2133_v46, 5  ;;  %v2557_v58 = vld [vmem:[#allocation2 + $0x30] sm:$0xe] }
  0xa0   : > { %v2329_v39 = vshrl.u32 %v2037_v57, 16  ;;  %v2139_v41 = vrot.slane %v2137_v34, 4  ;;  %v2318_v43 = vrot.slane %v2316_v25, 4  ;;  %v2321_v44 = vrot.slane %v2319_v29, 5  ;;  %2503 = vrot.lane.b32.xlu1 %v4438_v30, %s4793_s5  ;;  %v2558_v5 = vld [vmem:[#allocation2 + $0x34] sm:$0xf] }
  0xa1   : > { %v2327_v45 = vrot.slane %v2325_v35, 5  ;;  %v2014_v48 = vld [vmem:[#allocation2 + $0x38] sm:$0x1]  ;;  %v2130_v49 = vor.u32 %v2129_v3, %v2126_v37  ;;  %v2664_v62 = vsel %vm4854_vm4, %v2662_v33, %v2663_v11  ;;  %v4454_v4 = vrot.slane %v2578_v1, 9  ;;  %v2581_v7 = vld [vmem:[#allocation2 + $0x90] sm:$0xe] }
  0xa2   : > { %v2038_v50 = vld [vmem:[#allocation2 + $0x98] sm:$0x1]  ;;  %v2331_v51 = vrot.slane %v2329_v39, 4  ;;  %v2140_v52 = vor.u32 %v2139_v41, %v2135_v38  ;;  %v2143_v53 = vshll.u32 %v2014_v48, 16  ;;  %v2322_v54 = vor.u32 %v2321_v44, %v2318_v43  ;;  %v5282_v24 = vpop.permute.xlu0 %1940  ;;  %v2582_v30 = vld [vmem:[#allocation2 + $0x94] sm:$0xf] }
  0xa3   : > { %v2335_v55 = vshll.u32 %v2038_v50, 16  ;;  %v2131_v59 = vrot.slane %v2130_v49, 4  ;;  %v2559_v6 = vld [vmem:[#allocation2 + $0x38] sm:$0x1]  ;;  %v4462_v17 = vcombine.low %v5261_v8, %v2664_v62  ;;  %v2716_v18 = vrot.slane %v2579_v20, 5  ;;  %v5295_v8 = vpop.permute.xlu1 %1956 }
  0xa4   : > { %v2332_v60 = vor.u32 %v2331_v51, %v2327_v45  ;;  %v2141_v9 = vrot.slane %v2140_v52, 4  ;;  %v2145_v12 = vrot.slane %v2143_v53, 5  ;;  %v2323_v10 = vrot.slane %v2322_v54, 4  ;;  %v2583_v27 = vld [vmem:[#allocation2 + $0x98] sm:$0x1]  ;;  %v4725_v54 = vld [vmem:[#allocation2] sm:$0xff]  }
  0xa5   : > { %v2337_v15 = vrot.slane %v2335_v55, 5  ;;  %v2136_v23 = vsel %vm4887_vm8, %v2131_v59, %v2135_v38  ;;  %v2719_v21 = vrot.slane %v2580_v56, 5  ;;  %v4447_v22 = vrot.slane %v2557_v58, 9  ;;  %v3053_v41 = vld [vmem:[#allocation2 + $0x30] sm:$0xf]  ;;  %v4726_v56 = vld [vmem:[#allocation2 + $0x60] sm:$0xff]  }
  0xa6   : > { %v2333_v16 = vrot.slane %v2332_v60, 4  ;;  %v2146_v33 = vsel %vm4887_vm8, %v2141_v9, %v2145_v12  ;;  %v2328_v19 = vsel %vm4887_vm8, %v2323_v10, %v2327_v45  ;;  %v2717_v57 = vsel %vm4854_vm4, %v4454_v4, %v2716_v18  ;;  %v5297_v37 = vpop.permute.xlu0 %1763  ;;  %v4729_v58 = vld [vmem:[#allocation2 + $0x6c] sm:$0xff]   ;;  %v3054_v4 = vld [vmem:[#allocation2 + $0x34] sm:$0xf]  ;;  %938 = vst.msk [vmem:[#allocation3] sm:$0xff] %vm937_vm9, %v4725_v54  ;;  %946 = vst.msk [vmem:[#allocation3 + $0x40] sm:$0xff] %vm937_vm9, %v4726_v56 }
  0xa7   : > { %v4431_v31 = vcombine.low %v2136_v23, %v2146_v33  ;;  %v2718_v34 = vrot.slane %v2716_v18, 4  ;;  %v2667_v29 = vrot.slane %v2558_v5, 5  ;;  %v2670_v35 = vrot.slane %v2559_v6, 5  ;;  %v4739_v6 = vld [vmem:[#allocation2 + $0x78] sm:$0xff]   ;;  %v4741_v23 = vld [vmem:[#allocation2 + $0x24] sm:$0xff]   ;;  %947 = vst.msk [vmem:[#allocation3 + $0x48] sm:$0xff] %vm937_vm9, %v4729_v58 }
  0xa8   : > { %v2338_v46 = vsel %vm4887_vm8, %v2333_v16, %v2337_v15  ;;  %v4455_v36 = vrot.slane %v2581_v7, 9  ;;  %v2723_v38 = vrot.slane %v2582_v30, 5  ;;  %v2726_v39 = vrot.slane %v2583_v27, 5  ;;  %v3055_v15 = vld [vmem:[#allocation2 + $0x38] sm:$0x1]  ;;  %v4743_v16 = vld [vmem:[#allocation2 + $0x84] sm:$0xff]  }
  0xa9   : > { %v4439_v25 = vcombine.low %v2328_v19, %v2338_v46  ;;  %2489 = vrot.lane.b32.xlu0 %v4431_v31, %s4793_s5  ;;  %v2720_v3 = vsel %vm4854_vm4, %v2718_v34, %v2719_v21  ;;  %v358_v1 = vmax.f32 %v5241_v63, 0.0  ;;  %v2668_v44 = vsel %vm4854_vm4, %v4447_v22, %v2667_v29  ;;  %v3077_v21 = vld [vmem:[#allocation2 + $0x90] sm:$0xf]  ;;  %v3078_v46 = vld [vmem:[#allocation2 + $0x94] sm:$0xf]  ;;  %948 = vst.msk [vmem:[#allocation3 + $0x50] sm:$0xff] %vm937_vm9, %v4739_v6 }
  0xaa   : > { %v4470_v43 = vcombine.low %v2717_v57, %v2720_v3  ;;  %v2669_v45 = vrot.slane %v2667_v29, 4  ;;  %v359_v20 = vmax.f32 %v5245_v61, 0.0  ;;  %v2724_v48 = vsel %vm4854_vm4, %v4455_v36, %v2723_v38  ;;  %v5315_v55 = vpop.permute.xlu0 %2804  ;;  %v4727_v61 = vld [vmem:[#allocation2 + $0xc] sm:$0xff]   ;;  %v3079_v36 = vld [vmem:[#allocation2 + $0x98] sm:$0x1]  ;;  %941 = vst.msk [vmem:[#allocation3 + $0x18] sm:$0xff] %vm937_vm9, %v4741_v23 }
  0xab   : > { %2505 = vrot.lane.b32.xlu1 %v4439_v25, %s4793_s5  ;;  %v2725_v49 = vrot.slane %v2723_v38, 4  ;;  %v427_v50 = vrot.slane %v358_v1, 7  ;;  %v374_v51 = vmax.f32 %v5268_v28, 0.0  ;;  %v375_v52 = vmax.f32 %v5276_v26, 0.0  ;;  %v4736_v26 = vld [vmem:[#allocation2 + $0x18] sm:$0xff]   ;;  %v4721_v34 = vld [vmem:[#allocation2 + $0x30] sm:$0xff]  }
  0xac   : > { %v2671_v63 = vsel %vm4854_vm4, %v2669_v45, %v2670_v35  ;;  %v5312_v11 = vrot.slane %v359_v20, 7  ;;  %v3144_v53 = vshrl.u32 %v3053_v41, 16  ;;  %v5321_v5 = vpop.permute.xlu1 %1777  ;;  %v3147_v19 = vshll.u32 %v3053_v41, 16  ;;  %v4722_v38 = vld [vmem:[#allocation2 + $0x90] sm:$0xff]   ;;  %939 = vst.msk [vmem:[#allocation3 + $0x8] sm:$0xff] %vm937_vm9, %v4727_v61  ;;  %940 = vst.msk [vmem:[#allocation3 + $0x10] sm:$0xff] %vm937_vm9, %v4736_v26 }
  0xad   : > { %2808 = vrot.lane.b32.xlu0 %v4462_v17, %s4792_s30  ;;  %v4463_v59 = vcombine.low %v2668_v44, %v2671_v63  ;;  %v2727_v28 = vsel %vm4854_vm4, %v2725_v49, %v2726_v39  ;;  %v515_v60 = vsel %vm414_vm7, 0.0, %v427_v50  ;;  %v451_v62 = vrot.slane %v374_v51, 7  ;;  %949 = vst.msk [vmem:[#allocation3 + $0x58] sm:$0xff] %vm937_vm9, %v4743_v16  ;;  %v250_v58 = vld [vmem:[%s4863_s24 + $0x50] sm:$0xff] }
  0xae   : > { %v4471_v7 = vcombine.low %v2724_v48, %v2727_v28  ;;  %v429_v9 = vsel %vm414_vm7, %v427_v50, %v5312_v11  ;;  %v4575_v12 = vpack.c.bf16 %v515_v60, %v515_v60  ;;  %v5326_v10 = vrot.slane %v375_v52, 7  ;;  %1486 = vst.msk [vmem:[#allocation3] sm:$0xff] %vm1485_vm10, %v5253_v14 }
  0xaf   : > { %2824 = vrot.lane.b32.xlu1 %v4470_v43, %s4792_s30  ;;  %v4576_v17 = vpack.c.bf16 %v429_v9, %v429_v9  ;;  %v523_v18 = vsel %vm414_vm7, 0.0, %v451_v62  ;;  %v3146_v33 = vrot.slane %v3144_v53, 4  ;;  %v3153_v27 = vshll.u32 %v3054_v4, 16  ;;  %v5332_v57 = vpop.permute.xlu0 %2806  ;;  %1810 = vst.msk [vmem:[#allocation3] sm:$0xff] %vm1809_vm11, %v5214_v40 }
  0xb0   : > { %773 = vst.msk [vmem:[#allocation2 + $0x3c] sm:$0xf] %vm543_vm0, %v4575_v12  ;;  %v453_v22 = vsel %vm414_vm7, %v451_v62, %v5326_v10  ;;  %v4599_v30 = vpack.c.bf16 %v523_v18, %v523_v18  ;;  %v3157_v31 = vshrl.u32 %v3054_v4, 16  ;;  %v3149_v29 = vrot.slane %v3147_v19, 5  ;;  %v5336_v3 = vpop.permute.xlu1 %1779  ;;  %v251_v62 = vld [vmem:[%s4863_s24 + $0x58] sm:$0xff] }
  0xb1   : > { %2810 = vrot.lane.b32.xlu0 %v4463_v59, %s4792_s30  ;;  %774 = vst.msk [vmem:[#allocation2 + $0x40] sm:$0xf] %vm543_vm0, %v4576_v17  ;;  %v4600_v25 = vpack.c.bf16 %v453_v22, %v453_v22  ;;  %v3163_v35 = vshll.u32 %v3055_v15, 16  ;;  %v3155_v39 = vrot.slane %v3153_v27, 5  ;;  %v3336_v41 = vshrl.u32 %v3077_v21, 16 }
  0xb2   : > { %797 = vst.msk [vmem:[#allocation2 + $0x9c] sm:$0xf] %vm543_vm0, %v4599_v30  ;;  %v3159_v1 = vrot.slane %v3157_v31, 4  ;;  %v3150_v43 = vor.u32 %v3149_v29, %v3146_v33  ;;  %v3339_v45 = vshll.u32 %v3077_v21, 16  ;;  %v3345_v20 = vshll.u32 %v3078_v46, 16 }
  0xb3   : > { %2826 = vrot.lane.b32.xlu1 %v4471_v7, %s4792_s30  ;;  %798 = vst.msk [vmem:[#allocation2 + $0xa0] sm:$0xf] %vm543_vm0, %v4600_v25  ;;  %v3165_v44 = vrot.slane %v3163_v35, 5  ;;  %v3338_v49 = vrot.slane %v3336_v41, 4  ;;  %v3349_v50 = vshrl.u32 %v3078_v46, 16  ;;  %v3355_v51 = vshll.u32 %v3079_v36, 16 }
  0xb4   : > { %v3160_v48 = vor.u32 %v3159_v1, %v3155_v39  ;;  %v3151_v63 = vrot.slane %v3150_v43, 4  ;;  %v3341_v52 = vrot.slane %v3339_v45, 5  ;;  %v3347_v53 = vrot.slane %v3345_v20, 5  ;;  %v5354_v56 = vpop.permute.xlu1 %2820  ;;  %v1454_v61 = vpop.permute.xlu0 %1453  ;;  %1987 = vst.msk [vmem:[#allocation3] sm:$0xff] %vm1986_vm12, %v5272_v47  ;;  %v3598_v19 = vld [vmem:[#allocation2 + $0x30] sm:$0xe] }
  0xb5   : > { %2986 = vrot.lane.b32.xlu0 %v4721_v34, %s4794_s6  ;;  %v531_v54 = vsel %vm414_vm7, %v5312_v11, 0.0  ;;  %v3351_v59 = vrot.slane %v3349_v50, 4  ;;  %v3357_v28 = vrot.slane %v3355_v51, 5  ;;  %1494 = vst.msk [vmem:[#allocation3 + $0x40] sm:$0xff] %vm1485_vm10, %v1454_v61  ;;  %v5370_v23 = vmul.f32 %v5250_v0, %v250_v58  ;;  %v3599_v27 = vld [vmem:[#allocation2 + $0x34] sm:$0xf] }
  0xb6   : > { %v3161_v14 = vrot.slane %v3160_v48, 4  ;;  %v4577_v60 = vpack.c.bf16 %v531_v54, %v531_v54  ;;  %v3156_v4 = vsel %vm4887_vm8, %v3151_v63, %v3155_v39  ;;  %v3342_v26 = vor.u32 %v3341_v52, %v3338_v49  ;;  %1818 = vst.msk [vmem:[#allocation3 + $0x40] sm:$0xff] %vm1809_vm11, %v5321_v5  ;;  %v3600_v1 = vld [vmem:[#allocation2 + $0x38] sm:$0x1]  ;;  %v3622_v20 = vld [vmem:[#allocation2 + $0x90] sm:$0xe] }
  0xb7   : > { %3002 = vrot.lane.b32.xlu1 %v4722_v38, %s4794_s6  ;;  %v3056_v6 = vld [vmem:[#allocation2 + $0x3c] sm:$0xf]  ;;  %v3352_v9 = vor.u32 %v3351_v59, %v3347_v53  ;;  %1995 = vst.msk [vmem:[#allocation3 + $0x40] sm:$0xff] %vm1986_vm12, %v5278_v32  ;;  %v5380_v31 = vmul.f32 %v5250_v0, %v251_v62  ;;  %v539_v25 = vsel %vm414_vm7, %v5326_v10, 0.0  ;;  %v3623_v48 = vld [vmem:[#allocation2 + $0x94] sm:$0xf] }
  0xb8   : > { %v4723_v11 = vld [vmem:[#allocation2 + $0x3c] sm:$0xff]   ;;  %v3166_v7 = vsel %vm4887_vm8, %v3161_v14, %v3165_v44  ;;  %775 = vst.msk [vmem:[#allocation2 + $0x44] sm:$0x1] %vm546_vm1, %v4577_v60  ;;  %v3168_v15 = vshrl.u32 %v3056_v6, 16  ;;  %v3343_v17 = vrot.slane %v3342_v26, 4  ;;  %v3171_v18 = vshll.u32 %v3056_v6, 16  ;;  %v5374_v21 = vpop.permute.xlu1 %2822 }
  0xb9   : > { %v3057_v12 = vld [vmem:[#allocation2 + $0x40] sm:$0xf]  ;;  %v4494_v16 = vcombine.low %v3156_v4, %v3166_v7  ;;  %2988 = vrot.lane.b32.xlu0 %v4723_v11, %s4794_s6  ;;  %v3353_v5 = vrot.slane %v3352_v9, 4  ;;  %v3080_v29 = vld [vmem:[#allocation2 + $0x9c] sm:$0xf]  ;;  %v4601_v36 = vpack.c.bf16 %v539_v25, %v539_v25  ;;  %v4510_v51 = vrot.slane %v3598_v19, 9 }
  0xba   : > { %v3177_v33 = vshll.u32 %v3057_v12, 16  ;;  %v4724_v40 = vld [vmem:[#allocation2 + $0x9c] sm:$0xff]   ;;  %v3170_v22 = vrot.slane %v3168_v15, 4  ;;  %v3181_v30 = vshrl.u32 %v3057_v12, 16  ;;  %v3348_v46 = vsel %vm4887_vm8, %v3343_v17, %v3347_v53  ;;  %v3624_v63 = vld [vmem:[#allocation2 + $0x98] sm:$0x1] }
  0xbb   : > { %v3173_v47 = vrot.slane %v3171_v18, 5  ;;  %3004 = vrot.lane.b32.xlu1 %v4724_v40, %s4794_s6  ;;  %v3358_v32 = vsel %vm4887_vm8, %v3353_v5, %v3357_v28  ;;  %v3081_v38 = vld [vmem:[#allocation2 + $0xa0] sm:$0xf]  ;;  %v3360_v39 = vshrl.u32 %v3080_v29, 16  ;;  %v3363_v44 = vshll.u32 %v3080_v29, 16 }
  0xbc   : > { %v3179_v34 = vrot.slane %v3177_v33, 5  ;;  %v3183_v35 = vrot.slane %v3181_v30, 4  ;;  %v4502_v41 = vcombine.low %v3348_v46, %v3358_v32  ;;  %v3369_v45 = vshll.u32 %v3081_v38, 16  ;;  %799 = vst.msk [vmem:[#allocation2 + $0xa4] sm:$0x1] %vm546_vm1, %v4601_v36 }
  0xbd   : > { %v3174_v43 = vor.u32 %v3173_v47, %v3170_v22  ;;  %3531 = vrot.lane.b32.xlu0 %v4494_v16, %s4795_s7  ;;  %v3362_v49 = vrot.slane %v3360_v39, 4  ;;  %v3373_v50 = vshrl.u32 %v3081_v38, 16  ;;  %v3365_v54 = vrot.slane %v3363_v44, 5  ;;  %v966_v4 = vld [vmem:[#allocation2 + $0x30] sm:$0xf] }
  0xbe   : > { %v3184_v10 = vor.u32 %v3183_v35, %v3179_v34  ;;  %v5391_v61 = vrot.slane %v3369_v45, 5  ;;  %v3704_v58 = vrot.slane %v3599_v27, 5  ;;  %v1440_v14 = vpop.permute.xlu1 %1439  ;;  %v3707_v62 = vrot.slane %v3600_v1, 5  ;;  %v967_v19 = vld [vmem:[#allocation2 + $0x34] sm:$0xf] }
  0xbf   : > { %v3058_v52 = vld [vmem:[#allocation2 + $0x44] sm:$0x1]  ;;  %v3175_v53 = vrot.slane %v3174_v43, 4  ;;  %3547 = vrot.lane.b32.xlu1 %v4502_v41, %s4795_s7  ;;  %v3375_v60 = vrot.slane %v3373_v50, 4  ;;  %1487 = vst.msk [vmem:[#allocation3 + $0x8] sm:$0xff] %vm1485_vm10, %v1440_v14  ;;  %v3366_v6 = vor.u32 %v3365_v54, %v3362_v49  ;;  %v4518_v15 = vrot.slane %v3622_v20, 9 }
  0xc0   : > { %v3185_v59 = vrot.slane %v3184_v10, 4  ;;  %v3187_v28 = vshll.u32 %v3058_v52, 16  ;;  %v3705_v11 = vsel %vm4854_vm4, %v4510_v51, %v3704_v58  ;;  %v3706_v7 = vrot.slane %v3704_v58, 4  ;;  %1811 = vst.msk [vmem:[#allocation3 + $0x8] sm:$0xff] %vm1809_vm11, %v5297_v37  ;;  %v968_v27 = vld [vmem:[#allocation2 + $0x38] sm:$0x1]  ;;  %v5419_v51 = vpop.permute.xlu0 %2483 }
  0xc1   : > { %v3180_v26 = vsel %vm4887_vm8, %v3175_v53, %v3179_v34  ;;  %v3376_v12 = vor.u32 %v3375_v60, %v5391_v61  ;;  %v3760_v16 = vrot.slane %v3623_v48, 5  ;;  %1988 = vst.msk [vmem:[#allocation3 + $0x8] sm:$0xff] %vm1986_vm12, %v5282_v24  ;;  %v3367_v17 = vrot.slane %v3366_v6, 4  ;;  %v990_v46 = vld [vmem:[#allocation2 + $0x90] sm:$0xf] }
  0xc2   : > { %v3189_v9 = vrot.slane %v3187_v28, 5  ;;  %v3708_v18 = vsel %vm4854_vm4, %v3706_v7, %v3707_v62  ;;  %v3763_v33 = vrot.slane %v3624_v63, 5  ;;  %v1102_v40 = vshrl.u32 %v966_v4, 16  ;;  %v991_v41 = vld [vmem:[#allocation2 + $0x94] sm:$0xf]  ;;  %2532 = vst.msk [vmem:[#allocation3] sm:$0xff] %vm2531_vm13, %v5419_v51 }
  0xc3   : > { %v3377_v22 = vrot.slane %v3376_v12, 4  ;;  %v4526_v37 = vcombine.low %v3705_v11, %v3708_v18  ;;  %v5410_v30 = vsel %vm4854_vm4, %v4518_v15, %v3760_v16  ;;  %v3082_v24 = vld [vmem:[#allocation2 + $0xa4] sm:$0x1]  ;;  %v3372_v34 = vsel %vm4887_vm8, %v3367_v17, %v5391_v61  ;;  %v992_v50 = vld [vmem:[#allocation2 + $0x98] sm:$0x1]  ;;  %2853 = vst.msk [vmem:[#allocation3] sm:$0xff] %vm2852_vm14, %v5315_v55 }
  0xc4   : > { %v3190_v5 = vsel %vm4887_vm8, %v3185_v59, %v3189_v9  ;;  %v3762_v25 = vrot.slane %v3760_v16, 4  ;;  %v1104_v29 = vrot.slane %v1102_v40, 4  ;;  %v3379_v32 = vshll.u32 %v3082_v24, 16  ;;  %v3601_v61 = vld [vmem:[#allocation2 + $0x3c] sm:$0xe]  ;;  %v252_v55 = vld [vmem:[%s4863_s24 + $0x60] sm:$0xff] }
  0xc5   : > { %v4495_v47 = vcombine.low %v3180_v26, %v3190_v5  ;;  %v1105_v35 = vshll.u32 %v966_v4, 16  ;;  %v1111_v36 = vshll.u32 %v967_v19, 16  ;;  %v1115_v38 = vshrl.u32 %v967_v19, 16  ;;  %v3602_v60 = vld [vmem:[#allocation2 + $0x40] sm:$0xf] }
  0xc6   : > { %v3764_v39 = vsel %vm4854_vm4, %v3762_v25, %v3763_v33  ;;  %v1121_v1 = vshll.u32 %v968_v27, 16  ;;  %v1294_v43 = vshrl.u32 %v990_v46, 16  ;;  %v1297_v44 = vshll.u32 %v990_v46, 16  ;;  %v1456_v45 = vpop.permute.xlu1 %1455  ;;  %v3625_v62 = vld [vmem:[#allocation2 + $0x9c] sm:$0xe] }
  0xc7   : > { %3533 = vrot.lane.b32.xlu0 %v4495_v47, %s4795_s7  ;;  %v3381_v20 = vrot.slane %v3379_v32, 5  ;;  %v4534_v48 = vcombine.low %v5410_v30, %v3764_v39  ;;  %v1107_v10 = vrot.slane %v1105_v35, 5  ;;  %v1113_v49 = vrot.slane %v1111_v36, 5  ;;  %1495 = vst.msk [vmem:[#allocation3 + $0x48] sm:$0xff] %vm1485_vm10, %v1456_v45  ;;  %v3603_v7 = vld [vmem:[#allocation2 + $0x44] sm:$0x1]  ;;  %v5434_v47 = vpop.permute.xlu0 %2485 }
  0xc8   : > { %v1117_v63 = vrot.slane %v1115_v38, 4  ;;  %v1123_v52 = vrot.slane %v1121_v1, 5  ;;  %v1296_v53 = vrot.slane %v1294_v43, 4  ;;  %v1299_v54 = vrot.slane %v1297_v44, 5  ;;  %1819 = vst.msk [vmem:[#allocation3 + $0x48] sm:$0xff] %vm1809_vm11, %v5336_v3 }
  0xc9   : > { %v3382_v58 = vsel %vm4887_vm8, %v3377_v22, %v3381_v20  ;;  %v1108_v14 = vor.u32 %v1107_v10, %v1104_v29  ;;  %v1303_v59 = vshll.u32 %v991_v41, 16  ;;  %v1307_v28 = vshrl.u32 %v991_v41, 16  ;;  %1996 = vst.msk [vmem:[#allocation3 + $0x48] sm:$0xff] %vm1986_vm12, %v5295_v8  ;;  %v3626_v9 = vld [vmem:[#allocation2 + $0xa0] sm:$0xf] }
  0xca   : > { %v4503_v4 = vcombine.low %v3372_v34, %v3382_v58  ;;  %v1118_v26 = vor.u32 %v1117_v63, %v1113_v49  ;;  %v1300_v6 = vor.u32 %v1299_v54, %v1296_v53  ;;  %v1313_v11 = vshll.u32 %v992_v50, 16  ;;  %v3627_v3 = vld [vmem:[#allocation2 + $0xa4] sm:$0x1]  ;;  %v5429_v12 = vpop.permute.xlu1 %2499  ;;  %v969_v33 = vld [vmem:[#allocation2 + $0x3c] sm:$0xf]  ;;  %2533 = vst.msk [vmem:[#allocation3 + $0x8] sm:$0xff] %vm2531_vm13, %v5434_v47 }
  0xcb   : > { %3852 = vrot.lane.b32.xlu0 %v4526_v37, %s4796_s8  ;;  %v1109_v15 = vrot.slane %v1108_v14, 4  ;;  %v1305_v16 = vrot.slane %v1303_v59, 5  ;;  %v1309_v17 = vrot.slane %v1307_v28, 4  ;;  %v4511_v18 = vrot.slane %v3601_v61, 9  ;;  %v970_v19 = vld [vmem:[#allocation2 + $0x40] sm:$0xf]  ;;  %v5452_v53 = vpop.permute.xlu0 %2982 }
  0xcc   : > { %3549 = vrot.lane.b32.xlu1 %v4503_v4, %s4795_s7  ;;  %v1119_v8 = vrot.slane %v1118_v26, 4  ;;  %v1301_v40 = vrot.slane %v1300_v6, 4  ;;  %v1315_v5 = vrot.slane %v1313_v11, 5  ;;  %v3711_v22 = vrot.slane %v3602_v60, 5  ;;  %v971_v1 = vld [vmem:[#allocation2 + $0x44] sm:$0x1] }
  0xcd   : > { %v1114_v37 = vsel %vm4887_vm8, %v1109_v15, %v1113_v49  ;;  %v1310_v30 = vor.u32 %v1309_v17, %v1305_v16  ;;  %v3714_v27 = vrot.slane %v3603_v7, 5  ;;  %v4519_v46 = vrot.slane %v3625_v62, 9  ;;  %v993_v20 = vld [vmem:[#allocation2 + $0x9c] sm:$0xf]  ;;  %v1514_v14 = vld [vmem:[#allocation2 + $0x30] sm:$0xe] }
  0xce   : > { %v1124_v24 = vsel %vm4887_vm8, %v1119_v8, %v1123_v52  ;;  %v1306_v34 = vsel %vm4887_vm8, %v1301_v40, %v1305_v16  ;;  %v3712_v25 = vsel %vm4854_vm4, %v4511_v18, %v3711_v22  ;;  %v3713_v29 = vrot.slane %v3711_v22, 4  ;;  %v5442_v32 = vpop.permute.xlu1 %2501  ;;  %v994_v52 = vld [vmem:[#allocation2 + $0xa0] sm:$0xf]  ;;  %v995_v62 = vld [vmem:[#allocation2 + $0xa4] sm:$0x1]  ;;  %2540 = vst.msk [vmem:[#allocation3 + $0x40] sm:$0xff] %vm2531_vm13, %v5429_v12 }
  0xcf   : > { %v4368_v35 = vcombine.low %v1114_v37, %v1124_v24  ;;  %v1311_v36 = vrot.slane %v1310_v30, 4  ;;  %v3767_v38 = vrot.slane %v3626_v9, 5  ;;  %v3770_v39 = vrot.slane %v3627_v3, 5  ;;  %v1515_v3 = vld [vmem:[#allocation2 + $0x34] sm:$0xf]  ;;  %2541 = vst.msk [vmem:[#allocation3 + $0x48] sm:$0xff] %vm2531_vm13, %v5442_v32 }
  0xd0   : > { %3868 = vrot.lane.b32.xlu1 %v4534_v48, %s4796_s8  ;;  %v3715_v41 = vsel %vm4854_vm4, %v3713_v29, %v3714_v27  ;;  %v1126_v43 = vshrl.u32 %v969_v33, 16  ;;  %v1129_v44 = vshll.u32 %v969_v33, 16  ;;  %v1135_v45 = vshll.u32 %v970_v19, 16  ;;  %v1516_v15 = vld [vmem:[#allocation2 + $0x38] sm:$0x1]  ;;  %2854 = vst.msk [vmem:[#allocation3 + $0x8] sm:$0xff] %vm2852_vm14, %v5332_v57 }
  0xd1   : > { %1445 = vrot.lane.b32.xlu0 %v4368_v35, %s4790_s28  ;;  %v1316_v10 = vsel %vm4887_vm8, %v1311_v36, %v1315_v5  ;;  %v4527_v49 = vcombine.low %v3712_v25, %v3715_v41  ;;  %v3768_v50 = vsel %vm4854_vm4, %v4519_v46, %v3767_v38  ;;  %v3769_v63 = vrot.slane %v3767_v38, 4  ;;  %v1539_v37 = vld [vmem:[#allocation2 + $0x94] sm:$0xf]  ;;  %2861 = vst.msk [vmem:[#allocation3 + $0x40] sm:$0xff] %vm2852_vm14, %v5354_v56  ;;  %v253_v57 = vld [vmem:[%s4863_s24 + $0x68] sm:$0xff] }
  0xd2   : > { %v4376_v48 = vcombine.low %v1306_v34, %v1316_v10  ;;  %v1128_v54 = vrot.slane %v1126_v43, 4  ;;  %v1131_v61 = vrot.slane %v1129_v44, 5  ;;  %v1137_v58 = vrot.slane %v1135_v45, 5  ;;  %v5456_v26 = vpop.permute.xlu1 %2998  ;;  %v1540_v34 = vld [vmem:[#allocation2 + $0x98] sm:$0x1]  ;;  %2862 = vst.msk [vmem:[#allocation3 + $0x48] sm:$0xff] %vm2852_vm14, %v5374_v21 }
  0xd3   : > { %v3771_v59 = vsel %vm4854_vm4, %v3769_v63, %v3770_v39  ;;  %v1139_v28 = vshrl.u32 %v970_v19, 16  ;;  %v1145_v60 = vshll.u32 %v971_v1, 16  ;;  %v1318_v4 = vshrl.u32 %v993_v20, 16  ;;  %v1538_v19 = vld [vmem:[#allocation2 + $0x90] sm:$0xe]  ;;  %3031 = vst.msk [vmem:[#allocation3] sm:$0xff] %vm3030_vm15, %v5452_v53 }
  0xd4   : > { %1461 = vrot.lane.b32.xlu1 %v4376_v48, %s4790_s28  ;;  %v4535_v6 = vcombine.low %v3768_v50, %v3771_v59  ;;  %v1132_v11 = vor.u32 %v1131_v61, %v1128_v54  ;;  %v1321_v7 = vshll.u32 %v993_v20, 16  ;;  %v1327_v9 = vshll.u32 %v994_v52, 16  ;;  %v1517_v39 = vld [vmem:[#allocation2 + $0x3c] sm:$0xe]  ;;  %v1518_v1 = vld [vmem:[#allocation2 + $0x40] sm:$0xf] }
  0xd5   : > { %3854 = vrot.lane.b32.xlu0 %v4527_v49, %s4796_s8  ;;  %v1141_v16 = vrot.slane %v1139_v28, 4  ;;  %v1147_v17 = vrot.slane %v1145_v60, 5  ;;  %v1320_v18 = vrot.slane %v1318_v4, 4  ;;  %v1331_v33 = vshrl.u32 %v994_v52, 16  ;;  %v5460_v25 = vpop.permute.xlu0 %2984  ;;  %v1519_v20 = vld [vmem:[#allocation2 + $0x44] sm:$0x1] }
  0xd6   : > { %v1133_v8 = vrot.slane %v1132_v11, 4  ;;  %v1323_v40 = vrot.slane %v1321_v7, 5  ;;  %v1329_v5 = vrot.slane %v1327_v9, 5  ;;  %v1337_v22 = vshll.u32 %v995_v62, 16  ;;  %v1541_v10 = vld [vmem:[#allocation2 + $0x9c] sm:$0xe] }
  0xd7   : > { %v1142_v30 = vor.u32 %v1141_v16, %v1137_v58  ;;  %v1333_v27 = vrot.slane %v1331_v33, 4  ;;  %v4384_v46 = vrot.slane %v1514_v14, 9  ;;  %v1631_v24 = vrot.slane %v1515_v3, 5  ;;  %v5467_v49 = vpop.permute.xlu1 %3000  ;;  %v1542_v54 = vld [vmem:[#allocation2 + $0xa0] sm:$0xf]  ;;  %v266_v33 = vld [vmem:[%s4863_s24 + $0xd0] sm:$0xff] }
  0xd8   : > { %3870 = vrot.lane.b32.xlu1 %v4535_v6, %s4796_s8  ;;  %v1138_v29 = vsel %vm4887_vm8, %v1133_v8, %v1137_v58  ;;  %v1324_v35 = vor.u32 %v1323_v40, %v1320_v18  ;;  %v1339_v36 = vrot.slane %v1337_v22, 5  ;;  %v1634_v38 = vrot.slane %v1516_v15, 5  ;;  %v1543_v28 = vld [vmem:[#allocation2 + $0xa4] sm:$0x1]  ;;  %3039 = vst.msk [vmem:[#allocation3 + $0x40] sm:$0xff] %vm3030_vm15, %v5456_v26  ;;  %3032 = vst.msk [vmem:[#allocation3 + $0x8] sm:$0xff] %vm3030_vm15, %v5460_v25 }
  0xd9   : > { %v1143_v41 = vrot.slane %v1142_v30, 4  ;;  %v1334_v43 = vor.u32 %v1333_v27, %v1329_v5  ;;  %v1632_v44 = vsel %vm4854_vm4, %v4384_v46, %v1631_v24  ;;  %v1633_v45 = vrot.slane %v1631_v24, 4  ;;  %v5479_v15 = vpop.permute.xlu0 %3527  ;;  %3040 = vst.msk [vmem:[#allocation3 + $0x48] sm:$0xff] %vm3030_vm15, %v5467_v49  ;;  %v2560_v49 = vld [vmem:[#allocation2 + $0x3c] sm:$0xe] }
  0xda   : > { %v1325_v50 = vrot.slane %v1324_v35, 4  ;;  %v4392_v63 = vrot.slane %v1538_v19, 9  ;;  %v1687_v52 = vrot.slane %v1539_v37, 5  ;;  %v1690_v48 = vrot.slane %v1540_v34, 5  ;;  %v267_v19 = vld [vmem:[%s4863_s24 + $0xd8] sm:$0xff]  ;;  %3576 = vst.msk [vmem:[#allocation3] sm:$0xff] %vm3575_vm2, %v5479_v15 }
  0xdb   : > { %v1148_v61 = vsel %vm4887_vm8, %v1143_v41, %v1147_v17  ;;  %v1335_v58 = vrot.slane %v1334_v43, 4  ;;  %v1635_v14 = vsel %vm4854_vm4, %v1633_v45, %v1634_v38  ;;  %v4385_v59 = vrot.slane %v1517_v39, 9  ;;  %v2015_v37 = vld [vmem:[#allocation2 + $0x3c] sm:$0xf]  ;;  %v5496_v30 = vpop.permute.xlu1 %3543 }
  0xdc   : > { %v4369_v60 = vcombine.low %v1138_v29, %v1148_v61  ;;  %v1330_v62 = vsel %vm4887_vm8, %v1325_v50, %v1329_v5  ;;  %v4400_v4 = vcombine.low %v1632_v44, %v1635_v14  ;;  %v1688_v6 = vsel %vm4854_vm4, %v4392_v63, %v1687_v52  ;;  %v2016_v29 = vld [vmem:[#allocation2 + $0x40] sm:$0xf]  ;;  %v4751_v50 = vld [vmem:[#allocation2 + $0x30] sm:$0xff]   ;;  %3584 = vst.msk [vmem:[#allocation3 + $0x40] sm:$0xff] %vm3575_vm2, %v5496_v30 }
  0xdd   : > { %v1340_v11 = vsel %vm4887_vm8, %v1335_v58, %v1339_v36  ;;  %v1689_v7 = vrot.slane %v1687_v52, 4  ;;  %v1638_v9 = vrot.slane %v1518_v1, 5  ;;  %v1641_v3 = vrot.slane %v1519_v20, 5  ;;  %v4728_v58 = vld [vmem:[#allocation2 + $0x3c] sm:$0xff]   ;;  %942 = vst.msk [vmem:[#allocation3 + $0x20] sm:$0xff] %vm937_vm9, %v4751_v50 }
  0xde   : > { %1447 = vrot.lane.b32.xlu0 %v4369_v60, %s4790_s28  ;;  %v4377_v16 = vcombine.low %v1330_v62, %v1340_v11  ;;  %v4393_v17 = vrot.slane %v1541_v10, 9  ;;  %v1694_v18 = vrot.slane %v1542_v54, 5  ;;  %v1697_v22 = vrot.slane %v1543_v28, 5  ;;  %v2039_v11 = vld [vmem:[#allocation2 + $0x9c] sm:$0xf] }
  0xdf   : > { %v1691_v8 = vsel %vm4854_vm4, %v1689_v7, %v1690_v48  ;;  %v1639_v40 = vsel %vm4854_vm4, %v4385_v59, %v1638_v9  ;;  %v1640_v5 = vrot.slane %v1638_v9, 4  ;;  %v328_v24 = vadd.f32 %v5237_v13, %v5370_v23  ;;  %v4730_v7 = vld [vmem:[#allocation2 + $0x9c] sm:$0xff]   ;;  %v2562_v50 = vld [vmem:[#allocation2 + $0x44] sm:$0x1] }
  0xe0   : > { %1463 = vrot.lane.b32.xlu1 %v4377_v16, %s4790_s28  ;;  %v4408_v27 = vcombine.low %v1688_v6, %v1691_v8  ;;  %v1695_v46 = vsel %vm4854_vm4, %v4393_v17, %v1694_v18  ;;  %v1696_v51 = vrot.slane %v1694_v18, 4  ;;  %v329_v12 = vadd.f32 %v5237_v13, %v5380_v31  ;;  %v2017_v31 = vld [vmem:[#allocation2 + $0x44] sm:$0x1]  ;;  %v2040_v18 = vld [vmem:[#allocation2 + $0xa0] sm:$0xf] }
  0xe1   : > { %v1642_v47 = vsel %vm4854_vm4, %v1640_v5, %v1641_v3  ;;  %v305_v32 = vmul.f32 %v5250_v0, %v266_v33  ;;  %v306_v34 = vmul.f32 %v5250_v0, %v267_v19  ;;  %v360_v38 = vmax.f32 %v328_v24, 0.0  ;;  %v4753_v19 = vld [vmem:[#allocation2 + $0x90] sm:$0xff]   ;;  %v2041_v5 = vld [vmem:[#allocation2 + $0xa4] sm:$0x1] }
  0xe2   : > { %1769 = vrot.lane.b32.xlu0 %v4400_v4, %s4789_s27  ;;  %v4401_v35 = vcombine.low %v1639_v40, %v1642_v47  ;;  %v1698_v36 = vsel %vm4854_vm4, %v1696_v51, %v1697_v22  ;;  %v2148_v39 = vshrl.u32 %v2015_v37, 16  ;;  %v361_v1 = vmax.f32 %v329_v12, 0.0  ;;  %950 = vst.msk [vmem:[#allocation3 + $0x60] sm:$0xff] %vm937_vm9, %v4753_v19 }
  0xe3   : > { %v4409_v23 = vcombine.low %v1695_v46, %v1698_v36  ;;  %v344_v41 = vadd.f32 %v5237_v13, %v305_v32  ;;  %v345_v43 = vadd.f32 %v5237_v13, %v306_v34  ;;  %v5514_v44 = vpop.permute.xlu0 %3529  ;;  %v430_v0 = vrot.slane %v360_v38, 7  ;;  %v4754_v32 = vld [vmem:[#allocation2 + $0x3c] sm:$0xff]  }
  0xe4   : > { %1785 = vrot.lane.b32.xlu1 %v4408_v27, %s4789_s27  ;;  %v2150_v45 = vrot.slane %v2148_v39, 4  ;;  %v2151_v20 = vshll.u32 %v2015_v37, 16  ;;  %v2157_v10 = vshll.u32 %v2016_v29, 16  ;;  %v431_v63 = vrot.slane %v361_v1, 7  ;;  %v2561_v38 = vld [vmem:[#allocation2 + $0x40] sm:$0xf] }
  0xe5   : > { %v376_v52 = vmax.f32 %v344_v41, 0.0  ;;  %v377_v48 = vmax.f32 %v345_v43, 0.0  ;;  %v2161_v54 = vshrl.u32 %v2016_v29, 16  ;;  %v5517_v61 = vpop.permute.xlu1 %3545  ;;  %v516_v13 = vsel %vm414_vm7, 0.0, %v430_v0  ;;  %943 = vst.msk [vmem:[#allocation3 + $0x28] sm:$0xff] %vm937_vm9, %v4754_v32 }
  0xe6   : > { %1771 = vrot.lane.b32.xlu0 %v4401_v35, %s4789_s27  ;;  %v2153_v14 = vrot.slane %v2151_v20, 5  ;;  %v5521_v59 = vrot.slane %v2157_v10, 5  ;;  %v2167_v28 = vshll.u32 %v2017_v31, 16  ;;  %v432_v60 = vsel %vm414_vm7, %v430_v0, %v431_v63  ;;  %v268_v31 = vld [vmem:[%s4863_s24 + $0xe0] sm:$0xff]  ;;  %3577 = vst.msk [vmem:[#allocation3 + $0x8] sm:$0xff] %vm3575_vm2, %v5514_v44  ;;  %3585 = vst.msk [vmem:[#allocation3 + $0x48] sm:$0xff] %vm3575_vm2, %v5517_v61 }
  0xe7   : > { %v4578_v62 = vpack.c.bf16 %v516_v13, %v516_v13  ;;  %v454_v4 = vrot.slane %v376_v52, 7  ;;  %v455_v6 = vrot.slane %v377_v48, 7  ;;  %v4579_v9 = vpack.c.bf16 %v432_v60, %v432_v60  ;;  %v5526_v33 = vpop.permute.xlu0 %3848 }
  0xe8   : > { %1787 = vrot.lane.b32.xlu1 %v4409_v23, %s4789_s27  ;;  %v2154_v3 = vor.u32 %v2153_v14, %v2150_v45  ;;  %v2163_v16 = vrot.slane %v2161_v54, 4  ;;  %v2169_v17 = vrot.slane %v2167_v28, 5  ;;  %v2340_v51 = vshrl.u32 %v2039_v11, 16  ;;  %v5572_v54 = vld [vmem:[%s6080_s1] ss:$0 sm:$0xff]  ;;  %3897 = vst.msk [vmem:[#allocation3] sm:$0xff] %vm3896_vm3, %v5526_v33 }
  0xe9   : > { %776 = vst.msk [vmem:[#allocation2 + $0x48] sm:$0xf] %vm543_vm0, %v4578_v62  ;;  %v456_v8 = vsel %vm414_vm7, %v454_v4, %v455_v6  ;;  %v524_v40 = vsel %vm414_vm7, 0.0, %v454_v4  ;;  %777 = vst.msk [vmem:[#allocation2 + $0x4c] sm:$0xf] %vm543_vm0, %v4579_v9  ;;  %v2343_v24 = vshll.u32 %v2039_v11, 16  ;;  %v5553_v56 = vpop.permute.xlu1 %3864  ;;  %v5576_v13 = vmul.f32 %v5572_v54, %v253_v57 }
  0xea   : > { %1946 = vrot.lane.b32.xlu0 %v4728_v58, %s4791_s29  ;;  %v4602_v22 = vpack.c.bf16 %v524_v40, %v524_v40  ;;  %v4603_v37 = vpack.c.bf16 %v456_v8, %v456_v8  ;;  %v2155_v27 = vrot.slane %v2154_v3, 4  ;;  %v2164_v46 = vor.u32 %v2163_v16, %v5521_v59  ;;  %v5595_v8 = vld [vmem:[%s6081_s2] ss:$0 sm:$0xff]  ;;  %3905 = vst.msk [vmem:[#allocation3 + $0x40] sm:$0xff] %vm3896_vm3, %v5553_v56 }
  0xeb   : > { %v2349_v47 = vshll.u32 %v2040_v18, 16  ;;  %v2353_v12 = vshrl.u32 %v2040_v18, 16  ;;  %v2359_v26 = vshll.u32 %v2041_v5, 16  ;;  %v532_v25 = vsel %vm414_vm7, %v431_v63, 0.0 }
  0xec   : > { %1962 = vrot.lane.b32.xlu1 %v4730_v7, %s4791_s29  ;;  %800 = vst.msk [vmem:[#allocation2 + $0xa8] sm:$0xf] %vm543_vm0, %v4602_v22  ;;  %801 = vst.msk [vmem:[#allocation2 + $0xac] sm:$0xf] %vm543_vm0, %v4603_v37  ;;  %v2160_v21 = vsel %vm4887_vm8, %v2155_v27, %v5521_v59  ;;  %v2165_v53 = vrot.slane %v2164_v46, 4  ;;  %v2342_v34 = vrot.slane %v2340_v51, 4  ;;  %v4580_v1 = vpack.c.bf16 %v532_v25, %v532_v25 }
  0xed   : > { %v2345_v29 = vrot.slane %v2343_v24, 5  ;;  %v2351_v35 = vrot.slane %v2349_v47, 5  ;;  %v2355_v36 = vrot.slane %v2353_v12, 4  ;;  %v2361_v23 = vrot.slane %v2359_v26, 5  ;;  %v2584_v51 = vld [vmem:[#allocation2 + $0x9c] sm:$0xe] }
  0xee   : > { %v2170_v39 = vsel %vm4887_vm8, %v2165_v53, %v2169_v17  ;;  %v540_v41 = vsel %vm414_vm7, %v455_v6, 0.0  ;;  %v1442_v43 = vpop.permute.xlu0 %1441  ;;  %778 = vst.msk [vmem:[#allocation2 + $0x50] sm:$0x1] %vm546_vm1, %v4580_v1  ;;  %v4448_v52 = vrot.slane %v2560_v49, 9  ;;  %v2674_v48 = vrot.slane %v2561_v38, 5  ;;  %v4755_v53 = vld [vmem:[#allocation2 + $0x9c] sm:$0xff]  }
  0xef   : > { %v4432_v0 = vcombine.low %v2160_v21, %v2170_v39  ;;  %v2346_v45 = vor.u32 %v2345_v29, %v2342_v34  ;;  %v2356_v20 = vor.u32 %v2355_v36, %v2351_v35  ;;  %v4604_v10 = vpack.c.bf16 %v540_v41, %v540_v41  ;;  %1488 = vst.msk [vmem:[#allocation3 + $0x10] sm:$0xff] %vm1485_vm10, %v1442_v43  ;;  %v2585_v21 = vld [vmem:[#allocation2 + $0xa0] sm:$0xf]  ;;  %v2586_v34 = vld [vmem:[#allocation2 + $0xa4] sm:$0x1] }
  0xf0   : > { %v2018_v63 = vld [vmem:[#allocation2 + $0x48] sm:$0xf]  ;;  %v291_v58 = vmul.f32 %v5572_v54, %v252_v55  ;;  %v5580_v62 = vmul.f32 %v5572_v54, %v268_v31  ;;  %v2019_v6 = vld [vmem:[#allocation2 + $0x4c] sm:$0xf]  ;;  %v5584_v7 = vsel %vm4854_vm4, %v4448_v52, %v2674_v48  ;;  %v2676_v9 = vrot.slane %v2674_v48, 4  ;;  %951 = vst.msk [vmem:[#allocation3 + $0x68] sm:$0xff] %vm937_vm9, %v4755_v53 }
  0xf1   : > { %v4731_v14 = vld [vmem:[#allocation2 + $0x48] sm:$0xff]   ;;  %v2347_v59 = vrot.slane %v2346_v45, 4  ;;  %v2357_v28 = vrot.slane %v2356_v20, 4  ;;  %v2172_v60 = vshrl.u32 %v2018_v63, 16  ;;  %802 = vst.msk [vmem:[#allocation2 + $0xb0] sm:$0x1] %vm546_vm1, %v4604_v10  ;;  %v1458_v4 = vpop.permute.xlu1 %1457 }
  0xf2   : > { %v2175_v11 = vshll.u32 %v2018_v63, 16  ;;  %v2677_v3 = vrot.slane %v2562_v50, 5  ;;  %1496 = vst.msk [vmem:[#allocation3 + $0x50] sm:$0xff] %vm1485_vm10, %v1458_v4  ;;  %1948 = vrot.lane.b32.xlu0 %v4731_v14, %s4791_s29  ;;  %v5598_v40 = vadd.f32 %v5595_v8, %v291_v58  ;;  %v2181_v37 = vshll.u32 %v2019_v6, 16  ;;  %v5600_v24 = vpop.permute.xlu0 %3850  ;;  %v2563_v15 = vld [vmem:[#allocation2 + $0x48] sm:$0xe] }
  0xf3   : > { %v4732_v16 = vld [vmem:[#allocation2 + $0xa8] sm:$0xff]   ;;  %v2352_v17 = vsel %vm4887_vm8, %v2347_v59, %v2351_v35  ;;  %v2362_v18 = vsel %vm4887_vm8, %v2357_v28, %v2361_v23  ;;  %v2174_v19 = vrot.slane %v2172_v60, 4  ;;  %v2185_v27 = vshrl.u32 %v2019_v6, 16  ;;  %3898 = vst.msk [vmem:[#allocation3 + $0x8] sm:$0xff] %vm3896_vm3, %v5600_v24 }
  0xf4   : > { %v4440_v5 = vcombine.low %v2352_v17, %v2362_v18  ;;  %v2177_v22 = vrot.slane %v2175_v11, 5  ;;  %v2042_v46 = vld [vmem:[#allocation2 + $0xa8] sm:$0xf]  ;;  %1964 = vrot.lane.b32.xlu1 %v4732_v16, %s4791_s29  ;;  %v2043_v47 = vld [vmem:[#allocation2 + $0xac] sm:$0xf]  ;;  %v5605_v57 = vsel %vm4854_vm4, %v2676_v9, %v2677_v3  ;;  %v2183_v25 = vrot.slane %v2181_v37, 5 }
  0xf5   : > { %v2364_v12 = vshrl.u32 %v2042_v46, 16  ;;  %v2367_v55 = vshll.u32 %v2042_v46, 16  ;;  %v2187_v49 = vrot.slane %v2185_v27, 4  ;;  %v2373_v32 = vshll.u32 %v2043_v47, 16  ;;  %v2020_v29 = vld [vmem:[#allocation2 + $0x50] sm:$0x1]  ;;  %v5618_v23 = vpop.permute.xlu1 %3866 }
  0xf6   : > { %v2178_v26 = vor.u32 %v2177_v22, %v2174_v19  ;;  %2491 = vrot.lane.b32.xlu0 %v4432_v0, %s4793_s5  ;;  %v2377_v38 = vshrl.u32 %v2043_v47, 16  ;;  %v4464_v39 = vcombine.low %v5584_v7, %v5605_v57  ;;  %v2191_v44 = vshll.u32 %v2020_v29, 16  ;;  %v2564_v20 = vld [vmem:[#allocation2 + $0x4c] sm:$0xf]  ;;  %v2565_v48 = vld [vmem:[#allocation2 + $0x50] sm:$0x1] }
  0xf7   : > { %v2366_v35 = vrot.slane %v2364_v12, 4  ;;  %v2369_v36 = vrot.slane %v2367_v55, 5  ;;  %v2188_v1 = vor.u32 %v2187_v49, %v2183_v25  ;;  %v2375_v43 = vrot.slane %v2373_v32, 5  ;;  %v2587_v4 = vld [vmem:[#allocation2 + $0xa8] sm:$0xe]  ;;  %3906 = vst.msk [vmem:[#allocation3 + $0x48] sm:$0xff] %vm3896_vm3, %v5618_v23 }
  0xf8   : > { %v2179_v30 = vrot.slane %v2178_v26, 4  ;;  %v2044_v41 = vld [vmem:[#allocation2 + $0xb0] sm:$0x1]  ;;  %2507 = vrot.lane.b32.xlu1 %v4440_v5, %s4793_s5  ;;  %v2379_v31 = vrot.slane %v2377_v38, 4  ;;  %v4456_v45 = vrot.slane %v2584_v51, 9  ;;  %v2193_v63 = vrot.slane %v2191_v44, 5 }
  0xf9   : > { %v2370_v61 = vor.u32 %v2369_v36, %v2366_v35  ;;  %v2383_v0 = vshll.u32 %v2044_v41, 16  ;;  %v2189_v50 = vrot.slane %v2188_v1, 4  ;;  %v2730_v52 = vrot.slane %v2585_v21, 5  ;;  %v2588_v16 = vld [vmem:[#allocation2 + $0xac] sm:$0xf] }
  0xfa   : > { %v2184_v10 = vsel %vm4887_vm8, %v2179_v30, %v2183_v25  ;;  %v2380_v59 = vor.u32 %v2379_v31, %v2375_v43  ;;  %v2733_v60 = vrot.slane %v2586_v34, 5  ;;  %v4449_v3 = vrot.slane %v2563_v15, 9  ;;  %v2589_v17 = vld [vmem:[#allocation2 + $0xb0] sm:$0x1]  ;;  %v269_v25 = vld [vmem:[%s4863_s24 + $0xe8] sm:$0xff] }
  0xfb   : > { %v1444_v58 = vpop.permute.xlu0 %1443  ;;  %v2371_v14 = vrot.slane %v2370_v61, 4  ;;  %v2385_v28 = vrot.slane %v2383_v0, 5  ;;  %v2194_v6 = vsel %vm4887_vm8, %v2189_v50, %v2193_v63  ;;  %v2731_v11 = vsel %vm4854_vm4, %v4456_v45, %v2730_v52  ;;  %v3059_v35 = vld [vmem:[#allocation2 + $0x48] sm:$0xf]  ;;  %v3060_v30 = vld [vmem:[#allocation2 + $0x4c] sm:$0xf] }
  0xfc   : > { %1489 = vst.msk [vmem:[#allocation3 + $0x18] sm:$0xff] %vm1485_vm10, %v1444_v58  ;;  %v2732_v9 = vrot.slane %v2730_v52, 4  ;;  %v4433_v18 = vcombine.low %v2184_v10, %v2194_v6  ;;  %v2381_v5 = vrot.slane %v2380_v59, 4  ;;  %v2681_v22 = vrot.slane %v2564_v20, 5  ;;  %v3061_v0 = vld [vmem:[#allocation2 + $0x50] sm:$0x1] }
  0xfd   : > { %v2376_v19 = vsel %vm4887_vm8, %v2371_v14, %v2375_v43  ;;  %v1460_v37 = vpop.permute.xlu1 %1459  ;;  %v2684_v46 = vrot.slane %v2565_v48, 5  ;;  %v4457_v51 = vrot.slane %v2587_v4, 9  ;;  %v2737_v47 = vrot.slane %v2588_v16, 5  ;;  %v3083_v58 = vld [vmem:[#allocation2 + $0xa8] sm:$0xf] }
  0xfe   : > { %v2734_v27 = vsel %vm4854_vm4, %v2732_v9, %v2733_v60  ;;  %1497 = vst.msk [vmem:[#allocation3 + $0x58] sm:$0xff] %vm1485_vm10, %v1460_v37  ;;  %2493 = vrot.lane.b32.xlu0 %v4433_v18, %s4793_s5  ;;  %v2386_v55 = vsel %vm4887_vm8, %v2381_v5, %v2385_v28  ;;  %v2682_v53 = vsel %vm4854_vm4, %v4449_v3, %v2681_v22  ;;  %v2683_v26 = vrot.slane %v2681_v22, 4  ;;  %v4733_v59 = vld [vmem:[#allocation2 + $0x48] sm:$0xff]   ;;  %v3085_v22 = vld [vmem:[#allocation2 + $0xb0] sm:$0x1] }
  0xff   : > { %v1766_v12 = vpop.permute.xlu0 %1765  ;;  %v4472_v21 = vcombine.low %v2731_v11, %v2734_v27  ;;  %v4441_v49 = vcombine.low %v2376_v19, %v2386_v55  ;;  %v5643_v32 = vsel %vm4854_vm4, %v4457_v51, %v2737_v47  ;;  %v2739_v34 = vrot.slane %v2737_v47, 4  ;;  %v3084_v11 = vld [vmem:[#allocation2 + $0xac] sm:$0xf] }
 0x100   : > { %1812 = vst.msk [vmem:[#allocation3 + $0x10] sm:$0xff] %vm1809_vm11, %v1766_v12  ;;  %v2740_v29 = vrot.slane %v2589_v17, 5  ;;  %v2685_v36 = vsel %vm4854_vm4, %v2683_v26, %v2684_v46  ;;  %v331_v38 = vadd.f32 %v5595_v8, %v5576_v13  ;;  %v362_v15 = vmax.f32 %v5598_v40, 0.0  ;;  %v4734_v46 = vld [vmem:[#allocation2 + $0xa8] sm:$0xff]  }
 0x101   : > { %v1782_v1 = vpop.permute.xlu1 %1781  ;;  %2509 = vrot.lane.b32.xlu1 %v4441_v49, %s4793_s5  ;;  %v4465_v44 = vcombine.low %v2682_v53, %v2685_v36  ;;  %v308_v43 = vmul.f32 %v5572_v54, %v269_v25  ;;  %v346_v13 = vadd.f32 %v5595_v8, %v5580_v62  ;;  %v3192_v31 = vshrl.u32 %v3059_v35, 16  ;;  %v3921_v36 = vld [vmem:[#allocation3 + $0x40] sm:$0xff] }
 0x102   : > { %v2741_v41 = vsel %vm4854_vm4, %v2739_v34, %v2740_v29  ;;  %1820 = vst.msk [vmem:[#allocation3 + $0x50] sm:$0xff] %vm1809_vm11, %v1782_v1  ;;  %2812 = vrot.lane.b32.xlu0 %v4464_v39, %s4792_s30  ;;  %v363_v56 = vmax.f32 %v331_v38, 0.0  ;;  %v433_v61 = vrot.slane %v362_v15, 7  ;;  %v3195_v23 = vshll.u32 %v3059_v35, 16  ;;  %v270_v38 = vld [vmem:[%s4863_s24 + $0xf0] sm:$0xff]  ;;  %4652 = vmatprep.mubr.msk.bf16.mxu1 %vm3949_vm5, %v3921_v36 }
 0x103   : > { %v1768_v40 = vpop.permute.xlu0 %1767  ;;  %v4473_v33 = vcombine.low %v5643_v32, %v2741_v41  ;;  %v347_v62 = vadd.f32 %v5595_v8, %v308_v43  ;;  %v378_v24 = vmax.f32 %v346_v13, 0.0  ;;  %v3201_v45 = vshll.u32 %v3060_v30, 16  ;;  %v3913_v32 = vld [vmem:[#allocation3] sm:$0xff] }
 0x104   : > { %1813 = vst.msk [vmem:[#allocation3 + $0x18] sm:$0xff] %vm1809_vm11, %v1768_v40  ;;  %v434_v20 = vrot.slane %v363_v56, 7  ;;  %v517_v10 = vsel %vm414_vm7, 0.0, %v433_v61  ;;  %v3194_v50 = vrot.slane %v3192_v31, 4  ;;  %v3205_v63 = vshrl.u32 %v3060_v30, 16  ;;  %4636 = vmatprep.mubr.msk.bf16.mxu0 %vm3949_vm5, %v3913_v32  ;;  %v271_v56 = vld [vmem:[%s4863_s24 + $0xf8] sm:$0xff] }
 0x105   : > { %v1784_v7 = vpop.permute.xlu1 %1783  ;;  %2828 = vrot.lane.b32.xlu1 %v4472_v21, %s4792_s30  ;;  %v4581_v57 = vpack.c.bf16 %v517_v10, %v517_v10  ;;  %v379_v39 = vmax.f32 %v347_v62, 0.0  ;;  %v457_v52 = vrot.slane %v378_v24, 7  ;;  %v3197_v48 = vrot.slane %v3195_v23, 5  ;;  %v5689_v21 = vld [vmem:[%s6082_s3 + $0x10] ss:$0 sps:$4 sm:$0x33]  }
 0x106   : > { %1821 = vst.msk [vmem:[#allocation3 + $0x58] sm:$0xff] %vm1809_vm11, %v1784_v7  ;;  %2814 = vrot.lane.b32.xlu0 %v4465_v44, %s4792_s30  ;;  %v435_v28 = vsel %vm414_vm7, %v433_v61, %v434_v20  ;;  %v5677_v60 = vrot.slane %v3201_v45, 5  ;;  %v3207_v4 = vrot.slane %v3205_v63, 4  ;;  %v3211_v6 = vshll.u32 %v3061_v0, 16  ;;  %4674 = vmatprep.subr.msk.bf16.mxu0 %vm3998_vm6, %v5689_v21  ;;  %v3604_v10 = vld [vmem:[#allocation2 + $0x48] sm:$0xe] }
 0x107   : > { %v1943_v14 = vpop.permute.xlu0 %1942  ;;  %v4582_v9 = vpack.c.bf16 %v435_v28, %v435_v28  ;;  %779 = vst.msk [vmem:[#allocation2 + $0x54] sm:$0xf] %vm543_vm0, %v4581_v57  ;;  %v458_v3 = vrot.slane %v379_v39, 7  ;;  %v525_v16 = vsel %vm414_vm7, 0.0, %v457_v52  ;;  %v3198_v17 = vor.u32 %v3197_v48, %v3194_v50  ;;  %4675 = vmatprep.subr.msk.bf16.mxu1 %vm3998_vm6, %v5689_v21  ;;  %v3605_v39 = vld [vmem:[#allocation2 + $0x4c] sm:$0xf] }
 0x108   : > { %1989 = vst.msk [vmem:[#allocation3 + $0x10] sm:$0xff] %vm1986_vm12, %v1943_v14  ;;  %v4605_v18 = vpack.c.bf16 %v525_v16, %v525_v16  ;;  %v3208_v19 = vor.u32 %v3207_v4, %v5677_v60  ;;  %v3213_v5 = vrot.slane %v3211_v6, 5  ;;  %v3384_v37 = vshrl.u32 %v3083_v58, 16  ;;  %v3629_v32 = vld [vmem:[#allocation2 + $0xac] sm:$0xf] }
 0x109   : > { %v1959_v27 = vpop.permute.xlu1 %1958  ;;  %2830 = vrot.lane.b32.xlu1 %v4473_v33, %s4792_s30  ;;  %780 = vst.msk [vmem:[#allocation2 + $0x58] sm:$0xf] %vm543_vm0, %v4582_v9  ;;  %v459_v51 = vsel %vm414_vm7, %v457_v52, %v458_v3  ;;  %v3199_v47 = vrot.slane %v3198_v17, 4  ;;  %v3387_v12 = vshll.u32 %v3083_v58, 16  ;;  %v3393_v55 = vshll.u32 %v3084_v11, 16  ;;  %v3914_v17 = vld [vmem:[#allocation3 + $0x8] sm:$0xff] }
 0x10a   : > { %1997 = vst.msk [vmem:[#allocation3 + $0x50] sm:$0xff] %vm1986_vm12, %v1959_v27  ;;  %2990 = vrot.lane.b32.xlu0 %v4733_v59, %s4794_s6  ;;  %v4606_v53 = vpack.c.bf16 %v459_v51, %v459_v51  ;;  %v3209_v26 = vrot.slane %v3208_v19, 4  ;;  %v3386_v25 = vrot.slane %v3384_v37, 4  ;;  %v3397_v49 = vshrl.u32 %v3084_v11, 16  ;;  %v5715_v52 = vld [vmem:[#allocation2 + $0x50] sm:$0x1] }
 0x10b   : > { %803 = vst.msk [vmem:[#allocation2 + $0xb4] sm:$0xf] %vm543_vm0, %v4605_v18  ;;  %v3389_v34 = vrot.slane %v3387_v12, 5  ;;  %v3395_v29 = vrot.slane %v3393_v55, 5  ;;  %v3403_v35 = vshll.u32 %v3085_v22, 16  ;;  %v3204_v15 = vsel %vm4887_vm8, %v3199_v47, %v5677_v60 }
 0x10c   : > { %804 = vst.msk [vmem:[#allocation2 + $0xb8] sm:$0xf] %vm543_vm0, %v4606_v53  ;;  %v3399_v30 = vrot.slane %v3397_v49, 4  ;;  %v533_v1 = vsel %vm414_vm7, %v434_v20, 0.0  ;;  %v1945_v44 = vpop.permute.xlu0 %1944  ;;  %v3214_v41 = vsel %vm4887_vm8, %v3209_v26, %v3213_v5  ;;  %v541_v62 = vsel %vm414_vm7, %v458_v3, 0.0 }
 0x10d   : > { %3006 = vrot.lane.b32.xlu1 %v4734_v46, %s4794_s6  ;;  %v3390_v43 = vor.u32 %v3389_v34, %v3386_v25  ;;  %v3405_v13 = vrot.slane %v3403_v35, 5  ;;  %v4583_v40 = vpack.c.bf16 %v533_v1, %v533_v1  ;;  %1990 = vst.msk [vmem:[#allocation3 + $0x18] sm:$0xff] %vm1986_vm12, %v1945_v44  ;;  %v309_v24 = vmul.f32 %v5572_v54, %v270_v38  ;;  %v3628_v27 = vld [vmem:[#allocation2 + $0xa8] sm:$0xe]  ;;  %v3630_v44 = vld [vmem:[#allocation2 + $0xb0] sm:$0x1] }
 0x10e   : > { %v1961_v33 = vpop.permute.xlu1 %1960  ;;  %v3400_v61 = vor.u32 %v3399_v30, %v3395_v29  ;;  %v3062_v31 = vld [vmem:[#allocation2 + $0x54] sm:$0xf]  ;;  %v4607_v20 = vpack.c.bf16 %v541_v62, %v541_v62  ;;  %v4496_v63 = vcombine.low %v3204_v15, %v3214_v41  ;;  %v310_v58 = vmul.f32 %v5572_v54, %v271_v56  ;;  %v972_v41 = vld [vmem:[#allocation2 + $0x48] sm:$0xf] }
 0x10f   : > { %1998 = vst.msk [vmem:[#allocation3 + $0x58] sm:$0xff] %vm1986_vm12, %v1961_v33  ;;  %v3391_v0 = vrot.slane %v3390_v43, 4  ;;  %v3216_v23 = vshrl.u32 %v3062_v31, 16  ;;  %v3219_v45 = vshll.u32 %v3062_v31, 16  ;;  %v5719_v14 = vadd.f32 %v5595_v8, %v309_v24 }
 0x110   : > { %781 = vst.msk [vmem:[#allocation2 + $0x5c] sm:$0x1] %vm546_vm1, %v4583_v40  ;;  %v4735_v50 = vld [vmem:[#allocation2 + $0x54] sm:$0xff]   ;;  %v3401_v7 = vrot.slane %v3400_v61, 4  ;;  %v2488_v48 = vpop.permute.xlu0 %2487  ;;  %805 = vst.msk [vmem:[#allocation2 + $0xbc] sm:$0x1] %vm546_vm1, %v4607_v20  ;;  %v5732_v46 = vadd.f32 %v5595_v8, %v310_v58 }
 0x111   : > { %v3063_v57 = vld [vmem:[#allocation2 + $0x58] sm:$0xf]  ;;  %v3396_v59 = vsel %vm4887_vm8, %v3391_v0, %v3395_v29  ;;  %v3218_v28 = vrot.slane %v3216_v23, 4  ;;  %v3221_v60 = vrot.slane %v3219_v45, 5  ;;  %2534 = vst.msk [vmem:[#allocation3 + $0x10] sm:$0xff] %vm2531_vm13, %v2488_v48  ;;  %2992 = vrot.lane.b32.xlu0 %v4735_v50, %s4794_s6  ;;  %v4000_v3 = vsel %vm3998_vm6, %v5689_v21, 0 }
 0x112   : > { %v3225_v4 = vshll.u32 %v3063_v57, 16  ;;  %v2504_v6 = vpop.permute.xlu1 %2503  ;;  %v3406_v11 = vsel %vm4887_vm8, %v3401_v7, %v3405_v13  ;;  %v3229_v54 = vshrl.u32 %v3063_v57, 16  ;;  %v3086_v9 = vld [vmem:[#allocation2 + $0xb4] sm:$0xf]  ;;  %v4512_v16 = vrot.slane %v3604_v10, 9  ;;  %4635 = vmatpush3.bf16.msra.mxu0 %v4000_v3  ;;  %4673 = vmatpush3.bf16.msra.mxu1 %v4000_v3  ;;  %v3922_v21 = vld [vmem:[#allocation3 + $0x48] sm:$0xff] }
 0x113   : > { %2542 = vst.msk [vmem:[#allocation3 + $0x50] sm:$0xff] %vm2531_vm13, %v2504_v6  ;;  %v4738_v18 = vld [vmem:[#allocation2 + $0xb4] sm:$0xff]   ;;  %v4504_v19 = vcombine.low %v3396_v59, %v3406_v11  ;;  %v3222_v5 = vor.u32 %v3221_v60, %v3218_v28  ;;  %v3408_v47 = vshrl.u32 %v3086_v9, 16  ;;  %v3411_v12 = vshll.u32 %v3086_v9, 16  ;;  %v4756_v61 = vld [vmem:[#allocation2 + $0x48] sm:$0xff]  }
 0x114   : > { %v3227_v22 = vrot.slane %v3225_v4, 5  ;;  %v3087_v37 = vld [vmem:[#allocation2 + $0xb8] sm:$0xf]  ;;  %v3231_v51 = vrot.slane %v3229_v54, 4  ;;  %3008 = vrot.lane.b32.xlu1 %v4738_v18, %s4794_s6  ;;  %v3718_v25 = vrot.slane %v3605_v39, 5  ;;  %v3721_v49 = vrot.slane %v5715_v52, 5 }
 0x115   : > { %v3417_v55 = vshll.u32 %v3087_v37, 16  ;;  %v3223_v53 = vrot.slane %v3222_v5, 4  ;;  %v3421_v26 = vshrl.u32 %v3087_v37, 16  ;;  %3535 = vrot.lane.b32.xlu0 %v4496_v63, %s4795_s7  ;;  %v3410_v35 = vrot.slane %v3408_v47, 4  ;;  %4637 = vmatmul.mubr.msk.bf16.vlgmr.msra.gmra.mrb[0].mxu0 %vm3949_vm5, %v3914_v17  ;;  %v973_v50 = vld [vmem:[#allocation2 + $0x4c] sm:$0xf] }
 0x116   : > { %v3232_v29 = vor.u32 %v3231_v51, %v3227_v22  ;;  %v3413_v8 = vrot.slane %v3411_v12, 5  ;;  %v5742_v1 = vsel %vm4854_vm4, %v4512_v16, %v3718_v25  ;;  %4653 = vmatmul.mubr.msk.bf16.vlgmr.msra.gmra.mrb[0].mxu1 %vm3949_vm5, %v3922_v21  ;;  %v3720_v33 = vrot.slane %v3718_v25, 4  ;;  %944 = vst.msk [vmem:[#allocation3 + $0x30] sm:$0xff] %vm937_vm9, %v4756_v61  ;;  %v974_v58 = vld [vmem:[#allocation2 + $0x50] sm:$0x1]  ;;  %v4757_v54 = vld [vmem:[#allocation2 + $0xa8] sm:$0xff]  }
 0x117   : > { %v3064_v34 = vld [vmem:[#allocation2 + $0x5c] sm:$0x1]  ;;  %v3419_v36 = vrot.slane %v3417_v55, 5  ;;  %v3228_v38 = vsel %vm4887_vm8, %v3223_v53, %v3227_v22  ;;  %v3423_v30 = vrot.slane %v3421_v26, 4  ;;  %v4520_v56 = vrot.slane %v3628_v27, 9  ;;  %952 = vst.msk [vmem:[#allocation3 + $0x70] sm:$0xff] %vm937_vm9, %v4757_v54 }
 0x118   : > { %v3235_v15 = vshll.u32 %v3064_v34, 16  ;;  %v3233_v43 = vrot.slane %v3232_v29, 4  ;;  %v3088_v13 = vld [vmem:[#allocation2 + $0xbc] sm:$0x1]  ;;  %v3414_v40 = vor.u32 %v3413_v8, %v3410_v35  ;;  %3551 = vrot.lane.b32.xlu1 %v4504_v19, %s4795_s7  ;;  %v3774_v0 = vrot.slane %v3629_v32, 5 }
 0x119   : > { %v3424_v62 = vor.u32 %v3423_v30, %v3419_v36  ;;  %v3427_v24 = vshll.u32 %v3088_v13, 16  ;;  %v3722_v20 = vsel %vm4854_vm4, %v3720_v33, %v3721_v49  ;;  %v3777_v10 = vrot.slane %v3630_v44, 5  ;;  %v996_v6 = vld [vmem:[#allocation2 + $0xa8] sm:$0xf]  ;;  %v997_v11 = vld [vmem:[#allocation2 + $0xac] sm:$0xf] }
 0x11a   : > { %v3237_v31 = vrot.slane %v3235_v15, 5  ;;  %v3415_v45 = vrot.slane %v3414_v40, 4  ;;  %v1150_v63 = vshrl.u32 %v972_v41, 16  ;;  %v4528_v48 = vcombine.low %v5742_v1, %v3722_v20  ;;  %v998_v18 = vld [vmem:[#allocation2 + $0xb0] sm:$0x1] }
 0x11b   : > { %v2490_v23 = vpop.permute.xlu0 %2489  ;;  %v3425_v39 = vrot.slane %v3424_v62, 4  ;;  %v3429_v52 = vrot.slane %v3427_v24, 5  ;;  %v3775_v60 = vsel %vm4854_vm4, %v4520_v56, %v3774_v0  ;;  %v3776_v4 = vrot.slane %v3774_v0, 4  ;;  %v3607_v51 = vld [vmem:[#allocation2 + $0x54] sm:$0xe] }
 0x11c   : > { %2535 = vst.msk [vmem:[#allocation3 + $0x18] sm:$0xff] %vm2531_vm13, %v2490_v23  ;;  %v3238_v57 = vsel %vm4887_vm8, %v3233_v43, %v3237_v31  ;;  %v3420_v28 = vsel %vm4887_vm8, %v3415_v45, %v3419_v36  ;;  %v1152_v3 = vrot.slane %v1150_v63, 4  ;;  %v1153_v16 = vshll.u32 %v972_v41, 16  ;;  %v3608_v47 = vld [vmem:[#allocation2 + $0x58] sm:$0xf] }
 0x11d   : > { %v2506_v7 = vpop.permute.xlu1 %2505  ;;  %v4497_v59 = vcombine.low %v3228_v38, %v3238_v57  ;;  %v3430_v9 = vsel %vm4887_vm8, %v3425_v39, %v3429_v52  ;;  %v1159_v17 = vshll.u32 %v973_v50, 16  ;;  %v3778_v22 = vsel %vm4854_vm4, %v3776_v4, %v3777_v10  ;;  %v3631_v25 = vld [vmem:[#allocation2 + $0xb4] sm:$0xe]  ;;  %v3609_v35 = vld [vmem:[#allocation2 + $0x5c] sm:$0x1] }
 0x11e   : > { %2543 = vst.msk [vmem:[#allocation3 + $0x58] sm:$0xff] %vm2531_vm13, %v2506_v7  ;;  %v4505_v5 = vcombine.low %v3420_v28, %v3430_v9  ;;  %v1163_v37 = vshrl.u32 %v973_v50, 16  ;;  %v1169_v27 = vshll.u32 %v974_v58, 16  ;;  %v4536_v55 = vcombine.low %v3775_v60, %v3778_v22  ;;  %v3632_v30 = vld [vmem:[#allocation2 + $0xb8] sm:$0xf] }
 0x11f   : > { %v2809_v19 = vpop.permute.xlu0 %2808  ;;  %3537 = vrot.lane.b32.xlu0 %v4497_v59, %s4795_s7  ;;  %v1155_v21 = vrot.slane %v1153_v16, 5  ;;  %v1161_v53 = vrot.slane %v1159_v17, 5  ;;  %v1342_v26 = vshrl.u32 %v996_v6, 16  ;;  %v1345_v34 = vshll.u32 %v996_v6, 16  ;;  %v3633_v40 = vld [vmem:[#allocation2 + $0xbc] sm:$0x1] }
 0x120   : > { %2855 = vst.msk [vmem:[#allocation3 + $0x10] sm:$0xff] %vm2852_vm14, %v2809_v19  ;;  %3553 = vrot.lane.b32.xlu1 %v4505_v5, %s4795_s7  ;;  %v1165_v49 = vrot.slane %v1163_v37, 4  ;;  %v1171_v32 = vrot.slane %v1169_v27, 5  ;;  %v1351_v29 = vshll.u32 %v997_v11, 16  ;;  %v1355_v38 = vshrl.u32 %v997_v11, 16  ;;  %v4758_v50 = vld [vmem:[#allocation2 + $0x54] sm:$0xff]  }
 0x121   : > { %v2825_v12 = vpop.permute.xlu1 %2824  ;;  %v1156_v8 = vor.u32 %v1155_v21, %v1152_v3  ;;  %v1344_v36 = vrot.slane %v1342_v26, 4  ;;  %v1361_v15 = vshll.u32 %v998_v18, 16  ;;  %v1347_v41 = vrot.slane %v1345_v34, 5  ;;  %v975_v24 = vld [vmem:[#allocation2 + $0x54] sm:$0xf]  ;;  %945 = vst.msk [vmem:[#allocation3 + $0x38] sm:$0xff] %vm937_vm9, %v4758_v50 }
 0x122   : > { %2863 = vst.msk [vmem:[#allocation3 + $0x50] sm:$0xff] %vm2852_vm14, %v2825_v12  ;;  %v1166_v44 = vor.u32 %v1165_v49, %v1161_v53  ;;  %v1353_v43 = vrot.slane %v1351_v29, 5  ;;  %v4513_v13 = vrot.slane %v3607_v51, 9  ;;  %v1357_v61 = vrot.slane %v1355_v38, 4  ;;  %v976_v10 = vld [vmem:[#allocation2 + $0x58] sm:$0xf] }
 0x123   : > { %v2811_v1 = vpop.permute.xlu0 %2810  ;;  %3856 = vrot.lane.b32.xlu0 %v4528_v48, %s4796_s8  ;;  %v1157_v56 = vrot.slane %v1156_v8, 4  ;;  %v1363_v31 = vrot.slane %v1361_v15, 5  ;;  %v3725_v62 = vrot.slane %v3608_v47, 5  ;;  %v1348_v23 = vor.u32 %v1347_v41, %v1344_v36  ;;  %v977_v52 = vld [vmem:[#allocation2 + $0x5c] sm:$0x1]  ;;  %v4759_v5 = vld [vmem:[#allocation2 + $0xb4] sm:$0xff]  }
 0x124   : > { %2856 = vst.msk [vmem:[#allocation3 + $0x18] sm:$0xff] %vm2852_vm14, %v2811_v1  ;;  %3872 = vrot.lane.b32.xlu1 %v4536_v55, %s4796_s8  ;;  %v1167_v0 = vrot.slane %v1166_v44, 4  ;;  %v3728_v45 = vrot.slane %v3609_v35, 5  ;;  %v4521_v20 = vrot.slane %v3631_v25, 9  ;;  %v1358_v7 = vor.u32 %v1357_v61, %v1353_v43  ;;  %v999_v19 = vld [vmem:[#allocation2 + $0xb4] sm:$0xf] }
 0x125   : > { %v2827_v33 = vpop.permute.xlu1 %2826  ;;  %v1162_v63 = vsel %vm4887_vm8, %v1157_v56, %v1161_v53  ;;  %v3726_v57 = vsel %vm4854_vm4, %v4513_v13, %v3725_v62  ;;  %v3727_v39 = vrot.slane %v3725_v62, 4  ;;  %v1349_v59 = vrot.slane %v1348_v23, 4  ;;  %v1000_v47 = vld [vmem:[#allocation2 + $0xb8] sm:$0xf]  ;;  %v1520_v12 = vld [vmem:[#allocation2 + $0x48] sm:$0xe] }
 0x126   : > { %2864 = vst.msk [vmem:[#allocation3 + $0x58] sm:$0xff] %vm2852_vm14, %v2827_v33  ;;  %v1172_v58 = vsel %vm4887_vm8, %v1167_v0, %v1171_v32  ;;  %v3781_v28 = vrot.slane %v3632_v30, 5  ;;  %v3784_v60 = vrot.slane %v3633_v40, 5  ;;  %v1359_v11 = vrot.slane %v1358_v7, 4  ;;  %v1001_v25 = vld [vmem:[#allocation2 + $0xbc] sm:$0x1] }
 0x127   : > { %v2987_v48 = vpop.permute.xlu0 %2986  ;;  %v4370_v6 = vcombine.low %v1162_v63, %v1172_v58  ;;  %v3729_v54 = vsel %vm4854_vm4, %v3727_v39, %v3728_v45  ;;  %v1174_v9 = vshrl.u32 %v975_v24, 16  ;;  %v1354_v3 = vsel %vm4887_vm8, %v1349_v59, %v1353_v43  ;;  %v1521_v49 = vld [vmem:[#allocation2 + $0x4c] sm:$0xf]  ;;  %953 = vst.msk [vmem:[#allocation3 + $0x78] sm:$0xff] %vm937_vm9, %v4759_v5  ;;  %v1522_v36 = vld [vmem:[#allocation2 + $0x50] sm:$0x1] }
 0x128   : > { %3033 = vst.msk [vmem:[#allocation3 + $0x10] sm:$0xff] %vm3030_vm15, %v2987_v48  ;;  %v4529_v16 = vcombine.low %v3726_v57, %v3729_v54  ;;  %v3782_v17 = vsel %vm4854_vm4, %v4521_v20, %v3781_v28  ;;  %v3783_v18 = vrot.slane %v3781_v28, 4  ;;  %v1364_v22 = vsel %vm4887_vm8, %v1359_v11, %v1363_v31  ;;  %v1544_v44 = vld [vmem:[#allocation2 + $0xa8] sm:$0xe]  ;;  %v1545_v56 = vld [vmem:[#allocation2 + $0xac] sm:$0xf] }
 0x129   : > { %v3003_v4 = vpop.permute.xlu1 %3002  ;;  %1449 = vrot.lane.b32.xlu0 %v4370_v6, %s4790_s28  ;;  %v1176_v37 = vrot.slane %v1174_v9, 4  ;;  %v1177_v27 = vshll.u32 %v975_v24, 16  ;;  %v1183_v51 = vshll.u32 %v976_v10, 16  ;;  %v4378_v55 = vcombine.low %v1354_v3, %v1364_v22  ;;  %v1546_v0 = vld [vmem:[#allocation2 + $0xb0] sm:$0x1] }
 0x12a   : > { %3041 = vst.msk [vmem:[#allocation3 + $0x50] sm:$0xff] %vm3030_vm15, %v3003_v4  ;;  %v3785_v21 = vsel %vm4854_vm4, %v3783_v18, %v3784_v60  ;;  %v1187_v53 = vshrl.u32 %v976_v10, 16  ;;  %v1193_v26 = vshll.u32 %v977_v52, 16  ;;  %v1366_v8 = vshrl.u32 %v999_v19, 16  ;;  %v1523_v63 = vld [vmem:[#allocation2 + $0x54] sm:$0xe] }
 0x12b   : > { %v2989_v32 = vpop.permute.xlu0 %2988  ;;  %v4537_v34 = vcombine.low %v3782_v17, %v3785_v21  ;;  %v1179_v29 = vrot.slane %v1177_v27, 5  ;;  %v1185_v35 = vrot.slane %v1183_v51, 5  ;;  %1465 = vrot.lane.b32.xlu1 %v4378_v55, %s4790_s28  ;;  %v1369_v30 = vshll.u32 %v999_v19, 16  ;;  %v1524_v48 = vld [vmem:[#allocation2 + $0x58] sm:$0xf] }
 0x12c   : > { %3034 = vst.msk [vmem:[#allocation3 + $0x18] sm:$0xff] %vm3030_vm15, %v2989_v32  ;;  %v1189_v38 = vrot.slane %v1187_v53, 4  ;;  %v1195_v15 = vrot.slane %v1193_v26, 5  ;;  %v1375_v1 = vshll.u32 %v1000_v47, 16  ;;  %v1368_v13 = vrot.slane %v1366_v8, 4 }
 0x12d   : > { %v3005_v41 = vpop.permute.xlu1 %3004  ;;  %3858 = vrot.lane.b32.xlu0 %v4529_v16, %s4796_s8  ;;  %v1180_v43 = vor.u32 %v1179_v29, %v1176_v37  ;;  %v1379_v40 = vshrl.u32 %v1000_v47, 16  ;;  %v1385_v33 = vshll.u32 %v1001_v25, 16  ;;  %v1371_v31 = vrot.slane %v1369_v30, 5  ;;  %v1525_v58 = vld [vmem:[#allocation2 + $0x5c] sm:$0x1] }
 0x12e   : > { %3042 = vst.msk [vmem:[#allocation3 + $0x58] sm:$0xff] %vm3030_vm15, %v3005_v41  ;;  %v1190_v61 = vor.u32 %v1189_v38, %v1185_v35  ;;  %v1377_v62 = vrot.slane %v1375_v1, 5  ;;  %v4386_v24 = vrot.slane %v1520_v12, 9  ;;  %v1645_v50 = vrot.slane %v1521_v49, 5  ;;  %v1547_v11 = vld [vmem:[#allocation2 + $0xb4] sm:$0xe] }
 0x12f   : > { %v3532_v23 = vpop.permute.xlu0 %3531  ;;  %v1181_v45 = vrot.slane %v1180_v43, 4  ;;  %v1381_v20 = vrot.slane %v1379_v40, 4  ;;  %v1387_v10 = vrot.slane %v1385_v33, 5  ;;  %3874 = vrot.lane.b32.xlu1 %v4537_v34, %s4796_s8  ;;  %v1372_v57 = vor.u32 %v1371_v31, %v1368_v13  ;;  %v1548_v54 = vld [vmem:[#allocation2 + $0xb8] sm:$0xf] }
 0x130   : > { %3578 = vst.msk [vmem:[#allocation3 + $0x10] sm:$0xff] %vm3575_vm2, %v3532_v23  ;;  %v1191_v7 = vrot.slane %v1190_v61, 4  ;;  %v1648_v39 = vrot.slane %v1522_v36, 5  ;;  %v4394_v52 = vrot.slane %v1544_v44, 9  ;;  %v1646_v4 = vsel %vm4854_vm4, %v4386_v24, %v1645_v50  ;;  %v1549_v18 = vld [vmem:[#allocation2 + $0xbc] sm:$0x1] }
 0x131   : > { %v3548_v59 = vpop.permute.xlu1 %3547  ;;  %v1186_v28 = vsel %vm4887_vm8, %v1181_v45, %v1185_v35  ;;  %v1382_v60 = vor.u32 %v1381_v20, %v1377_v62  ;;  %v1647_v6 = vrot.slane %v1645_v50, 4  ;;  %v1373_v3 = vrot.slane %v1372_v57, 4  ;;  %v2021_v27 = vld [vmem:[#allocation2 + $0x54] sm:$0xf]  ;;  %v2022_v21 = vld [vmem:[#allocation2 + $0x58] sm:$0xf] }
 0x132   : > { %3586 = vst.msk [vmem:[#allocation3 + $0x50] sm:$0xff] %vm3575_vm2, %v3548_v59  ;;  %v1196_v9 = vsel %vm4887_vm8, %v1191_v7, %v1195_v15  ;;  %v1701_v16 = vrot.slane %v1545_v56, 5  ;;  %v1704_v17 = vrot.slane %v1546_v0, 5  ;;  %v4387_v37 = vrot.slane %v1523_v63, 9  ;;  %v2023_v33 = vld [vmem:[#allocation2 + $0x5c] sm:$0x1] }
 0x133   : > { %v4371_v19 = vcombine.low %v1186_v28, %v1196_v9  ;;  %v1383_v5 = vrot.slane %v1382_v60, 4  ;;  %v1649_v22 = vsel %vm4854_vm4, %v1647_v6, %v1648_v39  ;;  %v1378_v51 = vsel %vm4887_vm8, %v1373_v3, %v1377_v62 }
 0x134   : > { %v4402_v47 = vcombine.low %v1646_v4, %v1649_v22  ;;  %v1702_v12 = vsel %vm4854_vm4, %v4394_v52, %v1701_v16  ;;  %v1703_v55 = vrot.slane %v1701_v16, 4  ;;  %v1652_v26 = vrot.slane %v1524_v48, 5  ;;  %v2047_v52 = vld [vmem:[#allocation2 + $0xbc] sm:$0x1]  ;;  %v4744_v48 = vld [vmem:[#allocation2 + $0x54] sm:$0xff]  }
 0x135   : > { %1451 = vrot.lane.b32.xlu0 %v4371_v19, %s4790_s28  ;;  %v1388_v53 = vsel %vm4887_vm8, %v1383_v5, %v1387_v10  ;;  %v1655_v25 = vrot.slane %v1525_v58, 5  ;;  %v4395_v49 = vrot.slane %v1547_v11, 9  ;;  %v1708_v29 = vrot.slane %v1548_v54, 5  ;;  %v2046_v10 = vld [vmem:[#allocation2 + $0xb8] sm:$0xf] }
 0x136   : > { %v4379_v32 = vcombine.low %v1378_v51, %v1388_v53  ;;  %v1705_v34 = vsel %vm4854_vm4, %v1703_v55, %v1704_v17  ;;  %v1711_v35 = vrot.slane %v1549_v18, 5  ;;  %v1653_v36 = vsel %vm4854_vm4, %v4387_v37, %v1652_v26  ;;  %v2024_v4 = vld [vmem:[#allocation2 + $0x60] sm:$0xf]  ;;  %v2025_v5 = vld [vmem:[#allocation2 + $0x64] sm:$0xf]  ;;  %v4745_v22 = vld [vmem:[#allocation2 + $0xb4] sm:$0xff]  }
 0x137   : > { %v4410_v8 = vcombine.low %v1702_v12, %v1705_v34  ;;  %v1654_v38 = vrot.slane %v1652_v26, 4  ;;  %v380_v15 = vmax.f32 %v5719_v14, 0.0  ;;  %v1709_v1 = vsel %vm4854_vm4, %v4395_v49, %v1708_v29  ;;  %v4746_v55 = vld [vmem:[#allocation2 + $0x60] sm:$0xff]  }
 0x138   : > { %1467 = vrot.lane.b32.xlu1 %v4379_v32, %s4790_s28  ;;  %v1710_v44 = vrot.slane %v1708_v29, 4  ;;  %v381_v41 = vmax.f32 %v5732_v46, 0.0  ;;  %v2196_v43 = vshrl.u32 %v2021_v27, 16  ;;  %v2199_v14 = vshll.u32 %v2021_v27, 16  ;;  %v2045_v46 = vld [vmem:[#allocation2 + $0xb4] sm:$0xf]  ;;  %s6032_s28 = scalar_lea.vmem %s6083_s4, %s4561_s19 }
 0x139   : > { %v3534_v30 = vpop.permute.xlu0 %3533  ;;  %1773 = vrot.lane.b32.xlu0 %v4402_v47, %s4789_s27  ;;  %v1656_v13 = vsel %vm4854_vm4, %v1654_v38, %v1655_v25  ;;  %v460_v40 = vrot.slane %v380_v15, 7  ;;  %v2205_v56 = vshll.u32 %v2022_v21, 16  ;;  %v2209_v57 = vshrl.u32 %v2022_v21, 16  ;;  %v2026_v47 = vld [vmem:[#allocation2 + $0x68] sm:$0x1] }
 0x13a   : > { %3579 = vst.msk [vmem:[#allocation3 + $0x18] sm:$0xff] %vm3575_vm2, %v3534_v30  ;;  %v4403_v61 = vcombine.low %v1653_v36, %v1656_v13  ;;  %v1712_v31 = vsel %vm4854_vm4, %v1710_v44, %v1711_v35  ;;  %v5829_v62 = vrot.slane %v381_v41, 7  ;;  %v2198_v24 = vrot.slane %v2196_v43, 4 }
 0x13b   : > { %v4411_v0 = vcombine.low %v1709_v1, %v1712_v31  ;;  %v526_v23 = vsel %vm414_vm7, 0.0, %v460_v40  ;;  %v2201_v45 = vrot.slane %v2199_v14, 5  ;;  %v5832_v20 = vrot.slane %v2205_v56, 5  ;;  %v2566_v1 = vld [vmem:[#allocation2 + $0x54] sm:$0xe] }
 0x13c   : > { %1789 = vrot.lane.b32.xlu1 %v4410_v8, %s4789_s27  ;;  %v462_v63 = vsel %vm414_vm7, %v460_v40, %v5829_v62  ;;  %v4608_v7 = vpack.c.bf16 %v526_v23, %v526_v23  ;;  %v2215_v39 = vshll.u32 %v2023_v33, 16  ;;  %v2388_v28 = vshrl.u32 %v2045_v46, 16  ;;  %v2567_v33 = vld [vmem:[#allocation2 + $0x58] sm:$0xf] }
 0x13d   : > { %v3853_v50 = vpop.permute.xlu0 %3852  ;;  %1775 = vrot.lane.b32.xlu0 %v4403_v61, %s4789_s27  ;;  %v4609_v58 = vpack.c.bf16 %v462_v63, %v462_v63  ;;  %v2202_v59 = vor.u32 %v2201_v45, %v2198_v24  ;;  %v2391_v60 = vshll.u32 %v2045_v46, 16  ;;  %v2211_v11 = vrot.slane %v2209_v57, 4  ;;  %v2568_v46 = vld [vmem:[#allocation2 + $0x5c] sm:$0x1] }
 0x13e   : > { %3899 = vst.msk [vmem:[#allocation3 + $0x10] sm:$0xff] %vm3896_vm3, %v3853_v50  ;;  %v3550_v6 = vpop.permute.xlu1 %3549  ;;  %v2217_v54 = vrot.slane %v2215_v39, 5  ;;  %v2397_v9 = vshll.u32 %v2046_v10, 16  ;;  %v2401_v3 = vshrl.u32 %v2046_v10, 16  ;;  %v2390_v17 = vrot.slane %v2388_v28, 4 }
 0x13f   : > { %806 = vst.msk [vmem:[#allocation2 + $0xc0] sm:$0xf] %vm543_vm0, %v4608_v7  ;;  %807 = vst.msk [vmem:[#allocation2 + $0xc4] sm:$0xf] %vm543_vm0, %v4609_v58  ;;  %v2203_v16 = vrot.slane %v2202_v59, 4  ;;  %v2393_v18 = vrot.slane %v2391_v60, 5  ;;  %v2212_v37 = vor.u32 %v2211_v11, %v5832_v20 }
 0x140   : > { %3587 = vst.msk [vmem:[#allocation3 + $0x58] sm:$0xff] %vm3575_vm2, %v3550_v6  ;;  %v2407_v19 = vshll.u32 %v2047_v52, 16  ;;  %1791 = vrot.lane.b32.xlu1 %v4411_v0, %s4789_s27  ;;  %v2399_v27 = vrot.slane %v2397_v9, 5  ;;  %v2403_v51 = vrot.slane %v2401_v3, 4  ;;  %v2220_v12 = vshrl.u32 %v2024_v4, 16 }
 0x141   : > { %1950 = vrot.lane.b32.xlu0 %v4744_v48, %s4791_s29  ;;  %v2208_v21 = vsel %vm4887_vm8, %v2203_v16, %v5832_v20  ;;  %v2394_v53 = vor.u32 %v2393_v18, %v2390_v17  ;;  %v2223_v25 = vshll.u32 %v2024_v4, 16  ;;  %v2213_v32 = vrot.slane %v2212_v37, 4  ;;  %v2590_v52 = vld [vmem:[#allocation2 + $0xb4] sm:$0xe]  ;;  %v2591_v48 = vld [vmem:[#allocation2 + $0xb8] sm:$0xf] }
 0x142   : > { %v2409_v26 = vrot.slane %v2407_v19, 5  ;;  %v3869_v49 = vpop.permute.xlu1 %3868  ;;  %v2404_v34 = vor.u32 %v2403_v51, %v2399_v27  ;;  %v2222_v29 = vrot.slane %v2220_v12, 4  ;;  %v2229_v35 = vshll.u32 %v2025_v5, 16  ;;  %v2569_v4 = vld [vmem:[#allocation2 + $0x60] sm:$0xe] }
 0x143   : > { %3907 = vst.msk [vmem:[#allocation3 + $0x50] sm:$0xff] %vm3896_vm3, %v3869_v49  ;;  %v1446_v8 = vpop.permute.xlu0 %1445  ;;  %v2395_v36 = vrot.slane %v2394_v53, 4  ;;  %v2225_v38 = vrot.slane %v2223_v25, 5  ;;  %v2233_v15 = vshrl.u32 %v2025_v5, 16  ;;  %v2239_v30 = vshll.u32 %v2026_v47, 16 }
 0x144   : > { %1490 = vst.msk [vmem:[#allocation3 + $0x20] sm:$0xff] %vm1485_vm10, %v1446_v8  ;;  %1966 = vrot.lane.b32.xlu1 %v4745_v22, %s4791_s29  ;;  %v2218_v41 = vsel %vm4887_vm8, %v2213_v32, %v2217_v54  ;;  %v2405_v43 = vrot.slane %v2404_v34, 4  ;;  %v2231_v13 = vrot.slane %v2229_v35, 5  ;;  %v542_v40 = vsel %vm414_vm7, %v5829_v62, 0.0  ;;  %v2570_v6 = vld [vmem:[#allocation2 + $0x64] sm:$0xf] }
 0x145   : > { %v3915_v44 = vld [vmem:[#allocation3 + $0x10] sm:$0xff]  ;;  %1952 = vrot.lane.b32.xlu0 %v4746_v55, %s4791_s29  ;;  %v4434_v14 = vcombine.low %v2208_v21, %v2218_v41  ;;  %v2400_v56 = vsel %vm4887_vm8, %v2395_v36, %v2399_v27  ;;  %v2226_v61 = vor.u32 %v2225_v38, %v2222_v29  ;;  %v2235_v31 = vrot.slane %v2233_v15, 4  ;;  %v2592_v22 = vld [vmem:[#allocation2 + $0xbc] sm:$0x1]  ;;  %v3065_v32 = vld [vmem:[#allocation2 + $0x60] sm:$0xf] }
 0x146   : > { %4640 = vmatprep.mubr.msk.bf16.mxu0 %vm3949_vm5, %v3915_v44  ;;  %v2048_v24 = vld [vmem:[#allocation2 + $0xc0] sm:$0xf]  ;;  %v1462_v0 = vpop.permute.xlu1 %1461  ;;  %v2410_v45 = vsel %vm4887_vm8, %v2405_v43, %v2409_v26  ;;  %v2241_v20 = vrot.slane %v2239_v30, 5  ;;  %v4610_v62 = vpack.c.bf16 %v542_v40, %v542_v40  ;;  %v2049_v10 = vld [vmem:[#allocation2 + $0xc4] sm:$0xf]  ;;  %v4450_v60 = vrot.slane %v2566_v1, 9 }
 0x147   : > { %v4747_v23 = vld [vmem:[#allocation2 + $0xc0] sm:$0xff]   ;;  %1498 = vst.msk [vmem:[#allocation3 + $0x60] sm:$0xff] %vm1485_vm10, %v1462_v0  ;;  %v3855_v50 = vpop.permute.xlu0 %3854  ;;  %v4442_v63 = vcombine.low %v2400_v56, %v2410_v45  ;;  %v2227_v7 = vrot.slane %v2226_v61, 4  ;;  %v2236_v57 = vor.u32 %v2235_v31, %v2231_v13  ;;  %v2412_v39 = vshrl.u32 %v2048_v24, 16  ;;  %v2571_v12 = vld [vmem:[#allocation2 + $0x68] sm:$0x1] }
 0x148   : > { %3900 = vst.msk [vmem:[#allocation3 + $0x18] sm:$0xff] %vm3896_vm3, %v3855_v50  ;;  %1968 = vrot.lane.b32.xlu1 %v4747_v23, %s4791_s29  ;;  %v2415_v58 = vshll.u32 %v2048_v24, 16  ;;  %v2421_v59 = vshll.u32 %v2049_v10, 16  ;;  %v2425_v28 = vshrl.u32 %v2049_v10, 16  ;;  %v2688_v3 = vrot.slane %v2567_v33, 5 }
 0x149   : > { %808 = vst.msk [vmem:[#allocation2 + $0xc8] sm:$0x1] %vm546_vm1, %v4610_v62  ;;  %2495 = vrot.lane.b32.xlu0 %v4434_v14, %s4793_s5  ;;  %v2232_v11 = vsel %vm4887_vm8, %v2227_v7, %v2231_v13  ;;  %v2237_v54 = vrot.slane %v2236_v57, 4  ;;  %v2414_v9 = vrot.slane %v2412_v39, 4  ;;  %v2691_v5 = vrot.slane %v2568_v46, 5 }
 0x14a   : > { %v3871_v16 = vpop.permute.xlu1 %3870  ;;  %v2417_v17 = vrot.slane %v2415_v58, 5  ;;  %v5868_v18 = vrot.slane %v2421_v59, 5  ;;  %v2427_v19 = vrot.slane %v2425_v28, 4  ;;  %v2689_v27 = vsel %vm4854_vm4, %v4450_v60, %v2688_v3  ;;  %v3923_v55 = vld [vmem:[#allocation3 + $0x50] sm:$0xff]  ;;  %v2593_v49 = vld [vmem:[#allocation2 + $0xc0] sm:$0xe] }
 0x14b   : > { %3908 = vst.msk [vmem:[#allocation3 + $0x58] sm:$0xff] %vm3896_vm3, %v3871_v16  ;;  %v2242_v37 = vsel %vm4887_vm8, %v2237_v54, %v2241_v20  ;;  %v2690_v51 = vrot.slane %v2688_v3, 4  ;;  %v4458_v47 = vrot.slane %v2590_v52, 9  ;;  %v2744_v25 = vrot.slane %v2591_v48, 5  ;;  %4656 = vmatprep.mubr.msk.bf16.mxu1 %vm3949_vm5, %v3923_v55  ;;  %v2594_v36 = vld [vmem:[#allocation2 + $0xc4] sm:$0xf] }
 0x14c   : > { %2511 = vrot.lane.b32.xlu1 %v4442_v63, %s4793_s5  ;;  %v4435_v21 = vcombine.low %v2232_v11, %v2242_v37  ;;  %v2418_v53 = vor.u32 %v2417_v17, %v2414_v9  ;;  %v2428_v26 = vor.u32 %v2427_v19, %v5868_v18  ;;  %v2747_v29 = vrot.slane %v2592_v22, 5  ;;  %v3066_v44 = vld [vmem:[#allocation2 + $0x64] sm:$0xf]  ;;  %v3067_v62 = vld [vmem:[#allocation2 + $0x68] sm:$0x1] }
 0x14d   : > { %v2692_v34 = vsel %vm4854_vm4, %v2690_v51, %v2691_v5  ;;  %v4451_v35 = vrot.slane %v2569_v4, 9  ;;  %v2695_v8 = vrot.slane %v2570_v6, 5  ;;  %v5883_v1 = vsel %vm4854_vm4, %v4458_v47, %v2744_v25  ;;  %v3089_v50 = vld [vmem:[#allocation2 + $0xc0] sm:$0xf]  ;;  %v3090_v9 = vld [vmem:[#allocation2 + $0xc4] sm:$0xf] }
 0x14e   : > { %2497 = vrot.lane.b32.xlu0 %v4435_v21, %s4793_s5  ;;  %v2419_v38 = vrot.slane %v2418_v53, 4  ;;  %v2429_v15 = vrot.slane %v2428_v26, 4  ;;  %v4466_v30 = vcombine.low %v2689_v27, %v2692_v34  ;;  %v2746_v13 = vrot.slane %v2744_v25, 4  ;;  %v3068_v22 = vld [vmem:[#allocation2 + $0x6c] sm:$0xf]  ;;  %v4748_v51 = vld [vmem:[#allocation2 + $0x60] sm:$0xff]  }
 0x14f   : > { %v3916_v41 = vld [vmem:[#allocation3 + $0x18] sm:$0xff]  ;;  %v2696_v40 = vsel %vm4854_vm4, %v4451_v35, %v2695_v8  ;;  %v2697_v33 = vrot.slane %v2695_v8, 4  ;;  %v2698_v14 = vrot.slane %v2571_v12, 5  ;;  %v4459_v46 = vrot.slane %v2593_v49, 9 }
 0x150   : > { %v2050_v43 = vld [vmem:[#allocation2 + $0xc8] sm:$0x1]  ;;  %v1448_v56 = vpop.permute.xlu0 %1447  ;;  %4641 = vmatmul.mubr.msk.bf16.gmra.mrb[4].mxu0 %vm3949_vm5, %v3916_v41  ;;  %v2424_v61 = vsel %vm4887_vm8, %v2419_v38, %v5868_v18  ;;  %v2751_v0 = vrot.slane %v2594_v36, 5  ;;  %v5894_v23 = vsel %vm4854_vm4, %v2746_v13, %v2747_v29  ;;  %v3240_v10 = vshrl.u32 %v3065_v32, 16  ;;  %v3069_v29 = vld [vmem:[#allocation2 + $0x70] sm:$0xf] }
 0x151   : > { %v2431_v31 = vshll.u32 %v2050_v43, 16  ;;  %v2595_v24 = vld [vmem:[#allocation2 + $0xc8] sm:$0x1]  ;;  %1491 = vst.msk [vmem:[#allocation3 + $0x28] sm:$0xff] %vm1485_vm10, %v1448_v56  ;;  %v2699_v45 = vsel %vm4854_vm4, %v2697_v33, %v2698_v14  ;;  %v4474_v57 = vcombine.low %v5883_v1, %v5894_v23  ;;  %v3243_v28 = vshll.u32 %v3065_v32, 16  ;;  %v4750_v41 = vld [vmem:[#allocation2 + $0x6c] sm:$0xff]  }
 0x152   : > { %v2754_v20 = vrot.slane %v2595_v24, 5  ;;  %v1464_v63 = vpop.permute.xlu1 %1463  ;;  %2816 = vrot.lane.b32.xlu0 %v4466_v30, %s4792_s30  ;;  %v4467_v39 = vcombine.low %v2696_v40, %v2699_v45  ;;  %v5903_v52 = vsel %vm4854_vm4, %v4459_v46, %v2751_v0  ;;  %v3924_v48 = vld [vmem:[#allocation3 + $0x58] sm:$0xff]  ;;  %v2753_v58 = vrot.slane %v2751_v0, 4  ;;  %v3091_v5 = vld [vmem:[#allocation2 + $0xc8] sm:$0x1] }
 0x153   : > { %v2433_v7 = vrot.slane %v2431_v31, 5  ;;  %1499 = vst.msk [vmem:[#allocation3 + $0x68] sm:$0xff] %vm1485_vm10, %v1464_v63  ;;  %v3242_v59 = vrot.slane %v3240_v10, 4  ;;  %v3249_v60 = vshll.u32 %v3066_v44, 16  ;;  %4657 = vmatmul.mubr.msk.bf16.gmra.mrb[4].mxu1 %vm3949_vm5, %v3924_v48  ;;  %v3253_v11 = vshrl.u32 %v3066_v44, 16 }
 0x154   : > { %v1770_v4 = vpop.permute.xlu0 %1769  ;;  %v3259_v54 = vshll.u32 %v3067_v62, 16  ;;  %v3432_v3 = vshrl.u32 %v3089_v50, 16  ;;  %v5912_v17 = vsel %vm4854_vm4, %v2753_v58, %v2754_v20  ;;  %v3245_v18 = vrot.slane %v3243_v28, 5  ;;  %v3070_v1 = vld [vmem:[#allocation2 + $0x74] sm:$0x1] }
 0x155   : > { %v2434_v6 = vsel %vm4887_vm8, %v2429_v15, %v2433_v7  ;;  %1814 = vst.msk [vmem:[#allocation3 + $0x20] sm:$0xff] %vm1809_vm11, %v1770_v4  ;;  %v3251_v19 = vrot.slane %v3249_v60, 5  ;;  %v4475_v27 = vcombine.low %v5903_v52, %v5912_v17  ;;  %v3255_v47 = vrot.slane %v3253_v11, 4  ;;  %v3092_v24 = vld [vmem:[#allocation2 + $0xcc] sm:$0xf]  ;;  %v4749_v60 = vld [vmem:[#allocation2 + $0xc0] sm:$0xff]  }
 0x156   : > { %v4443_v16 = vcombine.low %v2424_v61, %v2434_v6  ;;  %v1786_v37 = vpop.permute.xlu1 %1785  ;;  %2818 = vrot.lane.b32.xlu0 %v4467_v39, %s4792_s30  ;;  %v3261_v12 = vrot.slane %v3259_v54, 5  ;;  %v3434_v55 = vrot.slane %v3432_v3, 4  ;;  %v3246_v21 = vor.u32 %v3245_v18, %v3242_v59  ;;  %v3093_v62 = vld [vmem:[#allocation2 + $0xd0] sm:$0xf]  ;;  %v3094_v10 = vld [vmem:[#allocation2 + $0xd4] sm:$0x1] }
 0x157   : > { %1822 = vst.msk [vmem:[#allocation3 + $0x60] sm:$0xff] %vm1809_vm11, %v1786_v37  ;;  %v3435_v53 = vshll.u32 %v3089_v50, 16  ;;  %v3441_v26 = vshll.u32 %v3090_v9, 16  ;;  %v3445_v25 = vshrl.u32 %v3090_v9, 16  ;;  %v3256_v32 = vor.u32 %v3255_v47, %v3251_v19  ;;  %v3610_v28 = vld [vmem:[#allocation2 + $0x60] sm:$0xe] }
 0x158   : > { %2513 = vrot.lane.b32.xlu1 %v4443_v16, %s4793_s5  ;;  %v1772_v49 = vpop.permute.xlu0 %1771  ;;  %v3451_v34 = vshll.u32 %v3091_v5, 16  ;;  %v3264_v35 = vshrl.u32 %v3068_v22, 16  ;;  %v3267_v8 = vshll.u32 %v3068_v22, 16  ;;  %v3247_v36 = vrot.slane %v3246_v21, 4  ;;  %v3612_v9 = vld [vmem:[#allocation2 + $0x68] sm:$0x1] }
 0x159   : > { %1815 = vst.msk [vmem:[#allocation3 + $0x28] sm:$0xff] %vm1809_vm11, %v1772_v49  ;;  %v3437_v38 = vrot.slane %v3435_v53, 5  ;;  %v3443_v15 = vrot.slane %v3441_v26, 5  ;;  %v3447_v30 = vrot.slane %v3445_v25, 4  ;;  %v3257_v43 = vrot.slane %v3256_v32, 4  ;;  %v4752_v53 = vld [vmem:[#allocation2 + $0xcc] sm:$0xff]  }
 0x15a   : > { %v1788_v44 = vpop.permute.xlu1 %1787  ;;  %2994 = vrot.lane.b32.xlu0 %v4748_v51, %s4794_s6  ;;  %v3453_v13 = vrot.slane %v3451_v34, 5  ;;  %v3266_v40 = vrot.slane %v3264_v35, 4  ;;  %v3269_v33 = vrot.slane %v3267_v8, 5  ;;  %v3252_v14 = vsel %vm4887_vm8, %v3247_v36, %v3251_v19  ;;  %v3613_v21 = vld [vmem:[#allocation2 + $0x6c] sm:$0xe] }
 0x15b   : > { %1823 = vst.msk [vmem:[#allocation3 + $0x68] sm:$0xff] %vm1809_vm11, %v1788_v44  ;;  %v3438_v56 = vor.u32 %v3437_v38, %v3434_v55  ;;  %v3448_v61 = vor.u32 %v3447_v30, %v3443_v15  ;;  %v3273_v31 = vshll.u32 %v3069_v29, 16  ;;  %v3262_v0 = vsel %vm4887_vm8, %v3257_v43, %v3261_v12  ;;  %v3634_v32 = vld [vmem:[#allocation2 + $0xc0] sm:$0xe]  ;;  %v3636_v34 = vld [vmem:[#allocation2 + $0xc8] sm:$0x1] }
 0x15c   : > { %2832 = vrot.lane.b32.xlu1 %v4474_v57, %s4792_s30  ;;  %v1947_v46 = vpop.permute.xlu0 %1946  ;;  %v3270_v23 = vor.u32 %v3269_v33, %v3266_v40  ;;  %v3277_v45 = vshrl.u32 %v3069_v29, 16  ;;  %v3283_v20 = vshll.u32 %v3070_v1, 16  ;;  %v3611_v57 = vld [vmem:[#allocation2 + $0x64] sm:$0xf]  ;;  %v4498_v52 = vcombine.low %v3252_v14, %v3262_v0  ;;  %v3614_v38 = vld [vmem:[#allocation2 + $0x70] sm:$0xf] }
 0x15d   : > { %1991 = vst.msk [vmem:[#allocation3 + $0x20] sm:$0xff] %vm1986_vm12, %v1947_v46  ;;  %v3439_v50 = vrot.slane %v3438_v56, 4  ;;  %v3449_v63 = vrot.slane %v3448_v61, 4  ;;  %v3275_v7 = vrot.slane %v3273_v31, 5  ;;  %v3456_v59 = vshrl.u32 %v3092_v24, 16 }
 0x15e   : > { %v1963_v39 = vpop.permute.xlu1 %1962  ;;  %2996 = vrot.lane.b32.xlu0 %v4750_v41, %s4794_s6  ;;  %v3271_v48 = vrot.slane %v3270_v23, 4  ;;  %v3279_v58 = vrot.slane %v3277_v45, 4  ;;  %v3285_v6 = vrot.slane %v3283_v20, 5  ;;  %v3459_v11 = vshll.u32 %v3092_v24, 16  ;;  %v3615_v43 = vld [vmem:[#allocation2 + $0x74] sm:$0x1] }
 0x15f   : > { %1999 = vst.msk [vmem:[#allocation3 + $0x60] sm:$0xff] %vm1986_vm12, %v1963_v39  ;;  %v3444_v4 = vsel %vm4887_vm8, %v3439_v50, %v3443_v15  ;;  %v3465_v54 = vshll.u32 %v3093_v62, 16  ;;  %v3454_v3 = vsel %vm4887_vm8, %v3449_v63, %v3453_v13  ;;  %v3458_v18 = vrot.slane %v3456_v59, 4  ;;  %v3638_v13 = vld [vmem:[#allocation2 + $0xd0] sm:$0xf] }
 0x160   : > { %2834 = vrot.lane.b32.xlu1 %v4475_v27, %s4792_s30  ;;  %v3276_v16 = vsel %vm4887_vm8, %v3271_v48, %v3275_v7  ;;  %v3280_v17 = vor.u32 %v3279_v58, %v3275_v7  ;;  %v3461_v19 = vrot.slane %v3459_v11, 5  ;;  %v3469_v22 = vshrl.u32 %v3093_v62, 16  ;;  %v3635_v27 = vld [vmem:[#allocation2 + $0xc4] sm:$0xf]  ;;  %v3637_v7 = vld [vmem:[#allocation2 + $0xcc] sm:$0xe] }
 0x161   : > { %v3467_v5 = vrot.slane %v3465_v54, 5  ;;  %v3475_v37 = vshll.u32 %v3094_v10, 16  ;;  %v4514_v47 = vrot.slane %v3610_v28, 9  ;;  %v3732_v12 = vrot.slane %v3611_v57, 5  ;;  %v3639_v57 = vld [vmem:[#allocation2 + $0xd4] sm:$0x1] }
 0x162   : > { %3539 = vrot.lane.b32.xlu0 %v4498_v52, %s4795_s7  ;;  %v3281_v51 = vrot.slane %v3280_v17, 4  ;;  %v3735_v55 = vrot.slane %v3612_v9, 5  ;;  %v4506_v26 = vcombine.low %v3444_v4, %v3454_v3  ;;  %v3462_v25 = vor.u32 %v3461_v19, %v3458_v18 }
 0x163   : > { %v3471_v49 = vrot.slane %v3469_v22, 4  ;;  %v3733_v35 = vsel %vm4854_vm4, %v4514_v47, %v3732_v12  ;;  %v3734_v8 = vrot.slane %v3732_v12, 4  ;;  %v3788_v36 = vrot.slane %v3635_v27, 5 }
 0x164   : > { %3010 = vrot.lane.b32.xlu1 %v4749_v60, %s4794_s6  ;;  %v3286_v29 = vsel %vm4887_vm8, %v3281_v51, %v3285_v6  ;;  %v1949_v15 = vpop.permute.xlu0 %1948  ;;  %v3463_v1 = vrot.slane %v3462_v25, 4  ;;  %v3477_v41 = vrot.slane %v3475_v37, 5  ;;  %v4522_v33 = vrot.slane %v3634_v32, 9 }
 0x165   : > { %v4499_v30 = vcombine.low %v3276_v16, %v3286_v29  ;;  %v3472_v44 = vor.u32 %v3471_v49, %v3467_v5  ;;  %1992 = vst.msk [vmem:[#allocation3 + $0x28] sm:$0xff] %vm1986_vm12, %v1949_v15  ;;  %v3736_v40 = vsel %vm4854_vm4, %v3734_v8, %v3735_v55  ;;  %v3791_v14 = vrot.slane %v3636_v34, 5 }
 0x166   : > { %v4515_v56 = vrot.slane %v3613_v21, 9  ;;  %v1965_v61 = vpop.permute.xlu1 %1964  ;;  %v4530_v24 = vcombine.low %v3733_v35, %v3736_v40  ;;  %v3790_v46 = vrot.slane %v3788_v36, 4  ;;  %v3739_v0 = vrot.slane %v3614_v38, 5 }
 0x167   : > { %3541 = vrot.lane.b32.xlu0 %v4499_v30, %s4795_s7  ;;  %v3473_v31 = vrot.slane %v3472_v44, 4  ;;  %2000 = vst.msk [vmem:[#allocation3 + $0x68] sm:$0xff] %vm1986_vm12, %v1965_v61  ;;  %v3468_v23 = vsel %vm4887_vm8, %v3463_v1, %v3467_v5  ;;  %v3742_v45 = vrot.slane %v3615_v43, 5  ;;  %v3795_v20 = vrot.slane %v3638_v13, 5 }
 0x168   : > { %3012 = vrot.lane.b32.xlu1 %v4752_v53, %s4794_s6  ;;  %v2492_v62 = vpop.permute.xlu0 %2491  ;;  %v3740_v50 = vsel %vm4854_vm4, %v4515_v56, %v3739_v0  ;;  %v3741_v63 = vrot.slane %v3739_v0, 4  ;;  %v3789_v39 = vsel %vm4854_vm4, %v4522_v33, %v3788_v36  ;;  %v3792_v42 = vsel %vm4854_vm4, %v3790_v46, %v3791_v14 }
 0x169   : > { %v3478_v10 = vsel %vm4887_vm8, %v3473_v31, %v3477_v41  ;;  %2536 = vst.msk [vmem:[#allocation3 + $0x20] sm:$0xff] %vm2531_vm13, %v2492_v62  ;;  %v4523_v28 = vrot.slane %v3637_v7, 9  ;;  %v3797_v60 = vrot.slane %v3795_v20, 4  ;;  %v3798_v4 = vrot.slane %v3639_v57, 5 }
 0x16a   : > { %v2508_v52 = vpop.permute.xlu1 %2507  ;;  %v4507_v48 = vcombine.low %v3468_v23, %v3478_v10  ;;  %v3743_v58 = vsel %vm4854_vm4, %v3741_v63, %v3742_v45  ;;  %v4538_v6 = vcombine.low %v3789_v39, %v3792_v42 }
 0x16b   : > { %3860 = vrot.lane.b32.xlu0 %v4530_v24, %s4796_s8  ;;  %2544 = vst.msk [vmem:[#allocation3 + $0x60] sm:$0xff] %vm2531_vm13, %v2508_v52  ;;  %v4531_v59 = vcombine.low %v3740_v50, %v3743_v58  ;;  %v3796_v11 = vsel %vm4854_vm4, %v4523_v28, %v3795_v20  ;;  %v3799_v54 = vsel %vm4854_vm4, %v3797_v60, %v3798_v4 }
 0x16c   : > { %3555 = vrot.lane.b32.xlu1 %v4506_v26, %s4795_s7  ;;  %v4539_v3 = vcombine.low %v3796_v11, %v3799_v54 }
 0x16f   : > { %3862 = vrot.lane.b32.xlu0 %v4531_v59, %s4796_s8 }
 0x170   : > { %3557 = vrot.lane.b32.xlu1 %v4507_v48, %s4795_s7  ;;  %v2494_v9 = vpop.permute.xlu0 %2493 }
 0x171   : > { %2537 = vst.msk [vmem:[#allocation3 + $0x28] sm:$0xff] %vm2531_vm13, %v2494_v9 }
 0x173   : > { %v2510_v16 = vpop.permute.xlu1 %2509 }
 0x174   : > { %3876 = vrot.lane.b32.xlu1 %v4538_v6, %s4796_s8  ;;  %2545 = vst.msk [vmem:[#allocation3 + $0x68] sm:$0xff] %vm2531_vm13, %v2510_v16  ;;  %v2813_v17 = vpop.permute.xlu0 %2812 }
 0x175   : > { %2857 = vst.msk [vmem:[#allocation3 + $0x20] sm:$0xff] %vm2852_vm14, %v2813_v17 }
 0x177   : > { %v2829_v18 = vpop.permute.xlu1 %2828 }
 0x178   : > { %3878 = vrot.lane.b32.xlu1 %v4539_v3, %s4796_s8  ;;  %2865 = vst.msk [vmem:[#allocation3 + $0x60] sm:$0xff] %vm2852_vm14, %v2829_v18  ;;  %v2815_v19 = vpop.permute.xlu0 %2814 }
 0x179   : > { %2858 = vst.msk [vmem:[#allocation3 + $0x28] sm:$0xff] %vm2852_vm14, %v2815_v19 }
 0x17b   : > { %v2831_v2 = vpop.permute.xlu1 %2830 }
 0x17c   : > { %2866 = vst.msk [vmem:[#allocation3 + $0x68] sm:$0xff] %vm2852_vm14, %v2831_v2  ;;  %v2991_v5 = vpop.permute.xlu0 %2990 }
 0x17d   : > { %3035 = vst.msk [vmem:[#allocation3 + $0x20] sm:$0xff] %vm3030_vm15, %v2991_v5 }
 0x17f   : > { %v3007_v22 = vpop.permute.xlu1 %3006 }
 0x180   : > { %3043 = vst.msk [vmem:[#allocation3 + $0x60] sm:$0xff] %vm3030_vm15, %v3007_v22 }
 0x183   : > { %v2993_v37 = vpop.permute.xlu0 %2992 }
 0x184   : > { %3036 = vst.msk [vmem:[#allocation3 + $0x28] sm:$0xff] %vm3030_vm15, %v2993_v37 }
 0x186   : > { %v3009_v27 = vpop.permute.xlu1 %3008 }
 0x187   : > { %3044 = vst.msk [vmem:[#allocation3 + $0x68] sm:$0xff] %vm3030_vm15, %v3009_v27  ;;  %v3536_v51 = vpop.permute.xlu0 %3535 }
 0x188   : > { %3580 = vst.msk [vmem:[#allocation3 + $0x20] sm:$0xff] %vm3575_vm2, %v3536_v51 }
 0x18a   : > { %v3552_v47 = vpop.permute.xlu1 %3551 }
 0x18b   : > { %3588 = vst.msk [vmem:[#allocation3 + $0x60] sm:$0xff] %vm3575_vm2, %v3552_v47 }
 0x191   : > { %v3538_v12 = vpop.permute.xlu0 %3537 }
 0x192   : > { %3581 = vst.msk [vmem:[#allocation3 + $0x28] sm:$0xff] %vm3575_vm2, %v3538_v12  ;;  %v3554_v55 = vpop.permute.xlu1 %3553 }
 0x193   : > { %3589 = vst.msk [vmem:[#allocation3 + $0x68] sm:$0xff] %vm3575_vm2, %v3554_v55 }
 0x195   : > { %v3857_v21 = vpop.permute.xlu0 %3856 }
 0x196   : > { %3901 = vst.msk [vmem:[#allocation3 + $0x20] sm:$0xff] %vm3896_vm3, %v3857_v21  ;;  %v3873_v53 = vpop.permute.xlu1 %3872 }
 0x197   : > { %3909 = vst.msk [vmem:[#allocation3 + $0x60] sm:$0xff] %vm3896_vm3, %v3873_v53 }
 0x19b   : > { %v1450_v26 = vpop.permute.xlu0 %1449 }
 0x19c   : > { %1492 = vst.msk [vmem:[#allocation3 + $0x30] sm:$0xff] %vm1485_vm10, %v1450_v26 }
 0x19d   : > { %v3917_v25 = vld [vmem:[#allocation3 + $0x20] sm:$0xff]  ;;  %v1466_v49 = vpop.permute.xlu1 %1465 }
 0x19e   : > { %4644 = vmatprep.mubr.msk.bf16.mxu0 %vm3949_vm5, %v3917_v25  ;;  %v3925_v32 = vld [vmem:[#allocation3 + $0x60] sm:$0xff]  ;;  %1500 = vst.msk [vmem:[#allocation3 + $0x70] sm:$0xff] %vm1485_vm10, %v1466_v49 }
 0x19f   : > { %v3859_v34 = vpop.permute.xlu0 %3858  ;;  %4660 = vmatprep.mubr.msk.bf16.mxu1 %vm3949_vm5, %v3925_v32 }
 0x1a0   : > { %3902 = vst.msk [vmem:[#allocation3 + $0x28] sm:$0xff] %vm3896_vm3, %v3859_v34 }
 0x1a1   : > { %v3875_v29 = vpop.permute.xlu1 %3874 }
 0x1a2   : > { %3910 = vst.msk [vmem:[#allocation3 + $0x68] sm:$0xff] %vm3896_vm3, %v3875_v29 }
 0x1a7   : > { %v1452_v35 = vpop.permute.xlu0 %1451  ;;  %v3918_v8 = vld [vmem:[#allocation3 + $0x28] sm:$0xff] }
 0x1a8   : > { %1493 = vst.msk [vmem:[#allocation3 + $0x38] sm:$0xff] %vm1485_vm10, %v1452_v35  ;;  %4645 = vmatmul.mubr.msk.bf16.gmra.mrb[8].mxu0 %vm3949_vm5, %v3918_v8 }
 0x1a9   : > { %v3926_v38 = vld [vmem:[#allocation3 + $0x68] sm:$0xff] }
 0x1aa   : > { %v1468_v36 = vpop.permute.xlu1 %1467  ;;  %4661 = vmatmul.mubr.msk.bf16.gmra.mrb[8].mxu1 %vm3949_vm5, %v3926_v38 }
 0x1ab   : > { %1501 = vst.msk [vmem:[#allocation3 + $0x78] sm:$0xff] %vm1485_vm10, %v1468_v36  ;;  %v1774_v15 = vpop.permute.xlu0 %1773 }
 0x1ac   : > { %1816 = vst.msk [vmem:[#allocation3 + $0x30] sm:$0xff] %vm1809_vm11, %v1774_v15 }
 0x1ae   : > { %v1790_v30 = vpop.permute.xlu1 %1789 }
 0x1af   : > { %1824 = vst.msk [vmem:[#allocation3 + $0x70] sm:$0xff] %vm1809_vm11, %v1790_v30  ;;  %v1776_v1 = vpop.permute.xlu0 %1775 }
 0x1b0   : > { %1817 = vst.msk [vmem:[#allocation3 + $0x38] sm:$0xff] %vm1809_vm11, %v1776_v1 }
 0x1b2   : > { %v1792_v44 = vpop.permute.xlu1 %1791 }
 0x1b3   : > { %1825 = vst.msk [vmem:[#allocation3 + $0x78] sm:$0xff] %vm1809_vm11, %v1792_v44  ;;  %v1951_v41 = vpop.permute.xlu0 %1950 }
 0x1b4   : > { %1993 = vst.msk [vmem:[#allocation3 + $0x30] sm:$0xff] %vm1986_vm12, %v1951_v41 }
 0x1b6   : > { %v1967_v43 = vpop.permute.xlu1 %1966 }
 0x1b7   : > { %2001 = vst.msk [vmem:[#allocation3 + $0x70] sm:$0xff] %vm1986_vm12, %v1967_v43  ;;  %v1953_v13 = vpop.permute.xlu0 %1952 }
 0x1b8   : > { %1994 = vst.msk [vmem:[#allocation3 + $0x38] sm:$0xff] %vm1986_vm12, %v1953_v13 }
 0x1ba   : > { %v1969_v40 = vpop.permute.xlu1 %1968 }
 0x1bb   : > { %2002 = vst.msk [vmem:[#allocation3 + $0x78] sm:$0xff] %vm1986_vm12, %v1969_v40  ;;  %v2496_v33 = vpop.permute.xlu0 %2495 }
 0x1bc   : > { %2538 = vst.msk [vmem:[#allocation3 + $0x30] sm:$0xff] %vm2531_vm13, %v2496_v33 }
 0x1be   : > { %v2512_v14 = vpop.permute.xlu1 %2511 }
 0x1bf   : > { %2546 = vst.msk [vmem:[#allocation3 + $0x70] sm:$0xff] %vm2531_vm13, %v2512_v14 }
 0x1c0   : > { %v2498_v56 = vpop.permute.xlu0 %2497 }
 0x1c1   : > { %2539 = vst.msk [vmem:[#allocation3 + $0x38] sm:$0xff] %vm2531_vm13, %v2498_v56 }
 0x1c4   : > { %v2817_v61 = vpop.permute.xlu0 %2816 }
 0x1c5   : > { %2859 = vst.msk [vmem:[#allocation3 + $0x30] sm:$0xff] %vm2852_vm14, %v2817_v61 }
 0x1c8   : > { %v2819_v31 = vpop.permute.xlu0 %2818 }
 0x1c9   : > { %2860 = vst.msk [vmem:[#allocation3 + $0x38] sm:$0xff] %vm2852_vm14, %v2819_v31 }
 0x1ca   : > { %v2514_v24 = vpop.permute.xlu1 %2513 }
 0x1cb   : > { %2547 = vst.msk [vmem:[#allocation3 + $0x78] sm:$0xff] %vm2531_vm13, %v2514_v24 }
 0x1cc   : > { %v2995_v46 = vpop.permute.xlu0 %2994 }
 0x1cd   : > { %3037 = vst.msk [vmem:[#allocation3 + $0x30] sm:$0xff] %vm3030_vm15, %v2995_v46 }
 0x1ce   : > { %v2833_v0 = vpop.permute.xlu1 %2832 }
 0x1cf   : > { %2867 = vst.msk [vmem:[#allocation3 + $0x70] sm:$0xff] %vm2852_vm14, %v2833_v0 }
 0x1d0   : > { %v2997_v23 = vpop.permute.xlu0 %2996 }
 0x1d1   : > { %3038 = vst.msk [vmem:[#allocation3 + $0x38] sm:$0xff] %vm3030_vm15, %v2997_v23 }
 0x1d2   : > { %v2835_v45 = vpop.permute.xlu1 %2834 }
 0x1d3   : > { %2868 = vst.msk [vmem:[#allocation3 + $0x78] sm:$0xff] %vm2852_vm14, %v2835_v45 }
 0x1d4   : > { %v3540_v20 = vpop.permute.xlu0 %3539 }
 0x1d5   : > { %3582 = vst.msk [vmem:[#allocation3 + $0x30] sm:$0xff] %vm3575_vm2, %v3540_v20 }
 0x1d6   : > { %v3011_v62 = vpop.permute.xlu1 %3010 }
 0x1d7   : > { %3045 = vst.msk [vmem:[#allocation3 + $0x70] sm:$0xff] %vm3030_vm15, %v3011_v62 }
 0x1d9   : > { %v3542_v50 = vpop.permute.xlu0 %3541 }
 0x1da   : > { %v3013_v10 = vpop.permute.xlu1 %3012  ;;  %3583 = vst.msk [vmem:[#allocation3 + $0x38] sm:$0xff] %vm3575_vm2, %v3542_v50 }
 0x1db   : > { %3046 = vst.msk [vmem:[#allocation3 + $0x78] sm:$0xff] %vm3030_vm15, %v3013_v10 }
 0x1dd   : > { %v3861_v7 = vpop.permute.xlu0 %3860 }
 0x1de   : > { %v3556_v63 = vpop.permute.xlu1 %3555  ;;  %3903 = vst.msk [vmem:[#allocation3 + $0x30] sm:$0xff] %vm3896_vm3, %v3861_v7 }
 0x1df   : > { %3590 = vst.msk [vmem:[#allocation3 + $0x70] sm:$0xff] %vm3575_vm2, %v3556_v63 }
 0x1e1   : > { %v3863_v39 = vpop.permute.xlu0 %3862 }
 0x1e2   : > { %v3558_v57 = vpop.permute.xlu1 %3557  ;;  %3904 = vst.msk [vmem:[#allocation3 + $0x38] sm:$0xff] %vm3896_vm3, %v3863_v39 }
 0x1e3   : > { %3591 = vst.msk [vmem:[#allocation3 + $0x78] sm:$0xff] %vm3575_vm2, %v3558_v57 }
 0x1e5   : > { %v3919_v48 = vld [vmem:[#allocation3 + $0x30] sm:$0xff] }
 0x1e6   : > { %v3877_v52 = vpop.permute.xlu1 %3876  ;;  %4648 = vmatprep.mubr.msk.bf16.mxu0 %vm3949_vm5, %v3919_v48 }
 0x1e7   : > { %3911 = vst.msk [vmem:[#allocation3 + $0x70] sm:$0xff] %vm3896_vm3, %v3877_v52 }
 0x1e8   : > { %v4638_v59 = vpop.f32.mrb[0].mxu0 }
 0x1e9   : > { %v3920_v58 = vld [vmem:[#allocation3 + $0x38] sm:$0xff]  ;;  %4165 = vst [vmem:[%s6032_s28 + $0x10] sm:$0xff] %v4638_v59  ;;  %v4036_v28 = vpop.f32.mrb[1].mxu0  ;;  %v4654_v60 = vpop.f32.mrb[0].mxu1 }
 0x1ea   : > { %v3879_v42 = vpop.permute.xlu1 %3878  ;;  %4649 = vmatmul.mubr.msk.bf16.gmra.mrb[12].mxu0 %vm3949_vm5, %v3920_v58  ;;  %4163 = vst [vmem:[%s6032_s28] sm:$0xff] %v4036_v28  ;;  %v4639_v4 = vpop.f32.mrb[2].mxu0  ;;  %4181 = vst [vmem:[%s6032_s28 + $0x90] sm:$0xff] %v4654_v60 }
 0x1eb   : > { %3912 = vst.msk [vmem:[#allocation3 + $0x78] sm:$0xff] %vm3896_vm3, %v3879_v42  ;;  %v4100_v6 = vpop.f32.mrb[1].mxu1  ;;  %4166 = vst [vmem:[%s6032_s28 + $0x18] sm:$0xff] %v4639_v4  ;;  %v4039_v11 = vpop.f32.mrb[3].mxu0 }
 0x1ec   : > { %4179 = vst [vmem:[%s6032_s28 + $0x80] sm:$0xff] %v4100_v6  ;;  %v4655_v54 = vpop.f32.mrb[2].mxu1  ;;  %4164 = vst [vmem:[%s6032_s28 + $0x8] sm:$0xff] %v4039_v11 }
 0x1ed   : > { %4182 = vst [vmem:[%s6032_s28 + $0x98] sm:$0xff] %v4655_v54  ;;  %v4103_v3 = vpop.f32.mrb[3].mxu1 }
 0x1ee   : > { %v3927_v9 = vld [vmem:[#allocation3 + $0x70] sm:$0xff]  ;;  %4180 = vst [vmem:[%s6032_s28 + $0x88] sm:$0xff] %v4103_v3 }
 0x1ef   : > { %4664 = vmatprep.mubr.msk.bf16.mxu1 %vm3949_vm5, %v3927_v9 }
 0x1f2   : > { %v3928_v16 = vld [vmem:[#allocation3 + $0x78] sm:$0xff] }
 0x1f3   : > { %4665 = vmatmul.mubr.msk.bf16.gmra.mrb[12].mxu1 %vm3949_vm5, %v3928_v16 }
 0x223   : > { %v4642_v17 = vpop.f32.mrb[4].mxu0 }
 0x224   : > { %4169 = vst [vmem:[%s6032_s28 + $0x30] sm:$0xff] %v4642_v17  ;;  %v4052_v18 = vpop.f32.mrb[5].mxu0 }
 0x225   : > { %4167 = vst [vmem:[%s6032_s28 + $0x20] sm:$0xff] %v4052_v18  ;;  %v4643_v19 = vpop.f32.mrb[6].mxu0 }
 0x226   : > { %4170 = vst [vmem:[%s6032_s28 + $0x38] sm:$0xff] %v4643_v19  ;;  %v4055_v2 = vpop.f32.mrb[7].mxu0  ;;  %v4658_v5 = vpop.f32.mrb[4].mxu1 }
 0x227   : > { %4168 = vst [vmem:[%s6032_s28 + $0x28] sm:$0xff] %v4055_v2  ;;  %4185 = vst [vmem:[%s6032_s28 + $0xb0] sm:$0xff] %v4658_v5  ;;  %v4116_v22 = vpop.f32.mrb[5].mxu1 }
 0x228   : > { %4183 = vst [vmem:[%s6032_s28 + $0xa0] sm:$0xff] %v4116_v22  ;;  %v4659_v37 = vpop.f32.mrb[6].mxu1 }
 0x229   : > { %4186 = vst [vmem:[%s6032_s28 + $0xb8] sm:$0xff] %v4659_v37  ;;  %v4119_v27 = vpop.f32.mrb[7].mxu1 }
 0x22a   : > { %4184 = vst [vmem:[%s6032_s28 + $0xa8] sm:$0xff] %v4119_v27 }
 0x27b   : > { %v4646_v51 = vpop.f32.mrb[8].mxu0 }
 0x27c   : > { %4173 = vst [vmem:[%s6032_s28 + $0x50] sm:$0xff] %v4646_v51  ;;  %v4068_v47 = vpop.f32.mrb[9].mxu0 }
 0x27d   : > { %4171 = vst [vmem:[%s6032_s28 + $0x40] sm:$0xff] %v4068_v47  ;;  %v4647_v12 = vpop.f32.mrb[10].mxu0  ;;  %v4662_v21 = vpop.f32.mrb[8].mxu1 }
 0x27e   : > { %4174 = vst [vmem:[%s6032_s28 + $0x58] sm:$0xff] %v4647_v12  ;;  %v4071_v55 = vpop.f32.mrb[11].mxu0  ;;  %4189 = vst [vmem:[%s6032_s28 + $0xd0] sm:$0xff] %v4662_v21  ;;  %v4132_v53 = vpop.f32.mrb[9].mxu1 }
 0x27f   : > { %4172 = vst [vmem:[%s6032_s28 + $0x48] sm:$0xff] %v4071_v55  ;;  %4187 = vst [vmem:[%s6032_s28 + $0xc0] sm:$0xff] %v4132_v53  ;;  %v4663_v26 = vpop.f32.mrb[10].mxu1 }
 0x280   : > { %4190 = vst [vmem:[%s6032_s28 + $0xd8] sm:$0xff] %v4663_v26  ;;  %v4135_v25 = vpop.f32.mrb[11].mxu1 }
 0x281   : > { %4188 = vst [vmem:[%s6032_s28 + $0xc8] sm:$0xff] %v4135_v25 }
 0x2bd   : > { %v4650_v49 = vpop.f32.mrb[12].mxu0 }
 0x2be   : > { %4177 = vst [vmem:[%s6032_s28 + $0x70] sm:$0xff] %v4650_v49  ;;  %v4084_v32 = vpop.f32.mrb[13].mxu0 }
 0x2bf   : > { %4175 = vst [vmem:[%s6032_s28 + $0x60] sm:$0xff] %v4084_v32  ;;  %v4651_v34 = vpop.f32.mrb[14].mxu0 }
 0x2c0   : > { %4178 = vst [vmem:[%s6032_s28 + $0x78] sm:$0xff] %v4651_v34  ;;  %v4087_v29 = vpop.f32.mrb[15].mxu0 }
 0x2c1   : > { %4176 = vst [vmem:[%s6032_s28 + $0x68] sm:$0xff] %v4087_v29 }
 0x2c6   : > { %v4666_v35 = vpop.f32.mrb[12].mxu1 }
 0x2c7   : > { %4193 = vst [vmem:[%s6032_s28 + $0xf0] sm:$0xff] %v4666_v35  ;;  %v4148_v8 = vpop.f32.mrb[13].mxu1 }
 0x2c8   : > { %4191 = vst [vmem:[%s6032_s28 + $0xe0] sm:$0xff] %v4148_v8  ;;  %v4667_v36 = vpop.f32.mrb[14].mxu1 }
 0x2c9   : > { %4194 = vst [vmem:[%s6032_s28 + $0xf8] sm:$0xff] %v4667_v36  ;;  %v4151_v38 = vpop.f32.mrb[15].mxu1 }
 0x2ca   : > { %4192 = vst [vmem:[%s6032_s28 + $0xe8] sm:$0xff] %v4151_v38 }
 0x2cb PF: > { %s14_s17 = sadd.s32 1, %s4786_s17   ;;  %s6088_s15 = smov %s4782_s16 }
 0x2cc   : > { %p11_p5 = scmp.ge.s32.totalorder %s14_s17, 4   ;;  %s6089_s16 = smov %s6091_s18 }
 0x2ce   :  { %13 = sbr.rel (!%p11_p5) target bundleno = 2 (0x2), region = 76 }

</bundles_post_ra>
